<compile_context>
chip_gen: v6e
topology: v6e:2x2x1
jax: 0.10.0
libtpu: 0.0.40
codegen_flags: <defaults>
</compile_context>

<pallas_src>
import functools

import jax
import jax.numpy as jnp
from jax import lax
from jax.experimental import pallas as pl
from jax.experimental.pallas import tpu as pltpu

_NEG_INIT = -1e30


def _supcon_kernel(lbl_row_ref, lbl_col_ref, bias_col_ref, cnt_row_ref,
                   feat_row_ref, feat_col_ref, out_ref,
                   m_acc, d_acc, ps_acc, *,
                   tm, tn, inv_temp, loss_scale, bounded_logits):
    i = pl.program_id(0)          # row tile (parallel)
    j = pl.program_id(1)          # col tile (reduction axis)
    n_col_tiles = pl.num_programs(1)

    @pl.when(j == 0)
    def _init():
        if not bounded_logits:
            m_acc[...] = jnp.full_like(m_acc, _NEG_INIT)
        d_acc[...] = jnp.zeros_like(d_acc)
        ps_acc[...] = jnp.zeros_like(ps_acc)

    # NT matmul (contract last dims of both operands), f32 accumulate on MXU.
    s = lax.dot_general(feat_row_ref[...], feat_col_ref[...],
                        (((1,), (1,)), ((), ())),
                        preferred_element_type=jnp.float32) * inv_temp  # [tm, tn]

    # Self-contrast exclusion: the only per-element mask left in the hot loop.
    row_g = lax.broadcasted_iota(jnp.int32, (tm, tn), 0) + i * tm
    col_g = lax.broadcasted_iota(jnp.int32, (tm, tn), 1) + j * tn
    not_self = row_g != col_g

    # Positive mask rebuilt in-kernel from per-row labels (no N^2 mask input).
    # Padded columns may spuriously match a user label but contribute exactly 0
    # (zero feature rows -> s == 0), so no pad masking is needed here.
    pos = jnp.logical_and(lbl_row_ref[...] == lbl_col_ref[...], not_self)

    # Padded columns are dropped from the denominator by the additive bias.
    s_b = s + bias_col_ref[...]                       # bias = 0 or -1e30, [1, tn]
    s_valid = jnp.where(not_self, s_b, _NEG_INIT)

    if bounded_logits:
        # Opt-in fast path for bounded logits (e.g. L2-normalized features):
        # no running max, no per-tile XLU max reduction, no rescale.
        d_acc[...] += jnp.sum(jnp.exp(s_valid), axis=1, keepdims=True)
    else:
        # Online log-sum-exp over valid (non-self, non-padded) columns.
        m_old = m_acc[...]
        m_new = jnp.maximum(m_old, jnp.max(s_valid, axis=1, keepdims=True))
        p = jnp.exp(s_valid - m_new)                  # masked entries -> exp(-1e30) = 0
        d_acc[...] = d_acc[...] * jnp.exp(m_old - m_new) + jnp.sum(p, axis=1, keepdims=True)
        m_acc[...] = m_new

    # Exact positive-score sum (the row max cancels algebraically).
    ps_acc[...] += jnp.sum(jnp.where(pos, s, 0.0), axis=1, keepdims=True)

    @pl.when(j == n_col_tiles - 1)
    def _finalize():
        if bounded_logits:
            log_denom = jnp.log(d_acc[...])
        else:
            log_denom = m_acc[...] + jnp.log(d_acc[...])
        cnt = cnt_row_ref[...]                        # precomputed; 0 for padded rows
        mean_lp = ps_acc[...] / jnp.maximum(cnt, 1.0) - log_denom
        out_ref[...] = jnp.where(cnt > 0.0, -loss_scale * mean_lp, 0.0)  # [tm, 1]


def _round_up(x, m):
    return ((x + m - 1) // m) * m


def _vmem_cap_bytes():
    try:
        return int(pltpu.get_tpu_info().vmem_capacity_bytes)
    except Exception:
        return 64 * 1024 * 1024   # conservative (v7x per-TC physical)


def supcon_loss(features, labels=None, mask=None, *, temperature=0.07,
                base_temperature=0.07, contrast_mode="all",
                block_size=256, matmul_dtype=jnp.bfloat16,
                bounded_logits=False):
    """JAX/Pallas port of SupConLoss.forward (contrast_mode='all').

    features: [B, V, ...] (flattened to [B, V, D])
    labels:   optional [B] int labels; None -> SimCLR (eye mask).
    matmul_dtype:   bf16 by default (f32 accumulation / softmax math); pass
                    jnp.float32 for bit-faithful logits.
    bounded_logits: opt-in fast path when |dot|/temperature is bounded
                    (e.g. L2-normalized features) — drops the online max.
    """
    if features.ndim < 3:
        raise ValueError("`features` needs to be [bsz, n_views, ...]")
    if features.ndim > 3:
        features = features.reshape(features.shape[0], features.shape[1], -1)
    if contrast_mode != "all":
        # TODO(synk): contrast_mode='one' (B anchors vs N contrasts) not implemented.
        raise NotImplementedError("Only contrast_mode='all' is implemented.")

    B, V, D = features.shape
    N = B * V

    if labels is not None and mask is not None:
        raise ValueError("Cannot define both `labels` and `mask`")
    if mask is not None:
        # TODO(synk): arbitrary [B,B] contrastive masks would require streaming an
        # N^2 mask; only label-equality / SimCLR (eye) masks are implemented.
        raise NotImplementedError("Arbitrary `mask` not supported; pass `labels` or None.")
    if labels is None:
        row_labels_b = jnp.arange(B, dtype=jnp.int32)   # unique labels == eye mask
    else:
        labels = jnp.asarray(labels).reshape(-1)
        if labels.shape[0] != B:
            raise ValueError("Num of labels does not match num of features")
        row_labels_b = labels.astype(jnp.int32)

    tm = tn = int(block_size)
    n_pad = _round_up(max(N, tm), tm)
    d_pad = _round_up(D, 128)          # lane-dense feature tiles

    # Batch-major [N, D]; the loss is invariant to this row permutation vs.
    # torch's view-major cat(unbind) because the mask is built from per-row labels.
    contrast = features.reshape(N, D).astype(jnp.float32)
    if d_pad != D:
        contrast = jnp.pad(contrast, ((0, 0), (0, d_pad - D)))
    if n_pad != N:
        contrast = jnp.pad(contrast, ((0, n_pad - N), (0, 0)))
    contrast = contrast.astype(matmul_dtype)

    # Per-row labels (label of row k = labels[k // V]); -1 sentinel on pad rows.
    row_labels = jnp.repeat(row_labels_b, V)
    if n_pad != N:
        row_labels = jnp.pad(row_labels, (0, n_pad - N), constant_values=-1)
    lbl_rows = row_labels.reshape(n_pad, 1)
    lbl_cols = row_labels.reshape(1, n_pad)

    # Additive column bias: 0 on real columns, -1e30 on padded columns
    # (replaces per-tile pad iota/compare/where in the kernel).
    col_bias = jnp.where(jnp.arange(n_pad) < N, 0.0, _NEG_INIT
                         ).astype(jnp.float32).reshape(1, n_pad)

    # Per-row positive counts (label-only), computed outside the N^2 loop:
    # count = V * (#same-label samples in batch) - 1 (self excluded); 0 on pads.
    cnt_b = jnp.sum(row_labels_b[:, None] == row_labels_b[None, :],
                    axis=1).astype(jnp.float32)
    pos_cnt = jnp.repeat(V * cnt_b - 1.0, V)
    if n_pad != N:
        pos_cnt = jnp.pad(pos_cnt, (0, n_pad - N))
    pos_cnt = pos_cnt.reshape(n_pad, 1)

    grid = (n_pad // tm, n_pad // tn)

    kernel = functools.partial(
        _supcon_kernel, tm=tm, tn=tn,
        inv_temp=float(1.0 / temperature),
        loss_scale=float(temperature / base_temperature),
        bounded_logits=bool(bounded_logits))

    itemsize = contrast.dtype.itemsize
    # Double-buffered row/col feature tiles + small per-tile inputs + temporaries.
    vmem_est = (2 * (tm + tn) * d_pad * itemsize            # feature tiles (x2 bufs)
                + 2 * 2 * (2 * tm + 2 * tn) * 4             # labels / bias / counts
                + 8 * tm * tn * 4                           # s, masks, exp, etc.
                + 4 * tm * 4)                               # scratch + output tile
    vmem_cap = _vmem_cap_bytes()
    vmem_limit = int(min(max(2 * vmem_est, 32 * 1024 * 1024), int(vmem_cap * 0.85)))

    cost = pl.CostEstimate(
        flops=int(2 * n_pad * n_pad * d_pad),
        transcendentals=int(n_pad * n_pad),
        bytes_accessed=int((n_pad + grid[0] * n_pad) * d_pad * itemsize
                           + 4 * n_pad * 4))

    per_row = pl.pallas_call(
        kernel,
        out_shape=jax.ShapeDtypeStruct((n_pad, 1), jnp.float32),
        grid_spec=pltpu.PrefetchScalarGridSpec(
            num_scalar_prefetch=0,
            grid=grid,
            in_specs=[
                pl.BlockSpec((tm, 1), lambda i, j: (i, 0)),      # row labels
                pl.BlockSpec((1, tn), lambda i, j: (0, j)),      # col labels
                pl.BlockSpec((1, tn), lambda i, j: (0, j)),      # col pad bias
                pl.BlockSpec((tm, 1), lambda i, j: (i, 0)),      # row positive count
                pl.BlockSpec((tm, d_pad), lambda i, j: (i, 0)),  # feature row tile
                pl.BlockSpec((tn, d_pad), lambda i, j: (j, 0)),  # feature col tile
            ],
            out_specs=pl.BlockSpec((tm, 1), lambda i, j: (i, 0)),
            scratch_shapes=[pltpu.VMEM((tm, 1), jnp.float32)] * 3,  # m, d, ps
        ),
        compiler_params=pltpu.CompilerParams(
            dimension_semantics=("parallel", "arbitrary"),
            vmem_limit_bytes=vmem_limit),
        cost_estimate=cost,
    )(lbl_rows, lbl_cols, col_bias, pos_cnt, contrast, contrast)

    # loss.view(anchor_count, batch_size).mean() == sum over all N real rows / N
    return jnp.sum(per_row) / jnp.float32(N)


def _supcon_loss_ref(features, labels=None, temperature=0.07, base_temperature=0.07):
    """Pure-JAX reference mirroring the PyTorch code (contrast_mode='all')."""
    B, V, D = features.shape
    N = B * V
    if labels is None:
        base_mask = jnp.eye(B, dtype=jnp.float32)
    else:
        labels = labels.reshape(-1, 1)
        base_mask = (labels == labels.T).astype(jnp.float32)
    contrast = jnp.transpose(features, (1, 0, 2)).reshape(N, D).astype(jnp.float32)
    dot = (contrast @ contrast.T) / temperature
    logits = dot - jnp.max(dot, axis=1, keepdims=True)
    logits_mask = 1.0 - jnp.eye(N, dtype=jnp.float32)
    m = jnp.tile(base_mask, (V, V)) * logits_mask
    exp_logits = jnp.exp(logits) * logits_mask
    log_prob = logits - jnp.log(jnp.sum(exp_logits, axis=1, keepdims=True))
    mean_log_prob_pos = jnp.sum(m * log_prob, axis=1) / jnp.sum(m, axis=1)
    loss_vec = -(temperature / base_temperature) * mean_log_prob_pos
    return jnp.mean(loss_vec)


if __name__ == "__main__":
    key = jax.random.PRNGKey(0)
    B, V, D = 8, 2, 32  # batch, n_views, feature dim
    kf, kl = jax.random.split(key)

    feats = jax.random.normal(kf, (B, V, D), dtype=jnp.float32)
    feats = feats / jnp.linalg.norm(feats, axis=-1, keepdims=True)  # standard SupCon usage
    labels = jax.random.randint(kl, (B,), 0, 4)  # 4 classes -> guaranteed positives

    # Supervised path, f32 matmul: bit-level algorithm check vs. reference.
    loss_f32 = jax.block_until_ready(
        supcon_loss(feats, labels=labels, matmul_dtype=jnp.float32))
    ref_sup = _supcon_loss_ref(feats, labels)
    assert jnp.allclose(loss_f32, ref_sup, atol=1e-4, rtol=1e-4), (loss_f32, ref_sup)

    # Supervised path, default bf16 matmul: looser tolerance (logits rounding only).
    loss_bf16 = jax.block_until_ready(supcon_loss(feats, labels=labels))
    assert jnp.allclose(loss_bf16, ref_sup, atol=0.2, rtol=0.05), (loss_bf16, ref_sup)

    # Opt-in bounded-logits fast path (features are L2-normalized here).
    loss_fast = jax.block_until_ready(
        supcon_loss(feats, labels=labels, matmul_dtype=jnp.float32, bounded_logits=True))
    assert jnp.allclose(loss_fast, ref_sup, atol=1e-4, rtol=1e-4), (loss_fast, ref_sup)

    # SimCLR (labels=None, eye mask) path.
    loss_simclr = jax.block_until_ready(supcon_loss(feats, matmul_dtype=jnp.float32))
    ref_simclr = _supcon_loss_ref(feats, None)
    assert jnp.allclose(loss_simclr, ref_simclr, atol=1e-4, rtol=1e-4), (loss_simclr, ref_simclr)

    print("KERNEL_OK")
</pallas_src>

<mosaic_0001>
module attributes {stable_mosaic.version = 11 : i64} {
  func.func @_supcon_kernel(%arg0: i32, %arg1: i32, %arg2: memref<256x1xi32, #tpu.memory_space<vmem>>, %arg3: memref<1x256xi32, #tpu.memory_space<vmem>>, %arg4: memref<1x256xf32, #tpu.memory_space<vmem>>, %arg5: memref<256x1xf32, #tpu.memory_space<vmem>>, %arg6: memref<256x128xf32, #tpu.memory_space<vmem>>, %arg7: memref<256x128xf32, #tpu.memory_space<vmem>>, %arg8: memref<256x1xf32, #tpu.memory_space<vmem>>, %arg9: memref<256x1xf32, #tpu.memory_space<vmem>>, %arg10: memref<256x1xf32, #tpu.memory_space<vmem>>, %arg11: memref<256x1xf32, #tpu.memory_space<vmem>>) attributes {dimension_semantics = [#tpu.dimension_semantics<parallel>, #tpu.dimension_semantics<arbitrary>], iteration_bounds = array<i64: 1, 1>, scalar_prefetch = 0 : i64, scratch_operands = 3 : i64, tpu.core_type = #tpu.core_type<tc>, window_params = [{transform_indices = @transform_0, window_bounds = array<i64: 256, 1>}, {transform_indices = @transform_1, window_bounds = array<i64: 1, 256>}, {transform_indices = @transform_2, window_bounds = array<i64: 1, 256>}, {transform_indices = @transform_3, window_bounds = array<i64: 256, 1>}, {transform_indices = @transform_4, window_bounds = array<i64: 256, 128>}, {transform_indices = @transform_5, window_bounds = array<i64: 256, 128>}, {transform_indices = @transform_6, window_bounds = array<i64: 256, 1>}]} {
    %c0_i32 = arith.constant 0 : i32
    %0 = arith.cmpi eq, %arg1, %c0_i32 : i32
    %1 = arith.extui %0 : i1 to i32
    %c0_i32_0 = arith.constant 0 : i32
    %2 = arith.cmpi ne, %1, %c0_i32_0 : i32
    scf.if %2 {
      %cst_31 = arith.constant -1.000000e+30 : f32
      %54 = vector.broadcast %cst_31 : f32 to vector<256x1xf32>
      %c0_32 = arith.constant 0 : index
      %c0_33 = arith.constant 0 : index
      %55 = vector.load %arg9[%c0_32, %c0_33] : memref<256x1xf32, #tpu.memory_space<vmem>>, vector<256x1xf32>
      tpu.vector_store %arg9[%c0_32, %c0_33], %54 {strides = array<i32>} : memref<256x1xf32, #tpu.memory_space<vmem>>, vector<256x1xf32>,
      %cst_34 = arith.constant 0.000000e+00 : f32
      %56 = vector.broadcast %cst_34 : f32 to vector<256x1xf32>
      %c0_35 = arith.constant 0 : index
      %c0_36 = arith.constant 0 : index
      %57 = vector.load %arg10[%c0_35, %c0_36] : memref<256x1xf32, #tpu.memory_space<vmem>>, vector<256x1xf32>
      tpu.vector_store %arg10[%c0_35, %c0_36], %56 {strides = array<i32>} : memref<256x1xf32, #tpu.memory_space<vmem>>, vector<256x1xf32>,
      %cst_37 = arith.constant 0.000000e+00 : f32
      %58 = vector.broadcast %cst_37 : f32 to vector<256x1xf32>
      %c0_38 = arith.constant 0 : index
      %c0_39 = arith.constant 0 : index
      %59 = vector.load %arg11[%c0_38, %c0_39] : memref<256x1xf32, #tpu.memory_space<vmem>>, vector<256x1xf32>
      tpu.vector_store %arg11[%c0_38, %c0_39], %58 {strides = array<i32>} : memref<256x1xf32, #tpu.memory_space<vmem>>, vector<256x1xf32>,
    } else {
    }
    %c0 = arith.constant 0 : index
    %c0_1 = arith.constant 0 : index
    %3 = vector.load %arg6[%c0, %c0_1] : memref<256x128xf32, #tpu.memory_space<vmem>>, vector<256x128xf32>
    %c0_2 = arith.constant 0 : index
    %c0_3 = arith.constant 0 : index
    %4 = vector.load %arg7[%c0_2, %c0_3] : memref<256x128xf32, #tpu.memory_space<vmem>>, vector<256x128xf32>
    %cst = arith.constant dense<0.000000e+00> : vector<256x256xf32>
    %5 = tpu.matmul %3, %4, %cst {dimension_numbers = #tpu.dot_dimension_numbers<[1], [1], [0], [0], [0, 0, 1, 0], [], []>} : vector<256x128xf32>, vector<256x128xf32>, vector<256x256xf32> -> vector<256x256xf32>
    %cst_4 = arith.constant 14.2857141 : f32
    %6 = vector.broadcast %cst_4 : f32 to vector<256x256xf32>
    %7 = arith.mulf %5, %6 : vector<256x256xf32>
    %8 = tpu.iota {dimensions = array<i32: 0>} : vector<256x256xi32>
    %c256_i32 = arith.constant 256 : i32
    %9 = arith.muli %arg0, %c256_i32 : i32
    %10 = vector.broadcast %9 : i32 to vector<256x256xi32>
    %11 = arith.addi %8, %10 : vector<256x256xi32>
    %12 = tpu.iota {dimensions = array<i32: 1>} : vector<256x256xi32>
    %c256_i32_5 = arith.constant 256 : i32
    %13 = arith.muli %arg1, %c256_i32_5 : i32
    %14 = vector.broadcast %13 : i32 to vector<256x256xi32>
    %15 = arith.addi %12, %14 : vector<256x256xi32>
    %16 = arith.cmpi ne, %11, %15 : vector<256x256xi32>
    %c0_6 = arith.constant 0 : index
    %c0_7 = arith.constant 0 : index
    %17 = vector.load %arg2[%c0_6, %c0_7] : memref<256x1xi32, #tpu.memory_space<vmem>>, vector<256x1xi32>
    %c0_8 = arith.constant 0 : index
    %c0_9 = arith.constant 0 : index
    %18 = vector.load %arg3[%c0_8, %c0_9] : memref<1x256xi32, #tpu.memory_space<vmem>>, vector<1x256xi32>
    %19 = vector.broadcast %17 : vector<256x1xi32> to vector<256x256xi32>
    %20 = vector.broadcast %18 : vector<1x256xi32> to vector<256x256xi32>
    %21 = arith.cmpi eq, %19, %20 : vector<256x256xi32>
    %22 = arith.andi %21, %16 : vector<256x256xi1>
    %c0_10 = arith.constant 0 : index
    %c0_11 = arith.constant 0 : index
    %23 = vector.load %arg4[%c0_10, %c0_11] : memref<1x256xf32, #tpu.memory_space<vmem>>, vector<1x256xf32>
    %24 = vector.broadcast %23 : vector<1x256xf32> to vector<256x256xf32>
    %25 = arith.addf %7, %24 : vector<256x256xf32>
    %cst_12 = arith.constant -1.000000e+30 : f32
    %26 = vector.broadcast %cst_12 : f32 to vector<256x256xf32>
    %27 = arith.select %16, %25, %26 : vector<256x256xi1>, vector<256x256xf32>
    %c0_13 = arith.constant 0 : index
    %c0_14 = arith.constant 0 : index
    %28 = vector.load %arg9[%c0_13, %c0_14] : memref<256x1xf32, #tpu.memory_space<vmem>>, vector<256x1xf32>
    %cst_15 = arith.constant dense<0xFF800000> : vector<256xf32>
    %29 = vector.multi_reduction <maximumf>, %27, %cst_15 [1] : vector<256x256xf32> to vector<256xf32>
    %30 = vector.shape_cast %29 : vector<256xf32> to vector<256x1xf32>
    %31 = arith.maximumf %28, %30 : vector<256x1xf32>
    %32 = vector.broadcast %31 : vector<256x1xf32> to vector<256x256xf32>
    %33 = arith.subf %27, %32 : vector<256x256xf32>
    %34 = math.exp %33 : vector<256x256xf32>
    %c0_16 = arith.constant 0 : index
    %c0_17 = arith.constant 0 : index
    %35 = vector.load %arg10[%c0_16, %c0_17] : memref<256x1xf32, #tpu.memory_space<vmem>>, vector<256x1xf32>
    %36 = arith.subf %28, %31 : vector<256x1xf32>
    %37 = math.exp %36 : vector<256x1xf32>
    %38 = arith.mulf %35, %37 : vector<256x1xf32>
    %cst_18 = arith.constant dense<0.000000e+00> : vector<256xf32>
    %39 = vector.multi_reduction <add>, %34, %cst_18 [1] : vector<256x256xf32> to vector<256xf32>
    %40 = vector.shape_cast %39 : vector<256xf32> to vector<256x1xf32>
    %41 = arith.addf %38, %40 : vector<256x1xf32>
    %c0_19 = arith.constant 0 : index
    %c0_20 = arith.constant 0 : index
    %42 = vector.load %arg10[%c0_19, %c0_20] : memref<256x1xf32, #tpu.memory_space<vmem>>, vector<256x1xf32>
    tpu.vector_store %arg10[%c0_19, %c0_20], %41 {strides = array<i32>} : memref<256x1xf32, #tpu.memory_space<vmem>>, vector<256x1xf32>,
    %c0_21 = arith.constant 0 : index
    %c0_22 = arith.constant 0 : index
    %43 = vector.load %arg9[%c0_21, %c0_22] : memref<256x1xf32, #tpu.memory_space<vmem>>, vector<256x1xf32>
    tpu.vector_store %arg9[%c0_21, %c0_22], %31 {strides = array<i32>} : memref<256x1xf32, #tpu.memory_space<vmem>>, vector<256x1xf32>,
    %c0_23 = arith.constant 0 : index
    %c0_24 = arith.constant 0 : index
    %44 = vector.load %arg11[%c0_23, %c0_24] : memref<256x1xf32, #tpu.memory_space<vmem>>, vector<256x1xf32>
    %cst_25 = arith.constant 0.000000e+00 : f32
    %45 = vector.broadcast %cst_25 : f32 to vector<256x256xf32>
    %46 = arith.select %22, %7, %45 : vector<256x256xi1>, vector<256x256xf32>
    %cst_26 = arith.constant dense<0.000000e+00> : vector<256xf32>
    %47 = vector.multi_reduction <add>, %46, %cst_26 [1] : vector<256x256xf32> to vector<256xf32>
    %48 = vector.shape_cast %47 : vector<256xf32> to vector<256x1xf32>
    %49 = arith.addf %44, %48 : vector<256x1xf32>
    %c0_27 = arith.constant 0 : index
    %c0_28 = arith.constant 0 : index
    %50 = vector.load %arg11[%c0_27, %c0_28] : memref<256x1xf32, #tpu.memory_space<vmem>>, vector<256x1xf32>
    tpu.vector_store %arg11[%c0_27, %c0_28], %49 {strides = array<i32>} : memref<256x1xf32, #tpu.memory_space<vmem>>, vector<256x1xf32>,
    %c0_i32_29 = arith.constant 0 : i32
    %51 = arith.cmpi eq, %arg1, %c0_i32_29 : i32
    %52 = arith.extui %51 : i1 to i32
    %c0_i32_30 = arith.constant 0 : i32
    %53 = arith.cmpi ne, %52, %c0_i32_30 : i32
    scf.if %53 {
      %c0_31 = arith.constant 0 : index
      %c0_32 = arith.constant 0 : index
      %54 = vector.load %arg9[%c0_31, %c0_32] : memref<256x1xf32, #tpu.memory_space<vmem>>, vector<256x1xf32>
      %c0_33 = arith.constant 0 : index
      %c0_34 = arith.constant 0 : index
      %55 = vector.load %arg10[%c0_33, %c0_34] : memref<256x1xf32, #tpu.memory_space<vmem>>, vector<256x1xf32>
      %56 = math.log %55 : vector<256x1xf32>
      %57 = arith.addf %54, %56 : vector<256x1xf32>
      %c0_35 = arith.constant 0 : index
      %c0_36 = arith.constant 0 : index
      %58 = vector.load %arg5[%c0_35, %c0_36] : memref<256x1xf32, #tpu.memory_space<vmem>>, vector<256x1xf32>
      %c0_37 = arith.constant 0 : index
      %c0_38 = arith.constant 0 : index
      %59 = vector.load %arg11[%c0_37, %c0_38] : memref<256x1xf32, #tpu.memory_space<vmem>>, vector<256x1xf32>
      %cst_39 = arith.constant 1.000000e+00 : f32
      %60 = vector.broadcast %cst_39 : f32 to vector<256x1xf32>
      %61 = arith.maximumf %58, %60 : vector<256x1xf32>
      %62 = arith.divf %59, %61 : vector<256x1xf32>
      %63 = arith.subf %62, %57 : vector<256x1xf32>
      %cst_40 = arith.constant 0.000000e+00 : f32
      %64 = vector.broadcast %cst_40 : f32 to vector<256x1xf32>
      %65 = arith.cmpf ogt, %58, %64 : vector<256x1xf32>
      %cst_41 = arith.constant -1.000000e+00 : f32
      %66 = vector.broadcast %cst_41 : f32 to vector<256x1xf32>
      %67 = arith.mulf %66, %63 : vector<256x1xf32>
      %cst_42 = arith.constant 0.000000e+00 : f32
      %68 = vector.broadcast %cst_42 : f32 to vector<256x1xf32>
      %69 = arith.select %65, %67, %68 : vector<256x1xi1>, vector<256x1xf32>
      %c0_43 = arith.constant 0 : index
      %c0_44 = arith.constant 0 : index
      %70 = vector.load %arg8[%c0_43, %c0_44] : memref<256x1xf32, #tpu.memory_space<vmem>>, vector<256x1xf32>
      tpu.vector_store %arg8[%c0_43, %c0_44], %69 {strides = array<i32>} : memref<256x1xf32, #tpu.memory_space<vmem>>, vector<256x1xf32>,
    } else {
    }
    return
  }
  func.func @transform_0(%arg0: i32, %arg1: i32) -> (i32, i32) {
    %c0_i32 = arith.constant 0 : i32
    %c0_i32_0 = arith.constant 0 : i32
    return %arg0, %c0_i32 : i32, i32
  }
  func.func @transform_1(%arg0: i32, %arg1: i32) -> (i32, i32) {
    %c0_i32 = arith.constant 0 : i32
    %c0_i32_0 = arith.constant 0 : i32
    return %c0_i32, %arg1 : i32, i32
  }
  func.func @transform_2(%arg0: i32, %arg1: i32) -> (i32, i32) {
    %c0_i32 = arith.constant 0 : i32
    %c0_i32_0 = arith.constant 0 : i32
    return %c0_i32, %arg1 : i32, i32
  }
  func.func @transform_3(%arg0: i32, %arg1: i32) -> (i32, i32) {
    %c0_i32 = arith.constant 0 : i32
    %c0_i32_0 = arith.constant 0 : i32
    return %arg0, %c0_i32 : i32, i32
  }
  func.func @transform_4(%arg0: i32, %arg1: i32) -> (i32, i32) {
    %c0_i32 = arith.constant 0 : i32
    %c0_i32_0 = arith.constant 0 : i32
    return %arg0, %c0_i32 : i32, i32
  }
  func.func @transform_5(%arg0: i32, %arg1: i32) -> (i32, i32) {
    %c0_i32 = arith.constant 0 : i32
    %c0_i32_0 = arith.constant 0 : i32
    return %arg1, %c0_i32 : i32, i32
  }
  func.func @transform_6(%arg0: i32, %arg1: i32) -> (i32, i32) {
    %c0_i32 = arith.constant 0 : i32
    %c0_i32_0 = arith.constant 0 : i32
    return %arg0, %c0_i32 : i32, i32
  }
}

</mosaic_0001>

<bundles_post_ra>
// kernel: tpu_custom_call.1
= control target key start
LH: loop header
LB: loop body
LE: loop exit
PB: predicated region body
PF: predicated region fallthrough
CT: control target
= control target key end

     0   :  { %v3115_v3 = vmov 0   ;;  %vm6004_vm15 = vcmask 7168   ;;  %s5997_s5 = inlined_call_operand.vmem [shape: f32[256,128], index: 5, kind: input, shape index: {}]   ;;  %s5998_s0 = inlined_call_operand.vmem [shape: s32[256,1], index: 0, kind: input, shape index: {}]   ;;  %s5999_s4 = inlined_call_operand.vmem [shape: f32[256,128], index: 4, kind: input, shape index: {}]   ;;  %s6000_s1 = inlined_call_operand.vmem [shape: s32[1,256], index: 1, kind: input, shape index: {}]   ;;  %s6001_s2 = inlined_call_operand.vmem [shape: f32[1,256], index: 2, kind: input, shape index: {}]   ;;  %s6002_s3 = inlined_call_operand.vmem [shape: f32[256,1], index: 3, kind: input, shape index: {}]   ;;  %s6003_s6 = inlined_call_operand.vmem [shape: f32[256,1], index: 6, kind: output, shape index: {}]  }
   0x1   :  { %v187_v0 = vld [vmem:[%s5997_s5 + $0xf8] sm:$0xff]  ;;  %v186_v2 = vld [vmem:[%s5997_s5 + $0xf0] sm:$0xff]  ;;  %2792 = vset.pattern.permute.xlu1 %v3115_v3  ;;  %2791 = vset.pattern.permute.xlu0 %v3115_v3  ;;  %v185_v5 = vld [vmem:[%s5997_s5 + $0xe8] sm:$0xff] }
   0x2   :  { %v171_v1 = vld [vmem:[%s5997_s5 + $0x78] sm:$0xff]  ;;  %2660 = vmatprep.subr.mxu0 %v187_v0  ;;  %2756 = vmatprep.subr.mxu1 %v187_v0  ;;  %v170_v4 = vld [vmem:[%s5997_s5 + $0x70] sm:$0xff]  ;;  %v169_v6 = vld [vmem:[%s5997_s5 + $0x68] sm:$0xff] }
   0x3   :  { %2661 = vmatpush3.xpose.msra.mxu0 %v171_v1  ;;  %2772 = vmatpush3.xpose.msra.mxu1 %v171_v1  ;;  %v184_v7 = vld [vmem:[%s5997_s5 + $0xe0] sm:$0xff]  ;;  %v649_v8 = vld [vmem:[%s5998_s0 + $0x10] sm:$0xff]  ;;  %v183_v11 = vld [vmem:[%s5997_s5 + $0xd8] sm:$0xff] }
   0x4   :  { %2662 = vmatprep.subr.mxu0 %v186_v2  ;;  %2757 = vmatprep.subr.mxu1 %v186_v2  ;;  %v647_v9 = vld [vmem:[%s5998_s0] sm:$0xff]  ;;  %v650_v14 = vld [vmem:[%s5998_s0 + $0x18] sm:$0xff]  ;;  %v648_v15 = vld [vmem:[%s5998_s0 + $0x8] sm:$0xff] }
   0x5   :  { %v168_v10 = vld [vmem:[%s5997_s5 + $0x60] sm:$0xff]  ;;  %687 = vperm.xlu1 %2792, %v649_v8   ;;  %681 = vperm.xlu0 %2791, %v647_v9   ;;  %v167_v16 = vld [vmem:[%s5997_s5 + $0x58] sm:$0xff]  ;;  %v182_v17 = vld [vmem:[%s5997_s5 + $0xd0] sm:$0xff] }
   0x6   :  { %v3189_v12 = vld [vmem:[%s5999_s4] sm:$0xff]  ;;  %v652_v18 = vld [vmem:[%s5998_s0 + $0x28] sm:$0xff]  ;;  %v166_v20 = vld [vmem:[%s5997_s5 + $0x50] sm:$0xff] }
   0x7   :  { %2663 = vmatpush3.xpose.msra.mxu0 %v170_v4  ;;  %2773 = vmatpush3.xpose.msra.mxu1 %v170_v4  ;;  %v3194_v13 = vld [vmem:[%s5999_s4 + $0x80] sm:$0xff]  ;;  %v181_v21 = vld [vmem:[%s5997_s5 + $0xc8] sm:$0xff]  ;;  %v654_v22 = vld [vmem:[%s5998_s0 + $0x38] sm:$0xff] }
   0x8   :  { %2664 = vmatprep.subr.mxu0 %v185_v5  ;;  %2758 = vmatprep.subr.mxu1 %v185_v5  ;;  %v651_v19 = vld [vmem:[%s5998_s0 + $0x20] sm:$0xff]  ;;  %v653_v23 = vld [vmem:[%s5998_s0 + $0x30] sm:$0xff]  ;;  %v165_v24 = vld [vmem:[%s5997_s5 + $0x48] sm:$0xff] }
   0x9   :  { %2692 = vmatprep.mubr.f32.mxu0 %v3189_v12  ;;  %2724 = vmatprep.mubr.f32.mxu1 %v3194_v13  ;;  %v180_v25 = vld [vmem:[%s5997_s5 + $0xc0] sm:$0xff]  ;;  %v656_v26 = vld [vmem:[%s5998_s0 + $0x48] sm:$0xff]  ;;  %v179_v29 = vld [vmem:[%s5997_s5 + $0xb8] sm:$0xff] }
   0xa   :  { %690 = vperm.xlu1 %2792, %v650_v14   ;;  %684 = vperm.xlu0 %2791, %v648_v15   ;;  %v655_v27 = vld [vmem:[%s5998_s0 + $0x40] sm:$0xff]  ;;  %v658_v30 = vld [vmem:[%s5998_s0 + $0x58] sm:$0xff]  ;;  %v657_v31 = vld [vmem:[%s5998_s0 + $0x50] sm:$0xff] }
   0xb   :  { %2665 = vmatpush3.xpose.msra.mxu0 %v169_v6  ;;  %2774 = vmatpush3.xpose.msra.mxu1 %v169_v6  ;;  %v164_v28 = vld [vmem:[%s5997_s5 + $0x40] sm:$0xff]  ;;  %v163_v32 = vld [vmem:[%s5997_s5 + $0x38] sm:$0xff]  ;;  %v178_v33 = vld [vmem:[%s5997_s5 + $0xb0] sm:$0xff] }
   0xc   :  { %2666 = vmatprep.subr.mxu0 %v184_v7  ;;  %2759 = vmatprep.subr.mxu1 %v184_v7  ;;  %v660_v34 = vld [vmem:[%s5998_s0 + $0x68] sm:$0xff]  ;;  %v659_v35 = vld [vmem:[%s5998_s0 + $0x60] sm:$0xff]  ;;  %v162_v36 = vld [vmem:[%s5997_s5 + $0x30] sm:$0xff] }
   0xd   :  { %v177_v37 = vld [vmem:[%s5997_s5 + $0xa8] sm:$0xff]  ;;  %v662_v38 = vld [vmem:[%s5998_s0 + $0x78] sm:$0xff]  ;;  %v661_v39 = vld [vmem:[%s5998_s0 + $0x70] sm:$0xff] }
   0xe   :  { %696 = vperm.xlu1 %2792, %v652_v18   ;;  %693 = vperm.xlu0 %2791, %v651_v19   ;;  %v161_v40 = vld [vmem:[%s5997_s5 + $0x28] sm:$0xff]  ;;  %v176_v41 = vld [vmem:[%s5997_s5 + $0xa0] sm:$0xff]  ;;  %v175_v45 = vld [vmem:[%s5997_s5 + $0x98] sm:$0xff] }
   0xf   :  { %2667 = vmatpush3.xpose.msra.mxu0 %v168_v10  ;;  %2775 = vmatpush3.xpose.msra.mxu1 %v168_v10  ;;  %v664_v42 = vld [vmem:[%s5998_s0 + $0x88] sm:$0xff]  ;;  %v663_v43 = vld [vmem:[%s5998_s0 + $0x80] sm:$0xff]  ;;  %v666_v46 = vld [vmem:[%s5998_s0 + $0x98] sm:$0xff] }
  0x10   :  { %2668 = vmatprep.subr.mxu0 %v183_v11  ;;  %2760 = vmatprep.subr.mxu1 %v183_v11  ;;  %v160_v44 = vld [vmem:[%s5997_s5 + $0x20] sm:$0xff]  ;;  %v665_v47 = vld [vmem:[%s5998_s0 + $0x90] sm:$0xff]  ;;  %v159_v48 = vld [vmem:[%s5997_s5 + $0x18] sm:$0xff] }
  0x11   :  { %v174_v49 = vld [vmem:[%s5997_s5 + $0x90] sm:$0xff]  ;;  %v668_v50 = vld [vmem:[%s5998_s0 + $0xa8] sm:$0xff]  ;;  %v667_v51 = vld [vmem:[%s5998_s0 + $0xa0] sm:$0xff] }
  0x12   :  { %702 = vperm.xlu1 %2792, %v654_v22   ;;  %699 = vperm.xlu0 %2791, %v653_v23   ;;  %v158_v52 = vld [vmem:[%s5997_s5 + $0x10] sm:$0xff]  ;;  %v173_v53 = vld [vmem:[%s5997_s5 + $0x88] sm:$0xff]  ;;  %v670_v54 = vld [vmem:[%s5998_s0 + $0xb8] sm:$0xff] }
  0x13   :  { %2669 = vmatpush3.xpose.msra.mxu0 %v167_v16  ;;  %2776 = vmatpush3.xpose.msra.mxu1 %v167_v16  ;;  %v669_v55 = vld [vmem:[%s5998_s0 + $0xb0] sm:$0xff]  ;;  %v157_v56 = vld [vmem:[%s5997_s5 + $0x8] sm:$0xff]  ;;  %v172_v57 = vld [vmem:[%s5997_s5 + $0x80] sm:$0xff] }
  0x14   :  { %2670 = vmatprep.subr.mxu0 %v182_v17  ;;  %2761 = vmatprep.subr.mxu1 %v182_v17  ;;  %v672_v58 = vld [vmem:[%s5998_s0 + $0xc8] sm:$0xff]  ;;  %v671_v59 = vld [vmem:[%s5998_s0 + $0xc0] sm:$0xff]  ;;  %v674_v61 = vld [vmem:[%s5998_s0 + $0xd8] sm:$0xff] }
  0x15   :  { %v156_v60 = vld [vmem:[%s5997_s5] sm:$0xff]  ;;  %v673_v62 = vld [vmem:[%s5998_s0 + $0xd0] sm:$0xff]  ;;  %v125_v63 = vld [vmem:[%s5999_s4 + $0x8] sm:$0xff] }
  0x16   :  { %708 = vperm.xlu1 %2792, %v656_v26   ;;  %705 = vperm.xlu0 %2791, %v655_v27   ;;  %v141_v0 = vld [vmem:[%s5999_s4 + $0x88] sm:$0xff]  ;;  %v675_v2 = vld [vmem:[%s5998_s0 + $0xe0] sm:$0xff]  ;;  %v126_v3 = vld [vmem:[%s5999_s4 + $0x10] sm:$0xff] }
  0x17   :  { %2671 = vmatpush3.xpose.msra.mxu0 %v166_v20  ;;  %2777 = vmatpush3.xpose.msra.mxu1 %v166_v20  ;;  %v676_v1 = vld [vmem:[%s5998_s0 + $0xe8] sm:$0xff]  ;;  %v142_v4 = vld [vmem:[%s5999_s4 + $0x90] sm:$0xff]  ;;  %v678_v5 = vld [vmem:[%s5998_s0 + $0xf8] sm:$0xff] }
  0x18   :  { %2672 = vmatprep.subr.mxu0 %v181_v21  ;;  %2762 = vmatprep.subr.mxu1 %v181_v21  ;;  %v677_v6 = vld [vmem:[%s5998_s0 + $0xf0] sm:$0xff]  ;;  %v127_v7 = vld [vmem:[%s5999_s4 + $0x18] sm:$0xff]  ;;  %v128_v9 = vld [vmem:[%s5999_s4 + $0x20] sm:$0xff] }
  0x19   :  { %v143_v8 = vld [vmem:[%s5999_s4 + $0x98] sm:$0xff]  ;;  %v144_v10 = vld [vmem:[%s5999_s4 + $0xa0] sm:$0xff]  ;;  %v129_v11 = vld [vmem:[%s5999_s4 + $0x28] sm:$0xff] }
  0x1a   :  { %714 = vperm.xlu1 %2792, %v658_v30   ;;  %711 = vperm.xlu0 %2791, %v657_v31   ;;  %v146_v14 = vld [vmem:[%s5999_s4 + $0xb0] sm:$0xff]  ;;  %v131_v15 = vld [vmem:[%s5999_s4 + $0x38] sm:$0xff]  ;;  %v132_v17 = vld [vmem:[%s5999_s4 + $0x40] sm:$0xff] }
  0x1b   :  { %2673 = vmatpush3.xpose.msra.mxu0 %v165_v24  ;;  %2778 = vmatpush3.xpose.msra.mxu1 %v165_v24  ;;  %v147_v16 = vld [vmem:[%s5999_s4 + $0xb8] sm:$0xff]  ;;  %v148_v18 = vld [vmem:[%s5999_s4 + $0xc0] sm:$0xff]  ;;  %v133_v19 = vld [vmem:[%s5999_s4 + $0x48] sm:$0xff] }
  0x1c   :  { %2674 = vmatprep.subr.mxu0 %v180_v25  ;;  %2763 = vmatprep.subr.mxu1 %v180_v25  ;;  %v149_v20 = vld [vmem:[%s5999_s4 + $0xc8] sm:$0xff]  ;;  %v134_v21 = vld [vmem:[%s5999_s4 + $0x50] sm:$0xff]  ;;  %v135_v23 = vld [vmem:[%s5999_s4 + $0x58] sm:$0xff] }
  0x1d   :  { %v150_v22 = vld [vmem:[%s5999_s4 + $0xd0] sm:$0xff]  ;;  %v151_v24 = vld [vmem:[%s5999_s4 + $0xd8] sm:$0xff]  ;;  %v136_v25 = vld [vmem:[%s5999_s4 + $0x60] sm:$0xff] }
  0x1e   :  { %720 = vperm.xlu1 %2792, %v660_v34   ;;  %717 = vperm.xlu0 %2791, %v659_v35   ;;  %v152_v26 = vld [vmem:[%s5999_s4 + $0xe0] sm:$0xff]  ;;  %v137_v27 = vld [vmem:[%s5999_s4 + $0x68] sm:$0xff]  ;;  %v154_v30 = vld [vmem:[%s5999_s4 + $0xf0] sm:$0xff] }
  0x1f   :  { %2675 = vmatpush3.xpose.msra.mxu0 %v164_v28  ;;  %2779 = vmatpush3.xpose.msra.mxu1 %v164_v28  ;;  %v153_v28 = vld [vmem:[%s5999_s4 + $0xe8] sm:$0xff]  ;;  %v139_v31 = vld [vmem:[%s5999_s4 + $0x78] sm:$0xff] }
  0x20   :  { %2676 = vmatprep.subr.mxu0 %v179_v29  ;;  %2764 = vmatprep.subr.mxu1 %v179_v29  ;;  %v138_v29 = vld [vmem:[%s5999_s4 + $0x70] sm:$0xff] }
  0x22   :  { %726 = vperm.xlu1 %2792, %v662_v38   ;;  %723 = vperm.xlu0 %2791, %v661_v39  }
  0x23   :  { %2677 = vmatpush3.xpose.msra.mxu0 %v163_v32  ;;  %2780 = vmatpush3.xpose.msra.mxu1 %v163_v32  ;;  %v155_v32 = vld [vmem:[%s5999_s4 + $0xf8] sm:$0xff] }
  0x24   :  { %2678 = vmatprep.subr.mxu0 %v178_v33  ;;  %2765 = vmatprep.subr.mxu1 %v178_v33 }
  0x26   :  { %732 = vperm.xlu1 %2792, %v664_v42   ;;  %729 = vperm.xlu0 %2791, %v663_v43  }
  0x27   :  { %2679 = vmatpush3.xpose.msra.mxu0 %v162_v36  ;;  %2781 = vmatpush3.xpose.msra.mxu1 %v162_v36 }
  0x28   :  { %2680 = vmatprep.subr.mxu0 %v177_v37  ;;  %2766 = vmatprep.subr.mxu1 %v177_v37  ;;  %v509_v37 = vlaneseq }
  0x2a   :  { %738 = vperm.xlu1 %2792, %v666_v46   ;;  %735 = vperm.xlu0 %2791, %v665_v47  }
  0x2b   :  { %2681 = vmatpush3.xpose.msra.mxu0 %v161_v40  ;;  %2782 = vmatpush3.xpose.msra.mxu1 %v161_v40  ;;  %v3461_v40 = vshrl.u32 %v509_v37, 7 }
  0x2c   :  { %2682 = vmatprep.subr.mxu0 %v176_v41  ;;  %2767 = vmatprep.subr.mxu1 %v176_v41 }
  0x2d   :  { %v778_v43 = vsub.s32 0, %v3461_v40  ;;  %v3478_v47 = vadd.s32 88, %v3461_v40 }
  0x2e   :  { %744 = vperm.xlu1 %2792, %v668_v50   ;;  %741 = vperm.xlu0 %2791, %v667_v51   ;;  %v3488_v50 = vadd.s32 96, %v3461_v40 }
  0x2f   :  { %2683 = vmatpush3.xpose.msra.mxu0 %v160_v44  ;;  %2783 = vmatpush3.xpose.msra.mxu1 %v160_v44  ;;  %v3471_v44 = vld [vmem:[%s6000_s1] sm:$0x3]  ;;  %6137 = vst [vmem:[#allocation6_spill] sm:$0xff] %v3478_v47 }
  0x30   :  { %2684 = vmatprep.subr.mxu0 %v175_v45  ;;  %2768 = vmatprep.subr.mxu1 %v175_v45  ;;  %6138 = vst [vmem:[#allocation7_spill] sm:$0xff] %v3488_v50 }
  0x32   :  { %750 = vperm.xlu1 %2792, %v670_v54   ;;  %747 = vperm.xlu0 %2791, %v669_v55   ;;  %v6142_v54 = vmov 0  ;;  %v3511_v55 = vadd.s32 112, %v3461_v40 }
  0x33   :  { %2685 = vmatpush3.xpose.msra.mxu0 %v159_v48  ;;  %2784 = vmatpush3.xpose.msra.mxu1 %v159_v48  ;;  %v3483_v48 = vrot.slane %v3471_v44, %v778_v43 }
  0x34   :  { %2686 = vmatprep.subr.mxu0 %v174_v49  ;;  %2769 = vmatprep.subr.mxu1 %v174_v49  ;;  %v3485_v49 = vand.u32 127, %v509_v37  ;;  %6145 = vst [vmem:[#allocation12_spill] sm:$0xff] %v3511_v55  ;;  %v3780_v37 = vadd.s32 224, %v3461_v40 }
  0x36   :  { %756 = vperm.xlu1 %2792, %v672_v58   ;;  %753 = vperm.xlu0 %2791, %v671_v59   ;;  %vm6015_vm0 = vcmp.ne.s32.totalorder %v3478_v47, %v3485_v49  ;;  %vm6014_vm3 = vcmp.ne.s32.totalorder %v3488_v50, %v3485_v49  ;;  %v3520_v58 = vadd.s32 120, %v3461_v40  ;;  %v6149_v59 = vmov 0  ;;  %6163 = vst [vmem:[#allocation22_spill] sm:$0xff] %v3780_v37 }
  0x37   :  { %2687 = vmatpush3.xpose.msra.mxu0 %v158_v52  ;;  %2785 = vmatpush3.xpose.msra.mxu1 %v158_v52  ;;  %vm6009_vm9 = vcmp.ne.s32.totalorder %v3511_v55, %v3485_v49 }
  0x38   :  { %2688 = vmatprep.subr.mxu0 %v173_v53  ;;  %2770 = vmatprep.subr.mxu1 %v173_v53  ;;  %v3497_v53 = vadd.s32 104, %v3461_v40  ;;  %6148 = vst [vmem:[#allocation15_spill] sm:$0xff] %v3520_v58  ;;  %vm6006_vm10 = vcmp.ne.s32.totalorder %v3520_v58, %v3485_v49  ;;  %v3795_v58 = vadd.s32 64, %v3461_v40 }
  0x3a   :  { %762 = vperm.xlu1 %2792, %v674_v61   ;;  %759 = vperm.xlu0 %2791, %v673_v62   ;;  %6141 = vst [vmem:[#allocation10_spill] sm:$0xff] %v3497_v53  ;;  %vm6012_vm4 = vcmp.ne.s32.totalorder %v3497_v53, %v3485_v49  ;;  %v3802_v53 = vadd.s32 240, %v3461_v40 }
  0x3b   :  { %2689 = vmatpush3.xpose.msra.mxu0 %v157_v56  ;;  %2786 = vmatpush3.xpose.msra.mxu1 %v157_v56 }
  0x3c   :  { %2690 = vmatprep.subr.mxu0 %v172_v57  ;;  %2771 = vmatprep.subr.mxu1 %v172_v57  ;;  %6166 = vst [vmem:[#allocation25_spill] sm:$0xff] %v3802_v53 }
  0x3e   :  { %768 = vperm.xlu1 %2792, %v676_v1   ;;  %765 = vperm.xlu0 %2791, %v675_v2   ;;  %v3116_v1 = vmov 0.0   ;;  %v782_v2 = vsub.s32 1, %v3461_v40 }
  0x3f   :  { %2691 = vmatpush3.xpose.msra.mxu0 %v156_v60  ;;  %2787 = vmatpush3.xpose.msra.mxu1 %v156_v60  ;;  %v6152_v60 = vmov 0  ;;  %92 = vst.msk [vmem:[#allocation4] sm:$0xff] %vm6004_vm15, %v3116_v1  ;;  %60 = vst.msk [vmem:[#allocation3] sm:$0xff] %vm6004_vm15, %v3116_v1 }
  0x40   :  { %61 = vst.msk [vmem:[#allocation3 + $0x8] sm:$0xff] %vm6004_vm15, %v3116_v1  ;;  %62 = vst.msk [vmem:[#allocation3 + $0x10] sm:$0xff] %vm6004_vm15, %v3116_v1 }
  0x41   :  { %63 = vst.msk [vmem:[#allocation3 + $0x18] sm:$0xff] %vm6004_vm15, %v3116_v1  ;;  %64 = vst.msk [vmem:[#allocation3 + $0x20] sm:$0xff] %vm6004_vm15, %v3116_v1 }
  0x42   :  { %2693 = vmatmul.mubr.f32.vlgmr.msra.gmra.mxu0 %v3189_v12  ;;  %2725 = vmatmul.mubr.f32.vlgmr.msra.gmra.mxu1 %v3194_v13  ;;  %v145_v12 = vld [vmem:[%s5999_s4 + $0xa8] sm:$0xff]  ;;  %v130_v13 = vld [vmem:[%s5999_s4 + $0x30] sm:$0xff]  ;;  %65 = vst.msk [vmem:[#allocation3 + $0x28] sm:$0xff] %vm6004_vm15, %v3116_v1  ;;  %66 = vst.msk [vmem:[#allocation3 + $0x30] sm:$0xff] %vm6004_vm15, %v3116_v1 }
  0x43   :  { %2694 = vmatprep.mubr.f32.mxu0 %v125_v63  ;;  %2726 = vmatprep.mubr.f32.mxu1 %v141_v0  ;;  %67 = vst.msk [vmem:[#allocation3 + $0x38] sm:$0xff] %vm6004_vm15, %v3116_v1  ;;  %68 = vst.msk [vmem:[#allocation3 + $0x40] sm:$0xff] %vm6004_vm15, %v3116_v1 }
  0x44   :  { %774 = vperm.xlu1 %2792, %v678_v5   ;;  %771 = vperm.xlu0 %2791, %v677_v6   ;;  %69 = vst.msk [vmem:[#allocation3 + $0x48] sm:$0xff] %vm6004_vm15, %v3116_v1  ;;  %70 = vst.msk [vmem:[#allocation3 + $0x50] sm:$0xff] %vm6004_vm15, %v3116_v1  ;;  %v3702_v5 = vadd.s32 8, %v3461_v40  ;;  %v912_v6 = vld [vmem:[%s6001_s2] sm:$0x3] }
  0x45   :  { %71 = vst.msk [vmem:[#allocation3 + $0x58] sm:$0xff] %vm6004_vm15, %v3116_v1  ;;  %72 = vst.msk [vmem:[#allocation3 + $0x60] sm:$0xff] %vm6004_vm15, %v3116_v1 }
  0x46   :  { %2695 = vmatmul.mubr.f32.gmra.mxu0 %v125_v63  ;;  %2727 = vmatmul.mubr.f32.gmra.mxu1 %v141_v0  ;;  %v6157_v63 = vmov 0  ;;  %v6160_v0 = vmov 0  ;;  %73 = vst.msk [vmem:[#allocation3 + $0x68] sm:$0xff] %vm6004_vm15, %v3116_v1  ;;  %74 = vst.msk [vmem:[#allocation3 + $0x70] sm:$0xff] %vm6004_vm15, %v3116_v1 }
  0x47   :  { %2696 = vmatprep.mubr.f32.mxu0 %v126_v3  ;;  %2728 = vmatprep.mubr.f32.mxu1 %v142_v4  ;;  %75 = vst.msk [vmem:[#allocation3 + $0x78] sm:$0xff] %vm6004_vm15, %v3116_v1  ;;  %76 = vst.msk [vmem:[#allocation3 + $0x80] sm:$0xff] %vm6004_vm15, %v3116_v1 }
  0x48   :  { %77 = vst.msk [vmem:[#allocation3 + $0x88] sm:$0xff] %vm6004_vm15, %v3116_v1  ;;  %78 = vst.msk [vmem:[#allocation3 + $0x90] sm:$0xff] %vm6004_vm15, %v3116_v1 }
  0x49   :  { %79 = vst.msk [vmem:[#allocation3 + $0x98] sm:$0xff] %vm6004_vm15, %v3116_v1  ;;  %80 = vst.msk [vmem:[#allocation3 + $0xa0] sm:$0xff] %vm6004_vm15, %v3116_v1 }
  0x4a   :  { %2697 = vmatmul.mubr.f32.gmra.mxu0 %v126_v3  ;;  %2729 = vmatmul.mubr.f32.gmra.mxu1 %v142_v4  ;;  %81 = vst.msk [vmem:[#allocation3 + $0xa8] sm:$0xff] %vm6004_vm15, %v3116_v1  ;;  %82 = vst.msk [vmem:[#allocation3 + $0xb0] sm:$0xff] %vm6004_vm15, %v3116_v1  ;;  %v3696_v3 = vadd.s32 128, %v3461_v40  ;;  %v3699_v4 = vrot.slane %v3471_v44, %v782_v2  ;;  %v3786_v44 = vadd.s32 248, %v3461_v40 }
  0x4b   :  { %2698 = vmatprep.mubr.f32.mxu0 %v127_v7  ;;  %2730 = vmatprep.mubr.f32.mxu1 %v143_v8  ;;  %83 = vst.msk [vmem:[#allocation3 + $0xb8] sm:$0xff] %vm6004_vm15, %v3116_v1  ;;  %84 = vst.msk [vmem:[#allocation3 + $0xc0] sm:$0xff] %vm6004_vm15, %v3116_v1 }
  0x4c   :  { %85 = vst.msk [vmem:[#allocation3 + $0xc8] sm:$0xff] %vm6004_vm15, %v3116_v1  ;;  %86 = vst.msk [vmem:[#allocation3 + $0xd0] sm:$0xff] %vm6004_vm15, %v3116_v1 }
  0x4d   :  { %87 = vst.msk [vmem:[#allocation3 + $0xd8] sm:$0xff] %vm6004_vm15, %v3116_v1  ;;  %88 = vst.msk [vmem:[#allocation3 + $0xe0] sm:$0xff] %vm6004_vm15, %v3116_v1 }
  0x4e   :  { %2699 = vmatmul.mubr.f32.gmra.mxu0 %v127_v7  ;;  %2731 = vmatmul.mubr.f32.gmra.mxu1 %v143_v8  ;;  %89 = vst.msk [vmem:[#allocation3 + $0xe8] sm:$0xff] %vm6004_vm15, %v3116_v1  ;;  %90 = vst.msk [vmem:[#allocation3 + $0xf0] sm:$0xff] %vm6004_vm15, %v3116_v1  ;;  %v3708_v7 = vadd.s32 128, %v3485_v49  ;;  %v3711_v8 = vadd.s32 152, %v3461_v40 }
  0x4f   :  { %2700 = vmatprep.mubr.f32.mxu0 %v128_v9  ;;  %2732 = vmatprep.mubr.f32.mxu1 %v144_v10  ;;  %91 = vst.msk [vmem:[#allocation3 + $0xf8] sm:$0xff] %vm6004_vm15, %v3116_v1  ;;  %93 = vst.msk [vmem:[#allocation4 + $0x8] sm:$0xff] %vm6004_vm15, %v3116_v1 }
  0x50   :  { %94 = vst.msk [vmem:[#allocation4 + $0x10] sm:$0xff] %vm6004_vm15, %v3116_v1  ;;  %95 = vst.msk [vmem:[#allocation4 + $0x18] sm:$0xff] %vm6004_vm15, %v3116_v1 }
  0x51   :  { %96 = vst.msk [vmem:[#allocation4 + $0x20] sm:$0xff] %vm6004_vm15, %v3116_v1  ;;  %97 = vst.msk [vmem:[#allocation4 + $0x28] sm:$0xff] %vm6004_vm15, %v3116_v1 }
  0x52   :  { %2701 = vmatmul.mubr.f32.gmra.mxu0 %v128_v9  ;;  %2733 = vmatmul.mubr.f32.gmra.mxu1 %v144_v10  ;;  %98 = vst.msk [vmem:[#allocation4 + $0x30] sm:$0xff] %vm6004_vm15, %v3116_v1  ;;  %99 = vst.msk [vmem:[#allocation4 + $0x38] sm:$0xff] %vm6004_vm15, %v3116_v1  ;;  %v3714_v9 = vadd.s32 136, %v3461_v40  ;;  %v3717_v10 = vadd.s32 168, %v3461_v40 }
  0x53   :  { %2702 = vmatprep.mubr.f32.mxu0 %v129_v11  ;;  %2734 = vmatprep.mubr.f32.mxu1 %v145_v12  ;;  %100 = vst.msk [vmem:[#allocation4 + $0x40] sm:$0xff] %vm6004_vm15, %v3116_v1  ;;  %101 = vst.msk [vmem:[#allocation4 + $0x48] sm:$0xff] %vm6004_vm15, %v3116_v1 }
  0x54   :  { %102 = vst.msk [vmem:[#allocation4 + $0x50] sm:$0xff] %vm6004_vm15, %v3116_v1  ;;  %103 = vst.msk [vmem:[#allocation4 + $0x58] sm:$0xff] %vm6004_vm15, %v3116_v1 }
  0x55   :  { %104 = vst.msk [vmem:[#allocation4 + $0x60] sm:$0xff] %vm6004_vm15, %v3116_v1  ;;  %105 = vst.msk [vmem:[#allocation4 + $0x68] sm:$0xff] %vm6004_vm15, %v3116_v1 }
  0x56   :  { %2703 = vmatmul.mubr.f32.gmra.mxu0 %v129_v11  ;;  %2735 = vmatmul.mubr.f32.gmra.mxu1 %v145_v12  ;;  %106 = vst.msk [vmem:[#allocation4 + $0x70] sm:$0xff] %vm6004_vm15, %v3116_v1  ;;  %107 = vst.msk [vmem:[#allocation4 + $0x78] sm:$0xff] %vm6004_vm15, %v3116_v1  ;;  %v3722_v11 = vadd.s32 144, %v3461_v40  ;;  %v3725_v12 = vadd.s32 16, %v3461_v40 }
  0x57   :  { %2704 = vmatprep.mubr.f32.mxu0 %v130_v13  ;;  %2736 = vmatprep.mubr.f32.mxu1 %v146_v14  ;;  %108 = vst.msk [vmem:[#allocation4 + $0x80] sm:$0xff] %vm6004_vm15, %v3116_v1  ;;  %109 = vst.msk [vmem:[#allocation4 + $0x88] sm:$0xff] %vm6004_vm15, %v3116_v1 }
  0x58   :  { %110 = vst.msk [vmem:[#allocation4 + $0x90] sm:$0xff] %vm6004_vm15, %v3116_v1  ;;  %111 = vst.msk [vmem:[#allocation4 + $0x98] sm:$0xff] %vm6004_vm15, %v3116_v1 }
  0x59   :  { %112 = vst.msk [vmem:[#allocation4 + $0xa0] sm:$0xff] %vm6004_vm15, %v3116_v1  ;;  %113 = vst.msk [vmem:[#allocation4 + $0xa8] sm:$0xff] %vm6004_vm15, %v3116_v1 }
  0x5a   :  { %2705 = vmatmul.mubr.f32.gmra.mxu0 %v130_v13  ;;  %2737 = vmatmul.mubr.f32.gmra.mxu1 %v146_v14  ;;  %114 = vst.msk [vmem:[#allocation4 + $0xb0] sm:$0xff] %vm6004_vm15, %v3116_v1  ;;  %115 = vst.msk [vmem:[#allocation4 + $0xb8] sm:$0xff] %vm6004_vm15, %v3116_v1  ;;  %v3728_v13 = vadd.s32 24, %v3461_v40  ;;  %v3733_v14 = vadd.s32 160, %v3461_v40 }
  0x5b   :  { %2706 = vmatprep.mubr.f32.mxu0 %v131_v15  ;;  %2738 = vmatprep.mubr.f32.mxu1 %v147_v16  ;;  %116 = vst.msk [vmem:[#allocation4 + $0xc0] sm:$0xff] %vm6004_vm15, %v3116_v1  ;;  %117 = vst.msk [vmem:[#allocation4 + $0xc8] sm:$0xff] %vm6004_vm15, %v3116_v1 }
  0x5c   :  { %118 = vst.msk [vmem:[#allocation4 + $0xd0] sm:$0xff] %vm6004_vm15, %v3116_v1  ;;  %119 = vst.msk [vmem:[#allocation4 + $0xd8] sm:$0xff] %vm6004_vm15, %v3116_v1 }
  0x5d   :  { %120 = vst.msk [vmem:[#allocation4 + $0xe0] sm:$0xff] %vm6004_vm15, %v3116_v1  ;;  %121 = vst.msk [vmem:[#allocation4 + $0xe8] sm:$0xff] %vm6004_vm15, %v3116_v1 }
  0x5e   :  { %2707 = vmatmul.mubr.f32.gmra.mxu0 %v131_v15  ;;  %2739 = vmatmul.mubr.f32.gmra.mxu1 %v147_v16  ;;  %122 = vst.msk [vmem:[#allocation4 + $0xf0] sm:$0xff] %vm6004_vm15, %v3116_v1  ;;  %123 = vst.msk [vmem:[#allocation4 + $0xf8] sm:$0xff] %vm6004_vm15, %v3116_v1  ;;  %v3736_v15 = vadd.s32 184, %v3461_v40  ;;  %v3739_v16 = vadd.s32 200, %v3461_v40  ;;  %v3789_v1 = vadd.s32 72, %v3461_v40 }
  0x5f   :  { %2708 = vmatprep.mubr.f32.mxu0 %v132_v17  ;;  %2740 = vmatprep.mubr.f32.mxu1 %v148_v18  ;;  %6164 = vst [vmem:[#allocation23_spill] sm:$0xff] %v3786_v44 }
  0x60   :  { %6165 = vst [vmem:[#allocation24_spill] sm:$0xff] %v3789_v1 }
  0x62   :  { %2709 = vmatmul.mubr.f32.gmra.mxu0 %v132_v17  ;;  %2741 = vmatmul.mubr.f32.gmra.mxu1 %v148_v18  ;;  %v3743_v17 = vrot.slane %v912_v6, %v778_v43  ;;  %v3748_v18 = vadd.s32 176, %v3461_v40  ;;  %v3783_v43 = vadd.s32 232, %v3461_v40 }
  0x63   :  { %2710 = vmatprep.mubr.f32.mxu0 %v133_v19  ;;  %2742 = vmatprep.mubr.f32.mxu1 %v149_v20 }
  0x66   :  { %2711 = vmatmul.mubr.f32.gmra.mxu0 %v133_v19  ;;  %2743 = vmatmul.mubr.f32.gmra.mxu1 %v149_v20  ;;  %v3751_v19 = vadd.s32 40, %v3461_v40 }
  0x67   :  { %2712 = vmatprep.mubr.f32.mxu0 %v134_v21  ;;  %2744 = vmatprep.mubr.f32.mxu1 %v150_v22 }
  0x6a   :  { %2713 = vmatmul.mubr.f32.gmra.mxu0 %v134_v21  ;;  %2745 = vmatmul.mubr.f32.gmra.mxu1 %v150_v22  ;;  %v3754_v22 = vadd.s32 32, %v3461_v40 }
  0x6b   :  { %2714 = vmatprep.mubr.f32.mxu0 %v135_v23  ;;  %2746 = vmatprep.mubr.f32.mxu1 %v151_v24 }
  0x6e   :  { %2715 = vmatmul.mubr.f32.gmra.mxu0 %v135_v23  ;;  %2747 = vmatmul.mubr.f32.gmra.mxu1 %v151_v24  ;;  %v3757_v23 = vadd.s32 192, %v3461_v40  ;;  %v3760_v24 = vadd.s32 216, %v3461_v40 }
  0x6f   :  { %2716 = vmatprep.mubr.f32.mxu0 %v136_v25  ;;  %2748 = vmatprep.mubr.f32.mxu1 %v152_v26 }
  0x72   :  { %2717 = vmatmul.mubr.f32.gmra.mxu0 %v136_v25  ;;  %2749 = vmatmul.mubr.f32.gmra.mxu1 %v152_v26  ;;  %v3763_v25 = vadd.s32 56, %v3461_v40 }
  0x73   :  { %2718 = vmatprep.mubr.f32.mxu0 %v137_v27  ;;  %2750 = vmatprep.mubr.f32.mxu1 %v153_v28 }
  0x76   :  { %2719 = vmatmul.mubr.f32.gmra.mxu0 %v137_v27  ;;  %2751 = vmatmul.mubr.f32.gmra.mxu1 %v153_v28  ;;  %v3767_v28 = vrot.slane %v912_v6, %v782_v2 }
  0x77   :  { %2720 = vmatprep.mubr.f32.mxu0 %v138_v29  ;;  %2752 = vmatprep.mubr.f32.mxu1 %v154_v30 }
  0x7a   :  { %2721 = vmatmul.mubr.f32.gmra.mxu0 %v138_v29  ;;  %2753 = vmatmul.mubr.f32.gmra.mxu1 %v154_v30  ;;  %v3772_v29 = vadd.s32 208, %v3461_v40  ;;  %v3775_v30 = vadd.s32 48, %v3461_v40 }
  0x7b   :  { %2722 = vmatprep.mubr.f32.mxu0 %v139_v31  ;;  %2754 = vmatprep.mubr.f32.mxu1 %v155_v32 }
  0x7e   :  { %2723 = vmatmul.mubr.f32.gmra.mxu0 %v139_v31  ;;  %2755 = vmatmul.mubr.f32.gmra.mxu1 %v155_v32 }
  0x80   :  { %v3449_v33 = vpop.permute.xlu1 %687  ;;  %v3451_v34 = vpop.permute.xlu0 %681 }
  0x81   :  { %vm784_vm15 = vcmp.eq.s32.totalorder %v3451_v34, %v3483_v48 }
  0x85   :  { %v3453_v35 = vpop.permute.xlu1 %690  ;;  %v3455_v36 = vpop.permute.xlu0 %684 }
  0x89   :  { %v3457_v38 = vpop.permute.xlu1 %696  ;;  %v3459_v39 = vpop.permute.xlu0 %693 }
  0x8d   :  { %v3463_v41 = vpop.permute.xlu1 %702  ;;  %v3465_v42 = vpop.permute.xlu0 %699 }
  0x91   :  { %v3473_v45 = vpop.permute.xlu1 %708  ;;  %v3475_v46 = vpop.permute.xlu0 %705 }
  0x92   :  { %6136 = vst [vmem:[#allocation5_spill] sm:$0xff] %v3473_v45 }
  0x95   :  { %v3490_v51 = vpop.permute.xlu1 %714  ;;  %v3492_v52 = vpop.permute.xlu0 %711 }
  0x96   :  { %6139 = vst [vmem:[#allocation8_spill] sm:$0xff] %v3490_v51  ;;  %6140 = vst [vmem:[#allocation9_spill] sm:$0xff] %v3492_v52  ;;  %vm806_vm1 = vcmp.eq.s32.totalorder %v3490_v51, %v3483_v48 }
  0x97   :  { %vm3504_vm2 = vmand %vm806_vm1, %vm6015_vm0  ;;  %vm583_vm1 = vcmp.ne.s32.totalorder %v3461_v40, %v3485_v49 }
  0x98   :  { %v6143_v54 = vsel %vm3504_vm2, 4294967295, %v6142_v54 }
  0x99   :  { %6144 = vst [vmem:[#allocation11_spill] sm:$0xff] %v6143_v54  ;;  %v3513_v56 = vpop.permute.xlu1 %720  ;;  %v3515_v57 = vpop.permute.xlu0 %717 }
  0x9a   :  { %6146 = vst [vmem:[#allocation13_spill] sm:$0xff] %v3513_v56  ;;  %6147 = vst [vmem:[#allocation14_spill] sm:$0xff] %v3515_v57  ;;  %vm810_vm5 = vcmp.eq.s32.totalorder %v3513_v56, %v3483_v48  ;;  %vm808_vm6 = vcmp.eq.s32.totalorder %v3515_v57, %v3483_v48 }
  0x9b   :  { %vm3529_vm7 = vmand %vm808_vm6, %vm6014_vm3  ;;  %vm585_vm6 = vcmp.ne.s32.totalorder %v3702_v5, %v3485_v49  ;;  %vm6041_vm3 = vcmp.ne.s32.totalorder %v3733_v14, %v3708_v7 }
  0x9c   :  { %v6150_v59 = vsel %vm3529_vm7, 4294967295, %v6149_v59  ;;  %vm3536_vm8 = vmand %vm810_vm5, %vm6012_vm4  ;;  %vm616_vm5 = vcmp.ne.s32.totalorder %v3696_v3, %v3708_v7 }
  0x9d   :  { %6151 = vst [vmem:[#allocation16_spill] sm:$0xff] %v6150_v59  ;;  %v6153_v60 = vsel %vm3536_vm8, 4294967295, %v6152_v60  ;;  %v3542_v61 = vpop.permute.xlu1 %726  ;;  %v3544_v62 = vpop.permute.xlu0 %723 }
  0x9e   :  { %6154 = vst [vmem:[#allocation17_spill] sm:$0xff] %v6153_v60  ;;  %6155 = vst [vmem:[#allocation18_spill] sm:$0xff] %v3542_v61  ;;  %vm814_vm11 = vcmp.eq.s32.totalorder %v3542_v61, %v3483_v48  ;;  %vm812_vm12 = vcmp.eq.s32.totalorder %v3544_v62, %v3483_v48 }
  0x9f   :  { %6156 = vst [vmem:[#allocation19_spill] sm:$0xff] %v3544_v62  ;;  %vm3555_vm13 = vmand %vm812_vm12, %vm6009_vm9  ;;  %vm785_vm9 = vcmp.eq.s32.totalorder %v3451_v34, %v3699_v4 }
  0xa0   :  { %v6158_v63 = vsel %vm3555_vm13, 4294967295, %v6157_v63  ;;  %vm3562_vm14 = vmand %vm814_vm11, %vm6006_vm10  ;;  %vm786_vm10 = vcmp.eq.s32.totalorder %v3455_v36, %v3483_v48 }
  0xa1   :  { %6159 = vst [vmem:[#allocation20_spill] sm:$0xff] %v6158_v63  ;;  %v6161_v0 = vsel %vm3562_vm14, 4294967295, %v6160_v0  ;;  %v3765_v26 = vpop.permute.xlu1 %732  ;;  %v730_v2 = vpop.permute.xlu0 %729  ;;  %v3805_v63 = vadd.s32 80, %v3461_v40  ;;  %vm848_vm12 = vmand %vm784_vm15, %vm583_vm1 }
  0xa2   :  { %6162 = vst [vmem:[#allocation21_spill] sm:$0xff] %v6161_v0  ;;  %vm817_vm4 = vcmp.eq.s32.totalorder %v730_v2, %v3699_v4  ;;  %vm816_vm0 = vcmp.eq.s32.totalorder %v730_v2, %v3483_v48  ;;  %vm818_vm15 = vcmp.eq.s32.totalorder %v3765_v26, %v3483_v48 }
  0xa3   :  { %6167 = vst [vmem:[#allocation26_spill] sm:$0xff] %v3805_v63 }
  0xa5   :  { %v3828_v62 = vpop.permute.xlu1 %738 }
 0x102   :  { %v254_v20 = vpop.f32.mrf.mxu0  ;;  %v350_v21 = vpop.f32.mrf.mxu1 }
 0x103   :  { %v445_v27 = vmul.f32 14.285714, %v254_v20  ;;  %v477_v50 = vmul.f32 14.285714, %v350_v21 }
 0x104   :  { %v256_v31 = vpop.f32.mrf.mxu0  ;;  %v352_v32 = vpop.f32.mrf.mxu1 }
 0x105   :  { %v924_v6 = vadd.f32 %v3743_v17, %v445_v27  ;;  %v446_v20 = vmul.f32 14.285714, %v256_v31  ;;  %v478_v60 = vmul.f32 14.285714, %v352_v32  ;;  %v1949_v61 = vsel %vm848_vm12, %v445_v27, 0.0  ;;  %vm850_vm12 = vmand %vm786_vm10, %vm585_vm6 }
 0x106   :  { %v260_v0 = vpop.f32.mrf.mxu0  ;;  %v356_v55 = vpop.f32.mrf.mxu1 }
 0x107   :  { %v3809_v31 = vadd.f32 %v3767_v28, %v446_v20  ;;  %v1950_v54 = vsel %vm785_vm9, %v446_v20, 0.0  ;;  %v3824_v32 = vsel %vm583_vm1, %v924_v6, -1e+30  ;;  %v447_v21 = vmul.f32 14.285714, %v260_v0  ;;  %vm3840_vm9 = vmand %vm817_vm4, %vm616_vm5 }
 0x108   :  { %v262_v47 = vpop.f32.mrf.mxu0  ;;  %v358_v59 = vpop.f32.mrf.mxu1  ;;  %6169 = vst [vmem:[#allocation28_spill] sm:$0xff] %v3824_v32  ;;  %v2013_v57 = vadd.f32 %v1950_v54, %v1949_v61  ;;  %v957_v27 = vadd.f32 %v3767_v28, %v478_v60  ;;  %v1982_v61 = vsel %vm3840_vm9, %v478_v60, 0.0  ;;  %vm6173_vm9 = vcmp.eq.s32.totalorder %v3455_v36, %v3699_v4 }
 0x109   :  { %6168 = vst [vmem:[#allocation27_spill] sm:$0xff] %v3809_v31  ;;  %v448_v56 = vmul.f32 14.285714, %v262_v47  ;;  %v1084_v40 = vmax.f32 %v3824_v32, %v3809_v31  ;;  %v736_v47 = vpop.permute.xlu0 %735  ;;  %v480_v6 = vmul.f32 14.285714, %v358_v59  ;;  %v3853_v31 = vadd.f32 %v3743_v17, %v477_v50 }
 0x10a   :  { %v266_v34 = vpop.f32.mrf.mxu0  ;;  %v362_v20 = vpop.f32.mrf.mxu1  ;;  %vm821_vm1 = vcmp.eq.s32.totalorder %v736_v47, %v3699_v4  ;;  %vm820_vm4 = vcmp.eq.s32.totalorder %v736_v47, %v3483_v48  ;;  %2014 = vadd.xlane.f32.xlu1 %v2013_v57  ;;  %v479_v57 = vmul.f32 14.285714, %v356_v55  ;;  %v926_v0 = vadd.f32 %v3743_v17, %v447_v21 }
 0x10b   :  { %v3847_v54 = vmul.f32 14.285714, %v362_v20  ;;  %6172 = vst [vmem:[#allocation29_spill] sm:$0xff] %v3853_v31  ;;  %1085 = vmax.xlane.f32.xlu0 %v1084_v40  ;;  %v1952_v59 = vsel %vm6173_vm9, %v448_v56, 0.0  ;;  %v1981_v20 = vsel %vm816_vm0, %v477_v50, 0.0  ;;  %v1951_v40 = vsel %vm850_vm12, %v447_v21, 0.0 }
 0x10c   :  { %v268_v32 = vpop.f32.mrf.mxu0  ;;  %v364_v51 = vpop.f32.mrf.mxu1  ;;  %v2061_v52 = vadd.f32 %v1982_v61, %v1981_v20  ;;  %v2016_v1 = vadd.f32 %v1952_v59, %v1951_v40  ;;  %vm6174_vm9 = vcmp.ne.s32.totalorder %v3714_v9, %v3708_v7  ;;  %vm789_vm0 = vcmp.eq.s32.totalorder %v3449_v33, %v3699_v4 }
 0x10d   :  { %v1985_v60 = vsel %vm820_vm4, %v3847_v54, 0.0  ;;  %v482_v36 = vmul.f32 14.285714, %v364_v51  ;;  %vm6175_vm4 = vcmp.eq.s32.totalorder %v3765_v26, %v3699_v4  ;;  %v959_v51 = vadd.f32 %v3767_v28, %v480_v6 }
 0x10e   :  { %v3875_v44 = vpop.f32.mrf.mxu0  ;;  %v368_v63 = vpop.f32.mrf.mxu1  ;;  %vm3883_vm11 = vmand %vm6175_vm4, %vm6174_vm9  ;;  %vm6178_vm12 = vcmp.ne.s32.totalorder %v3722_v11, %v3708_v7  ;;  %v3904_v21 = vsel %vm616_vm5, %v957_v27, -1e+30  ;;  %v3909_v59 = vadd.f32 %v3743_v17, %v479_v57  ;;  %v3912_v20 = vadd.f32 %v3767_v28, %v448_v56  ;;  %2062 = vadd.xlane.f32.xlu1 %v2061_v52 }
 0x10f   :  { %vm3895_vm10 = vmand %vm821_vm1, %vm6178_vm12  ;;  %v3899_v2 = vmul.f32 14.285714, %v368_v63  ;;  %6181 = vst [vmem:[#allocation30_spill] sm:$0xff] %v3904_v21  ;;  %v1984_v61 = vsel %vm3883_vm11, %v480_v6, 0.0  ;;  %vm822_vm1 = vcmp.eq.s32.totalorder %v3828_v62, %v3483_v48  ;;  %2017 = vadd.xlane.f32.xlu0 %v2016_v1  ;;  %vm6046_vm5 = vcmp.ne.s32.totalorder %v3717_v10, %v3708_v7  ;;  %v3922_v27 = vpop.permute.xlu1 %744 }
 0x110   :  { %6182 = vst [vmem:[#allocation31_spill] sm:$0xff] %v3909_v59  ;;  %6183 = vst [vmem:[#allocation32_spill] sm:$0xff] %v3912_v20  ;;  %v1986_v47 = vsel %vm3895_vm10, %v482_v36, 0.0  ;;  %v274_v63 = vpop.f32.mrf.mxu0  ;;  %v370_v3 = vpop.f32.mrf.mxu1  ;;  %v3924_v56 = vmul.f32 14.285714, %v266_v34  ;;  %v1983_v52 = vsel %vm818_vm15, %v479_v57, 0.0  ;;  %vm589_vm10 = vcmp.ne.s32.totalorder %v3728_v13, %v3485_v49 }
 0x111   :  { %v3926_v6 = vadd.f32 %v1986_v47, %v1985_v60  ;;  %v1987_v40 = vsel %vm822_vm1, %v3899_v2, 0.0  ;;  %v450_v1 = vmul.f32 14.285714, %v268_v32  ;;  %v3934_v50 = vmul.f32 14.285714, %v370_v3  ;;  %v742_v60 = vpop.permute.xlu0 %741 }
 0x112   :  { %v278_v55 = vpop.f32.mrf.mxu0  ;;  %v374_v45 = vpop.f32.mrf.mxu1  ;;  %v1132_v34 = vmax.f32 %v3853_v31, %v3904_v21  ;;  %v2064_v53 = vadd.f32 %v1984_v61, %v1983_v52  ;;  %vm791_vm9 = vcmp.eq.s32.totalorder %v3453_v35, %v3699_v4  ;;  %v928_v26 = vadd.f32 %v3743_v17, %v3924_v56 }
 0x113   :  { %6184 = vst [vmem:[#allocation33_spill] sm:$0xff] %v3926_v6  ;;  %vm6185_vm15 = vcmp.ne.s32.totalorder %v3711_v8, %v3708_v7  ;;  %vm6186_vm4 = vcmp.eq.s32.totalorder %v3828_v62, %v3699_v4  ;;  %v3952_v57 = vmul.f32 14.285714, %v374_v45  ;;  %v3957_v61 = vsel %vm585_vm6, %v926_v0, -1e+30 }
 0x114   :  { %vm3948_vm12 = vmand %vm6186_vm4, %vm6185_vm15  ;;  %6189 = vst [vmem:[#allocation34_spill] sm:$0xff] %v3957_v61  ;;  %vm6190_vm1 = vcmp.ne.s32.totalorder %v3714_v9, %v3708_v7  ;;  %vm827_vm11 = vcmp.eq.s32.totalorder %v3922_v27, %v3699_v4  ;;  %vm825_vm15 = vcmp.eq.s32.totalorder %v742_v60, %v3699_v4  ;;  %vm824_vm4 = vcmp.eq.s32.totalorder %v742_v60, %v3483_v48  ;;  %v280_v62 = vpop.f32.mrf.mxu0  ;;  %v376_v5 = vpop.f32.mrf.mxu1 }
 0x115   :  { %v3962_v47 = vsel %vm6190_vm1, %v959_v51, -1e+30  ;;  %v1988_v45 = vsel %vm3948_vm12, %v3934_v50, 0.0  ;;  %1133 = vmax.xlane.f32.xlu1 %v1132_v34  ;;  %2065 = vadd.xlane.f32.xlu0 %v2064_v53  ;;  %vm6047_vm6 = vcmp.ne.s32.totalorder %v3748_v18, %v3708_v7  ;;  %v3976_v9 = vadd.f32 %v3767_v28, %v450_v1 }
 0x116   :  { %6191 = vst [vmem:[#allocation35_spill] sm:$0xff] %v3962_v47  ;;  %v961_v0 = vadd.f32 %v3767_v28, %v482_v36  ;;  %v3979_v51 = vadd.f32 %v1988_v45, %v1987_v40  ;;  %v1989_v3 = vsel %vm824_vm4, %v3952_v57, 0.0  ;;  %v452_v53 = vmul.f32 14.285714, %v274_v63  ;;  %v3986_v34 = vpop.f32.mrf.mxu0  ;;  %v380_v32 = vpop.f32.mrf.mxu1  ;;  %vm4001_vm4 = vmand %vm825_vm15, %vm6041_vm3 }
 0x117   :  { %6192 = vst [vmem:[#allocation36_spill] sm:$0xff] %v3976_v9  ;;  %v3984_v52 = vmul.f32 14.285714, %v376_v5  ;;  %v1087_v6 = vmax.f32 %v3957_v61, %v3912_v20  ;;  %v1135_v21 = vmax.f32 %v3909_v59, %v3962_v47  ;;  %v3994_v36 = vpop.permute.xlu1 %750  ;;  %v4005_v40 = vmul.f32 14.285714, %v380_v32 }
 0x118   :  { %6193 = vst [vmem:[#allocation37_spill] sm:$0xff] %v3979_v51  ;;  %vm826_vm12 = vcmp.eq.s32.totalorder %v3922_v27, %v3483_v48  ;;  %v1954_v45 = vsel %vm789_vm0, %v450_v1, 0.0  ;;  %vm6196_vm1 = vcmp.ne.s32.totalorder %v3725_v12, %v3485_v49  ;;  %v4021_v60 = vadd.f32 %v3743_v17, %v3847_v54  ;;  %v4027_v1 = vpop.f32.mrf.mxu0  ;;  %v382_v59 = vpop.f32.mrf.mxu1 }
 0x119   :  { %v4015_v5 = vsel %vm6196_vm1, %v928_v26, -1e+30  ;;  %v451_v32 = vmul.f32 14.285714, %v3875_v44  ;;  %v1990_v47 = vsel %vm4001_vm4, %v3984_v52, 0.0  ;;  %1088 = vmax.xlane.f32.xlu1 %v1087_v6  ;;  %1136 = vmax.xlane.f32.xlu0 %v1135_v21  ;;  %vm6199_vm0 = vmmov %vm6196_vm1  ;;  %vm6200_vm1 = vcmp.eq.s32.totalorder %v3449_v33, %v3483_v48  ;;  %v748_v44 = vpop.permute.xlu0 %747 }
 0x11a   :  { %6197 = vst [vmem:[#allocation38_spill] sm:$0xff] %v4015_v5  ;;  %6198 = vst [vmem:[#allocation39_spill] sm:$0xff] %v4021_v60  ;;  %vm6048_vm15 = vcmp.ne.s32.totalorder %v3736_v15, %v3708_v7  ;;  %v4037_v54 = vadd.f32 %v1990_v47, %v1989_v3  ;;  %v1991_v26 = vsel %vm826_vm12, %v4005_v40, 0.0  ;;  %vm6202_vm4 = vcmp.ne.s32.totalorder %v3722_v11, %v3708_v7  ;;  %v4050_v33 = vpop.f32.mrf.mxu0  ;;  %v386_v20 = vpop.f32.mrf.mxu1 }
 0x11b   :  { %vm852_vm3 = vmand %vm6200_vm1, %vm6199_vm0  ;;  %v4044_v6 = vsel %vm6202_vm4, %v961_v0, -1e+30  ;;  %v4046_v12 = vmul.f32 14.285714, %v278_v55  ;;  %v4048_v63 = vmul.f32 14.285714, %v382_v59  ;;  %v1090_v47 = vmax.f32 %v4015_v5, %v3976_v9 }
 0x11c   :  { %6201 = vst [vmem:[#allocation40_spill] sm:$0xff] %v4037_v54  ;;  %v1953_v21 = vsel %vm852_vm3, %v3924_v56, 0.0  ;;  %6203 = vst [vmem:[#allocation41_spill] sm:$0xff] %v4044_v6  ;;  %v930_v3 = vadd.f32 %v3743_v17, %v451_v32  ;;  %v454_v54 = vmul.f32 14.285714, %v280_v62  ;;  %v1956_v59 = vsel %vm791_vm9, %v452_v53, 0.0  ;;  %v4069_v55 = vpop.f32.mrf.mxu0  ;;  %v388_v62 = vpop.f32.mrf.mxu1 }
 0x11d   :  { %v2019_v61 = vadd.f32 %v1954_v45, %v1953_v21  ;;  %vm891_vm3 = vmand %vm827_vm11, %vm6046_vm5  ;;  %v4061_v11 = vmul.f32 14.285714, %v386_v20  ;;  %vm829_vm12 = vcmp.eq.s32.totalorder %v748_v44, %v3699_v4  ;;  %vm828_vm0 = vcmp.eq.s32.totalorder %v748_v44, %v3483_v48  ;;  %1091 = vmax.xlane.f32.xlu0 %v1090_v47 }
 0x11e   :  { %v1992_v56 = vsel %vm891_vm3, %v4048_v63, 0.0  ;;  %v1138_v27 = vmax.f32 %v4021_v60, %v4044_v6  ;;  %vm6204_vm11 = vcmp.eq.s32.totalorder %v3453_v35, %v3483_v48  ;;  %vm6053_vm1 = vcmp.ne.s32.totalorder %v3757_v23, %v3708_v7  ;;  %v4095_v47 = vpop.f32.mrf.mxu0  ;;  %v392_v6 = vpop.f32.mrf.mxu1 }
 0x11f   :  { %2020 = vadd.xlane.f32.xlu1 %v2019_v61  ;;  %vm854_vm9 = vmand %vm6204_vm11, %vm589_vm10  ;;  %v932_v20 = vadd.f32 %v3743_v17, %v4046_v12  ;;  %v4085_v61 = vadd.f32 %v1992_v56, %v1991_v26  ;;  %v1993_v0 = vsel %vm828_vm0, %v4061_v11, 0.0  ;;  %v4091_v35 = vadd.f32 %v3767_v28, %v452_v53  ;;  %v4101_v26 = vpop.permute.xlu1 %756 }
 0x120   :  { %v1955_v45 = vsel %vm854_vm9, %v451_v32, 0.0  ;;  %v4093_v21 = vmul.f32 14.285714, %v388_v62  ;;  %vm830_vm11 = vcmp.eq.s32.totalorder %v3994_v36, %v3483_v48  ;;  %vm795_vm5 = vcmp.eq.s32.totalorder %v3457_v38, %v3699_v4  ;;  %v754_v32 = vpop.permute.xlu0 %753  ;;  %vm4110_vm0 = vmand %vm829_vm12, %vm6047_vm6  ;;  %v4135_v13 = vpop.f32.mrf.mxu0 }
 0x121   :  { %6205 = vst [vmem:[#allocation42_spill] sm:$0xff] %v4085_v61  ;;  %6206 = vst [vmem:[#allocation43_spill] sm:$0xff] %v4091_v35  ;;  %v2022_v60 = vadd.f32 %v1956_v59, %v1955_v45  ;;  %v963_v56 = vadd.f32 %v3767_v28, %v3934_v50  ;;  %v4114_v62 = vmul.f32 14.285714, %v392_v6  ;;  %vm6209_vm9 = vcmp.eq.s32.totalorder %v3459_v39, %v3699_v4 }
 0x122   :  { %v1958_v59 = vsel %vm6209_vm9, %v454_v54, 0.0  ;;  %v4122_v45 = vsel %vm589_vm10, %v930_v3, -1e+30  ;;  %vm833_vm3 = vcmp.eq.s32.totalorder %v754_v32, %v3699_v4  ;;  %v4128_v50 = vadd.f32 %v3767_v28, %v454_v54  ;;  %v394_v3 = vpop.f32.mrf.mxu1  ;;  %v4167_v53 = vpop.f32.mrf.mxu0 }
 0x123   :  { %6210 = vst [vmem:[#allocation44_spill] sm:$0xff] %v4122_v45  ;;  %v965_v44 = vadd.f32 %v3767_v28, %v3984_v52  ;;  %v1994_v6 = vsel %vm4110_vm0, %v4093_v21, 0.0  ;;  %1139 = vmax.xlane.f32.xlu1 %v1138_v27  ;;  %2023 = vadd.xlane.f32.xlu0 %v2022_v60  ;;  %vm6212_vm10 = vcmp.ne.s32.totalorder %v3754_v22, %v3485_v49  ;;  %v1995_v60 = vsel %vm830_vm11, %v4114_v62, 0.0 }
 0x124   :  { %6211 = vst [vmem:[#allocation45_spill] sm:$0xff] %v4128_v50  ;;  %vm6213_vm12 = vcmp.eq.s32.totalorder %v3459_v39, %v3483_v48  ;;  %vm6058_vm6 = vcmp.ne.s32.totalorder %v3739_v16, %v3708_v7  ;;  %v4147_v52 = vadd.f32 %v1994_v6, %v1993_v0  ;;  %vm6215_vm0 = vmmov %vm6212_vm10  ;;  %v4163_v27 = vadd.f32 %v3743_v17, %v3899_v2  ;;  %v398_v6 = vpop.f32.mrf.mxu1 }
 0x125   :  { %vm856_vm9 = vmand %vm6213_vm12, %vm6212_vm10  ;;  %v4157_v39 = vsel %vm6215_vm0, %v932_v20, -1e+30  ;;  %vm595_vm10 = vcmp.ne.s32.totalorder %v3775_v30, %v3485_v49  ;;  %v4165_v0 = vmul.f32 14.285714, %v394_v3  ;;  %vm797_vm11 = vcmp.eq.s32.totalorder %v3465_v42, %v3699_v4  ;;  %v4193_v3 = vpop.f32.mrf.mxu0 }
 0x126   :  { %6214 = vst [vmem:[#allocation46_spill] sm:$0xff] %v4147_v52  ;;  %v1957_v54 = vsel %vm856_vm9, %v4046_v12, 0.0  ;;  %6216 = vst [vmem:[#allocation47_spill] sm:$0xff] %v4157_v39  ;;  %v1093_v12 = vmax.f32 %v4122_v45, %v4091_v35  ;;  %v456_v22 = vmul.f32 14.285714, %v4027_v1  ;;  %vm6218_vm12 = vcmp.eq.s32.totalorder %v3994_v36, %v3699_v4  ;;  %v400_v36 = vpop.f32.mrf.mxu1 }
 0x127   :  { %6217 = vst [vmem:[#allocation48_spill] sm:$0xff] %v4163_v27  ;;  %v2025_v52 = vadd.f32 %v1958_v59, %v1957_v54  ;;  %vm895_vm9 = vmand %vm6218_vm12, %vm6048_vm15  ;;  %v4180_v2 = vmul.f32 14.285714, %v398_v6  ;;  %vm832_vm0 = vcmp.eq.s32.totalorder %v754_v32, %v3483_v48  ;;  %vm6219_vm4 = vcmp.ne.s32.totalorder %v3711_v8, %v3708_v7  ;;  %v4201_v8 = vpop.permute.xlu0 %759 }
 0x128   :  { %v4186_v20 = vsel %vm6219_vm4, %v963_v56, -1e+30  ;;  %v4190_v59 = vadd.f32 %v3743_v17, %v3952_v57  ;;  %v1996_v1 = vsel %vm895_vm9, %v4165_v0, 0.0  ;;  %1094 = vmax.xlane.f32.xlu0 %v1093_v12  ;;  %vm834_vm12 = vcmp.eq.s32.totalorder %v4101_v26, %v3483_v48 }
 0x129   :  { %6220 = vst [vmem:[#allocation49_spill] sm:$0xff] %v4186_v20  ;;  %2026 = vadd.xlane.f32.xlu1 %v2025_v52  ;;  %v1096_v54 = vmax.f32 %v4157_v39, %v4128_v50  ;;  %v455_v57 = vmul.f32 14.285714, %v3986_v34  ;;  %v4204_v56 = vadd.f32 %v1996_v1, %v1995_v60  ;;  %v1997_v52 = vsel %vm832_vm0, %v4180_v2, 0.0  ;;  %v4219_v39 = vpop.f32.mrf.mxu0  ;;  %v404_v34 = vpop.f32.mrf.mxu1  ;;  %vm4232_vm0 = vmand %vm833_vm3, %vm6053_vm1 }
 0x12a   :  { %6221 = vst [vmem:[#allocation50_spill] sm:$0xff] %v4190_v59  ;;  %vm6223_vm9 = vcmp.ne.s32.totalorder %v3733_v14, %v3708_v7  ;;  %v4215_v12 = vmul.f32 14.285714, %v4050_v33  ;;  %v4217_v50 = vmul.f32 14.285714, %v400_v36  ;;  %v1141_v60 = vmax.f32 %v4163_v27, %v4186_v20  ;;  %v4223_v1 = vpop.permute.xlu1 %762 }
 0x12b   :  { %6222 = vst [vmem:[#allocation51_spill] sm:$0xff] %v4204_v56  ;;  %v4210_v6 = vsel %vm6223_vm9, %v965_v44, -1e+30  ;;  %v934_v14 = vadd.f32 %v3743_v17, %v455_v57  ;;  %v458_v44 = vmul.f32 14.285714, %v4069_v55  ;;  %v1960_v20 = vsel %vm795_vm5, %v456_v22, 0.0  ;;  %v4246_v32 = vpop.f32.mrf.mxu0  ;;  %v406_v27 = vpop.f32.mrf.mxu1 }
 0x12c   :  { %6224 = vst [vmem:[#allocation52_spill] sm:$0xff] %v4210_v6  ;;  %v4236_v36 = vmul.f32 14.285714, %v404_v34  ;;  %v1998_v55 = vsel %vm4232_vm0, %v4217_v50, 0.0  ;;  %1142 = vmax.xlane.f32.xlu0 %v1141_v60  ;;  %vm836_vm3 = vcmp.eq.s32.totalorder %v4201_v8, %v3483_v48  ;;  %v1144_v34 = vmax.f32 %v4190_v59, %v4210_v6 }
 0x12d   :  { %1097 = vmax.xlane.f32.xlu1 %v1096_v54  ;;  %vm6227_vm5 = vcmp.ne.s32.totalorder %v3751_v19, %v3485_v49  ;;  %vm6228_vm1 = vcmp.eq.s32.totalorder %v3457_v38, %v3483_v48  ;;  %vm838_vm0 = vcmp.eq.s32.totalorder %v4223_v1, %v3483_v48  ;;  %vm6064_vm15 = vcmp.ne.s32.totalorder %v3760_v24, %v3708_v7 }
 0x12e   :  { %vm858_vm9 = vmand %vm6228_vm1, %vm6227_vm5  ;;  %v936_v54 = vadd.f32 %v3743_v17, %v4215_v12  ;;  %v4266_v60 = vadd.f32 %v1998_v55, %v1997_v52  ;;  %v1999_v38 = vsel %vm834_vm12, %v4236_v36, 0.0  ;;  %v4276_v6 = vadd.f32 %v3743_v17, %v4005_v40  ;;  %v4283_v52 = vpop.f32.mrf.mxu0  ;;  %v410_v55 = vpop.f32.mrf.mxu1 }
 0x12f   :  { %v1959_v33 = vsel %vm858_vm9, %v455_v57, 0.0  ;;  %v4279_v59 = vadd.f32 %v3767_v28, %v456_v22  ;;  %v4281_v35 = vmul.f32 14.285714, %v406_v27  ;;  %vm799_vm12 = vcmp.eq.s32.totalorder %v3463_v41, %v3699_v4  ;;  %v4287_v57 = vpop.permute.xlu0 %765  ;;  %v4364_v30 = vpop.permute.xlu1 %768 }
 0x130   :  { %6229 = vst [vmem:[#allocation53_spill] sm:$0xff] %v4266_v60  ;;  %6230 = vst [vmem:[#allocation54_spill] sm:$0xff] %v4276_v6  ;;  %v2028_v60 = vadd.f32 %v1960_v20, %v1959_v33  ;;  %v967_v45 = vadd.f32 %v3767_v28, %v4048_v63  ;;  %vm6232_vm9 = vcmp.eq.s32.totalorder %v4101_v26, %v3699_v4  ;;  %v4301_v27 = vmul.f32 14.285714, %v410_v55 }
 0x131   :  { %6231 = vst [vmem:[#allocation55_spill] sm:$0xff] %v4279_v59  ;;  %vm4297_vm5 = vmand %vm6232_vm9, %vm6058_vm6  ;;  %v1962_v22 = vsel %vm797_vm11, %v458_v44, 0.0  ;;  %vm6235_vm4 = vcmp.ne.s32.totalorder %v3751_v19, %v3485_v49  ;;  %vm841_vm1 = vcmp.eq.s32.totalorder %v4287_v57, %v3699_v4  ;;  %v4314_v26 = vadd.f32 %v3767_v28, %v458_v44  ;;  %1145 = vmax.xlane.f32.xlu1 %v1144_v34  ;;  %v4324_v19 = vpop.f32.mrf.mxu0 }
 0x132   :  { %v4309_v63 = vsel %vm6235_vm4, %v934_v14, -1e+30  ;;  %v969_v20 = vadd.f32 %v3767_v28, %v4093_v21  ;;  %v4319_v33 = vmul.f32 14.285714, %v4095_v47  ;;  %v2000_v55 = vsel %vm4297_vm5, %v4281_v35, 0.0  ;;  %2029 = vadd.xlane.f32.xlu0 %v2028_v60  ;;  %v412_v14 = vpop.f32.mrf.mxu1 }
 0x133   :  { %6236 = vst [vmem:[#allocation56_spill] sm:$0xff] %v4309_v63  ;;  %6237 = vst [vmem:[#allocation57_spill] sm:$0xff] %v4314_v26  ;;  %vm6238_vm11 = vcmp.eq.s32.totalorder %v3465_v42, %v3483_v48  ;;  %vm840_vm9 = vcmp.eq.s32.totalorder %v4287_v57, %v3483_v48  ;;  %vm6071_vm6 = vcmp.ne.s32.totalorder %v3780_v37, %v3708_v7  ;;  %v2001_v47 = vsel %vm836_vm3, %v4301_v27, 0.0 }
 0x134   :  { %vm860_vm4 = vmand %vm6238_vm11, %vm595_vm10  ;;  %v4338_v21 = vadd.f32 %v2000_v55, %v1999_v38  ;;  %v4348_v42 = vsel %vm595_vm10, %v936_v54, -1e+30  ;;  %v4354_v34 = vadd.f32 %v3743_v17, %v4061_v11  ;;  %v4356_v60 = vmul.f32 14.285714, %v412_v14  ;;  %v4358_v38 = vpop.f32.mrf.mxu0  ;;  %v416_v40 = vpop.f32.mrf.mxu1 }
 0x135   :  { %v1961_v44 = vsel %vm860_vm4, %v4215_v12, 0.0  ;;  %6240 = vst [vmem:[#allocation59_spill] sm:$0xff] %v4348_v42  ;;  %v1099_v12 = vmax.f32 %v4309_v63, %v4279_v59  ;;  %v4368_v54 = vadd.f32 %v3743_v17, %v4319_v33  ;;  %v460_v11 = vmul.f32 14.285714, %v4135_v13 }
 0x136   :  { %6239 = vst [vmem:[#allocation58_spill] sm:$0xff] %v4338_v21  ;;  %6241 = vst [vmem:[#allocation60_spill] sm:$0xff] %v4354_v34  ;;  %v2031_v55 = vadd.f32 %v1962_v22, %v1961_v44  ;;  %vm6242_vm3 = vcmp.ne.s32.totalorder %v3772_v29, %v3708_v7  ;;  %vm6243_vm4 = vcmp.eq.s32.totalorder %v4201_v8, %v3699_v4  ;;  %v4381_v14 = vmul.f32 14.285714, %v416_v40  ;;  %v4400_v21 = vpop.f32.mrf.mxu0 }
 0x137   :  { %vm4377_vm5 = vmand %vm6243_vm4, %vm6242_vm3  ;;  %vm6246_vm11 = vcmp.ne.s32.totalorder %v3717_v10, %v3708_v7  ;;  %v4392_v13 = vadd.f32 %v3743_v17, %v4114_v62  ;;  %v4395_v8 = vmul.f32 14.285714, %v4167_v53  ;;  %1100 = vmax.xlane.f32.xlu0 %v1099_v12  ;;  %v418_v10 = vpop.f32.mrf.mxu1  ;;  %vm6080_vm3 = vcmp.ne.s32.totalorder %v3783_v43, %v3708_v7  ;;  %v4408_v62 = vpop.permute.xlu0 %771 }
 0x138   :  { %v4386_v44 = vsel %vm6246_vm11, %v967_v45, -1e+30  ;;  %v2002_v40 = vsel %vm4377_vm5, %v4356_v60, 0.0  ;;  %2032 = vadd.xlane.f32.xlu1 %v2031_v55  ;;  %v1102_v45 = vmax.f32 %v4348_v42, %v4314_v26  ;;  %vm842_vm11 = vcmp.eq.s32.totalorder %v4364_v30, %v3483_v48 }
 0x139   :  { %6247 = vst [vmem:[#allocation61_spill] sm:$0xff] %v4386_v44  ;;  %6248 = vst [vmem:[#allocation62_spill] sm:$0xff] %v4392_v13  ;;  %v4411_v53 = vadd.f32 %v3767_v28, %v460_v11  ;;  %v4413_v22 = vadd.f32 %v2002_v40, %v2001_v47  ;;  %v2003_v55 = vsel %vm838_vm0, %v4381_v14, 0.0  ;;  %vm6251_vm5 = vcmp.ne.s32.totalorder %v3748_v18, %v3708_v7  ;;  %v4431_v47 = vpop.f32.mrf.mxu0  ;;  %v422_v40 = vpop.f32.mrf.mxu1 }
 0x13a   :  { %v4422_v12 = vsel %vm6251_vm5, %v969_v20, -1e+30  ;;  %v4426_v26 = vadd.f32 %v3767_v28, %v4165_v0  ;;  %v462_v42 = vmul.f32 14.285714, %v4193_v3  ;;  %v4429_v59 = vmul.f32 14.285714, %v418_v10 }
 0x13b   :  { %6249 = vst [vmem:[#allocation63_spill] sm:$0xff] %v4411_v53  ;;  %6250 = vst [vmem:[#allocation64_spill] sm:$0xff] %v4413_v22  ;;  %v1147_v22 = vmax.f32 %v4276_v6, %v4386_v44  ;;  %v940_v63 = vadd.f32 %v3743_v17, %v4395_v8  ;;  %v4439_v18 = vadd.f32 %v3743_v17, %v4180_v2  ;;  %v4451_v3 = vmul.f32 14.285714, %v422_v40  ;;  %v4467_v40 = vpop.f32.mrf.mxu0  ;;  %v424_v44 = vpop.f32.mrf.mxu1  ;;  %v6263_v6 = vld [vmem:[#allocation24_spill] sm:$0xff] }
 0x13c   :  { %6252 = vst [vmem:[#allocation65_spill] sm:$0xff] %v4422_v12  ;;  %vm6254_vm0 = vcmp.eq.s32.totalorder %v4223_v1, %v3699_v4  ;;  %v1964_v20 = vsel %vm799_vm12, %v460_v11, 0.0  ;;  %v4459_v2 = vadd.f32 %v3767_v28, %v462_v42  ;;  %v4462_v10 = vmul.f32 14.285714, %v4219_v39  ;;  %1103 = vmax.xlane.f32.xlu1 %v1102_v45  ;;  %v6260_v39 = vld [vmem:[#allocation25_spill] sm:$0xff] }
 0x13d   :  { %6253 = vst [vmem:[#allocation66_spill] sm:$0xff] %v4439_v18  ;;  %vm4447_vm4 = vmand %vm6254_vm0, %vm6064_vm15  ;;  %1148 = vmax.xlane.f32.xlu0 %v1147_v22  ;;  %v1150_v11 = vmax.f32 %v4354_v34, %v4422_v12  ;;  %vm6258_vm12 = vcmp.ne.s32.totalorder %v3763_v25, %v3485_v49  ;;  %vm6259_vm0 = vcmp.eq.s32.totalorder %v3463_v41, %v3483_v48  ;;  %v6261_v45 = vld [vmem:[#allocation5_spill] sm:$0xff]  ;;  %v4483_v22 = vpop.permute.xlu1 %774  ;;  %v2005_v41 = vsel %vm840_vm9, %v4451_v3, 0.0 }
 0x13e   :  { %6257 = vst [vmem:[#allocation67_spill] sm:$0xff] %v4459_v2  ;;  %v2004_v1 = vsel %vm4447_vm4, %v4429_v59, 0.0  ;;  %vm862_vm15 = vmand %vm6259_vm0, %vm6258_vm12  ;;  %vm844_vm5 = vcmp.eq.s32.totalorder %v4408_v62, %v3483_v48  ;;  %vm6079_vm4 = vcmp.ne.s32.totalorder %v6260_v39, %v3708_v7  ;;  %v973_v0 = vadd.f32 %v3767_v28, %v4217_v50 }
 0x13f   :  { %v4487_v12 = vadd.f32 %v2004_v1, %v2003_v55  ;;  %v1963_v34 = vsel %vm862_vm15, %v4319_v33, 0.0  ;;  %v4498_v9 = vadd.f32 %v3743_v17, %v4462_v10  ;;  %v4501_v5 = vmul.f32 14.285714, %v4246_v32  ;;  %v4505_v55 = vpop.f32.mrf.mxu0  ;;  %v428_v1 = vpop.f32.mrf.mxu1  ;;  %v6264_v33 = vld [vmem:[#allocation9_spill] sm:$0xff]  ;;  %vm4521_vm0 = vmand %vm841_vm1, %vm6071_vm6 }
 0x140   :  { %v4503_v50 = vmul.f32 14.285714, %v424_v44  ;;  %vm803_vm9 = vcmp.eq.s32.totalorder %v6261_v45, %v3699_v4  ;;  %v4513_v31 = vadd.f32 %v3743_v17, %v4236_v36  ;;  %vm6267_vm10 = vcmp.eq.s32.totalorder %v3475_v46, %v3699_v4  ;;  %vm6268_vm15 = vmmov %vm6258_vm12  ;;  %1151 = vmax.xlane.f32.xlu1 %v1150_v11 }
 0x141   :  { %6262 = vst [vmem:[#allocation25_spill] sm:$0xff] %v4487_v12  ;;  %v2034_v12 = vadd.f32 %v1964_v20, %v1963_v34  ;;  %v4525_v34 = vmul.f32 14.285714, %v428_v1  ;;  %v1966_v44 = vsel %vm6267_vm10, %v462_v42, 0.0  ;;  %v4534_v36 = vsel %vm6268_vm15, %v4368_v54, -1e+30  ;;  %v4554_v54 = vpop.f32.mrf.mxu0  ;;  %v430_v56 = vpop.f32.mrf.mxu1 }
 0x142   :  { %6269 = vst [vmem:[#allocation5_spill] sm:$0xff] %v4534_v36  ;;  %v6270_v20 = vld [vmem:[#allocation26_spill] sm:$0xff]  ;;  %v4542_v57 = vadd.f32 %v3767_v28, %v4501_v5  ;;  %v4546_v1 = vadd.f32 %v3767_v28, %v4281_v35  ;;  %v4549_v42 = vmul.f32 14.285714, %v4283_v52  ;;  %v2006_v25 = vsel %vm4521_vm0, %v4503_v50, 0.0  ;;  %v6273_v35 = vld [vmem:[#allocation23_spill] sm:$0xff] }
 0x143   :  { %2035 = vadd.xlane.f32.xlu0 %v2034_v12  ;;  %vm6271_vm10 = vcmp.ne.s32.totalorder %v3795_v58, %v3485_v49  ;;  %vm6272_vm15 = vcmp.eq.s32.totalorder %v3475_v46, %v3483_v48  ;;  %vm846_vm1 = vcmp.eq.s32.totalorder %v4483_v22, %v3483_v48  ;;  %vm646_vm12 = vcmp.ne.s32.totalorder %v6273_v35, %v3708_v7  ;;  %v338_v51 = vpop.f32.mrf.mxu0  ;;  %v434_v37 = vpop.f32.mrf.mxu1 }
 0x144   :  { %vm864_vm6 = vmand %vm6272_vm15, %vm6271_vm10  ;;  %vm805_vm0 = vcmp.eq.s32.totalorder %v6264_v33, %v3699_v4  ;;  %v4568_v52 = vadd.f32 %v2006_v25, %v2005_v41  ;;  %v2007_v12 = vsel %vm842_vm11, %v4525_v34, 0.0  ;;  %v4578_v46 = vsel %vm6271_vm10, %v940_v63, -1e+30 }
 0x145   :  { %v1965_v11 = vsel %vm864_vm6, %v4395_v8, 0.0  ;;  %6275 = vst [vmem:[#allocation9_spill] sm:$0xff] %v4578_v46  ;;  %v466_v32 = vmul.f32 14.285714, %v4324_v19  ;;  %v4581_v61 = vmul.f32 14.285714, %v430_v56  ;;  %v1105_v25 = vmax.f32 %v4534_v36, %v4411_v53 }
 0x146   :  { %6274 = vst [vmem:[#allocation24_spill] sm:$0xff] %v4568_v52  ;;  %v2037_v41 = vadd.f32 %v1966_v44, %v1965_v11  ;;  %v4587_v52 = vadd.f32 %v3743_v17, %v4549_v42  ;;  %v4590_v8 = vmul.f32 14.285714, %v4358_v38  ;;  %vm6276_vm6 = vcmp.eq.s32.totalorder %v4364_v30, %v3699_v4  ;;  %v340_v30 = vpop.f32.mrf.mxu0  ;;  %v6285_v53 = vld [vmem:[#allocation18_spill] sm:$0xff] }
 0x147   :  { %vm907_vm11 = vmand %vm6276_vm6, %vm6080_vm3  ;;  %v4598_v58 = vmul.f32 14.285714, %v434_v37  ;;  %vm6277_vm15 = vcmp.ne.s32.totalorder %v3736_v15, %v3708_v7  ;;  %v4607_v63 = vadd.f32 %v3767_v28, %v466_v32  ;;  %v4611_v19 = vadd.f32 %v3767_v28, %v4356_v60  ;;  %1106 = vmax.xlane.f32.xlu0 %v1105_v25  ;;  %v436_v37 = vpop.f32.mrf.mxu1  ;;  %v6283_v25 = vld [vmem:[#allocation14_spill] sm:$0xff] }
 0x148   :  { %v4604_v56 = vsel %vm6277_vm15, %v4426_v26, -1e+30  ;;  %v2008_v38 = vsel %vm907_vm11, %v4581_v61, 0.0  ;;  %2038 = vadd.xlane.f32.xlu1 %v2037_v41  ;;  %v1108_v44 = vmax.f32 %v4578_v46, %v4459_v2  ;;  %v469_v15 = vmul.f32 14.285714, %v4431_v47  ;;  %v6282_v41 = vld [vmem:[#allocation8_spill] sm:$0xff] }
 0x149   :  { %6278 = vst [vmem:[#allocation26_spill] sm:$0xff] %v4604_v56  ;;  %v4617_v26 = vadd.f32 %v2008_v38, %v2007_v12  ;;  %v2009_v11 = vsel %vm844_vm5, %v4598_v58, 0.0  ;;  %vm6280_vm10 = vcmp.ne.s32.totalorder %v3757_v23, %v3708_v7  ;;  %vm807_vm6 = vcmp.eq.s32.totalorder %v6282_v41, %v3699_v4  ;;  %v440_v2 = vpop.f32.mrf.mxu1 }
 0x14a   :  { %v4626_v60 = vsel %vm6280_vm10, %v973_v0, -1e+30  ;;  %vm809_vm11 = vcmp.eq.s32.totalorder %v6283_v25, %v3699_v4  ;;  %v946_v47 = vadd.f32 %v3743_v17, %v4590_v8  ;;  %v4635_v12 = vmul.f32 14.285714, %v4400_v21 }
 0x14b   :  { %6279 = vst [vmem:[#allocation23_spill] sm:$0xff] %v4617_v26  ;;  %6281 = vst [vmem:[#allocation68_spill] sm:$0xff] %v4626_v60  ;;  %v4637_v38 = vmul.f32 14.285714, %v436_v37  ;;  %v344_v26 = vpop.f32.mrf.mxu0  ;;  %v1153_v23 = vmax.f32 %v4392_v13, %v4604_v56  ;;  %v948_v0 = vadd.f32 %v3743_v17, %v469_v15  ;;  %v4643_v46 = vmul.f32 14.285714, %v4467_v40  ;;  %v442_v36 = vpop.f32.mrf.mxu1 }
 0x14c   :  { %vm6284_vm5 = vcmp.eq.s32.totalorder %v4408_v62, %v3699_v4  ;;  %v4651_v21 = vmul.f32 14.285714, %v440_v2  ;;  %v1968_v37 = vsel %vm803_vm9, %v4501_v5, 0.0  ;;  %v471_v56 = vmul.f32 14.285714, %v4505_v55  ;;  %1109 = vmax.xlane.f32.xlu1 %v1108_v44 }
 0x14d   :  { %vm909_vm15 = vmand %vm6284_vm5, %vm6079_vm4  ;;  %v473_v13 = vmul.f32 14.285714, %v338_v51  ;;  %1154 = vmax.xlane.f32.xlu0 %v1153_v23  ;;  %vm815_vm10 = vcmp.eq.s32.totalorder %v6285_v53, %v3699_v4  ;;  %v1156_v62 = vmax.f32 %v4439_v18, %v4626_v60  ;;  %vm6286_vm5 = vcmp.ne.s32.totalorder %v6263_v6, %v3485_v49  ;;  %v6288_v51 = vld [vmem:[#allocation13_spill] sm:$0xff]  ;;  %v346_v55 = vpop.f32.mrf.mxu0 }
 0x14e   :  { %v2010_v40 = vsel %vm909_vm15, %v4637_v38, 0.0  ;;  %vm6287_vm9 = vcmp.eq.s32.totalorder %v6261_v45, %v3483_v48  ;;  %vm811_vm3 = vcmp.eq.s32.totalorder %v6288_v51, %v3699_v4  ;;  %v2011_v2 = vsel %vm846_vm1, %v4651_v21, 0.0  ;;  %v6289_v45 = vld [vmem:[#allocation19_spill] sm:$0xff] }
 0x14f   :  { %vm866_vm4 = vmand %vm6287_vm9, %vm6286_vm5  ;;  %v4671_v5 = vadd.f32 %v2010_v40, %v2009_v11  ;;  %v1970_v23 = vsel %vm805_vm0, %v466_v32, 0.0  ;;  %vm813_vm15 = vcmp.eq.s32.totalorder %v6289_v45, %v3699_v4  ;;  %v950_v60 = vadd.f32 %v3743_v17, %v471_v56 }
 0x150   :  { %v1967_v44 = vsel %vm866_vm4, %v4462_v10, 0.0  ;;  %v4684_v18 = vmul.f32 14.285714, %v442_v36  ;;  %vm6290_vm5 = vcmp.ne.s32.totalorder %v6270_v20, %v3485_v49  ;;  %vm6291_vm1 = vcmp.eq.s32.totalorder %v6264_v33, %v3483_v48  ;;  %1157 = vmax.xlane.f32.xlu1 %v1156_v62 }
 0x151   :  { %v2040_v11 = vadd.f32 %v1968_v37, %v1967_v44  ;;  %vm868_vm9 = vmand %vm6291_vm1, %vm6290_vm5  ;;  %vm6292_vm4 = vcmp.ne.s32.totalorder %v6263_v6, %v3485_v49  ;;  %v4699_v32 = vmul.f32 14.285714, %v4554_v54  ;;  %v952_v36 = vadd.f32 %v3743_v17, %v473_v13  ;;  %v6298_v44 = vld [vmem:[#allocation6_spill] sm:$0xff] }
 0x152   :  { %v4696_v10 = vsel %vm6292_vm4, %v4498_v9, -1e+30  ;;  %v4702_v40 = vmul.f32 14.285714, %v340_v30  ;;  %vm6293_vm0 = vcmp.eq.s32.totalorder %v4483_v22, %v3699_v4  ;;  %v1969_v48 = vsel %vm868_vm9, %v4549_v42, 0.0 }
 0x153   :  { %vm911_vm5 = vmand %vm6293_vm0, %vm646_vm12  ;;  %v475_v33 = vmul.f32 14.285714, %v344_v26  ;;  %v4711_v6 = vmul.f32 14.285714, %v346_v55  ;;  %2041 = vadd.xlane.f32.xlu0 %v2040_v11  ;;  %v2043_v54 = vadd.f32 %v1970_v23, %v1969_v48  ;;  %v1111_v30 = vmax.f32 %v4696_v10, %v4542_v57  ;;  %v6300_v23 = vld [vmem:[#allocation7_spill] sm:$0xff]  ;;  %v6305_v26 = vld [vmem:[#allocation10_spill] sm:$0xff] }
 0x154   :  { %v2012_v9 = vsel %vm911_vm5, %v4684_v18, 0.0  ;;  %vm6294_vm1 = vcmp.ne.s32.totalorder %v6270_v20, %v3485_v49  ;;  %vm6295_vm9 = vcmp.ne.s32.totalorder %v3739_v16, %v3708_v7  ;;  %v1971_v62 = vsel %vm3504_vm2, %v4590_v8, 0.0 }
 0x155   :  { %v4714_v37 = vadd.f32 %v2012_v9, %v2011_v2  ;;  %v4722_v22 = vsel %vm6294_vm1, %v4587_v52, -1e+30  ;;  %v4728_v42 = vsel %vm6295_vm9, %v4546_v1, -1e+30  ;;  %v1972_v2 = vsel %vm807_vm6, %v4635_v12, 0.0  ;;  %2044 = vadd.xlane.f32.xlu1 %v2043_v54 }
 0x156   :  { %v1973_v20 = vsel %vm3529_vm7, %v469_v15, 0.0  ;;  %v1974_v52 = vsel %vm809_vm11, %v4643_v46, 0.0  ;;  %v2046_v16 = vadd.f32 %v1972_v2, %v1971_v62  ;;  %vm6299_vm4 = vcmp.ne.s32.totalorder %v6298_v44, %v3485_v49  ;;  %v6307_v2 = vld [vmem:[#allocation12_spill] sm:$0xff] }
 0x157   :  { %v4743_v1 = vadd.f32 %v1974_v52, %v1973_v20  ;;  %v4748_v8 = vsel %vm6299_vm4, %v946_v47, -1e+30  ;;  %vm6301_vm2 = vcmp.ne.s32.totalorder %v6300_v23, %v3485_v49  ;;  %v4757_v15 = vadd.f32 %v3743_v17, %v4301_v27  ;;  %1112 = vmax.xlane.f32.xlu0 %v1111_v30  ;;  %v6310_v20 = vld [vmem:[#allocation15_spill] sm:$0xff] }
 0x158   :  { %v4753_v41 = vsel %vm6301_vm2, %v948_v0, -1e+30  ;;  %v954_v25 = vadd.f32 %v3743_v17, %v475_v33  ;;  %v1114_v11 = vmax.f32 %v4722_v22, %v4607_v63  ;;  %vm6302_vm7 = vcmp.ne.s32.totalorder %v3772_v29, %v3708_v7 }
 0x159   :  { %v4766_v47 = vsel %vm6302_vm7, %v4611_v19, -1e+30  ;;  %v1980_v0 = vsel %vm815_vm10, %v4711_v6, 0.0  ;;  %v1159_v27 = vmax.f32 %v4513_v31, %v4728_v42  ;;  %v1975_v9 = vsel %vm3536_vm8, %v471_v56, 0.0 }
 0x15a   :  { %v1976_v54 = vsel %vm811_vm3, %v4699_v32, 0.0  ;;  %v1977_v19 = vsel %vm3555_vm13, %v473_v13, 0.0  ;;  %v1978_v53 = vsel %vm813_vm15, %v4702_v40, 0.0  ;;  %vm6306_vm6 = vcmp.ne.s32.totalorder %v6305_v26, %v3485_v49  ;;  %1115 = vmax.xlane.f32.xlu1 %v1114_v11  ;;  %v1918_v26 = vld [vmem:[#allocation4 + $0x8] sm:$0xff] }
 0x15b   :  { %v4780_v30 = vadd.f32 %v1976_v54, %v1975_v9  ;;  %v4791_v62 = vsel %vm6306_vm6, %v950_v60, -1e+30  ;;  %v4793_v56 = vadd.f32 %v1978_v53, %v1977_v19  ;;  %vm6308_vm8 = vcmp.ne.s32.totalorder %v6307_v2, %v3485_v49  ;;  %1160 = vmax.xlane.f32.xlu0 %v1159_v27  ;;  %v1933_v53 = vld [vmem:[#allocation4 + $0x80] sm:$0xff] }
 0x15c   :  { %v4798_v51 = vsel %vm6308_vm8, %v952_v36, -1e+30  ;;  %v1162_v13 = vmax.f32 %v4757_v15, %v4766_v47  ;;  %v1979_v4 = vsel %vm3562_vm14, %v475_v33, 0.0  ;;  %vm6311_vm13 = vcmp.ne.s32.totalorder %v6310_v20, %v3485_v49 }
 0x15d   :  { %v4804_v45 = vadd.f32 %v1980_v0, %v1979_v4  ;;  %v4809_v60 = vsel %vm6311_vm13, %v954_v25, -1e+30  ;;  %v4813_v52 = vadd.f32 %v3767_v28, %v4635_v12  ;;  %v979_v36 = vadd.f32 %v3767_v28, %v4429_v59  ;;  %v1934_v4 = vld [vmem:[#allocation4 + $0x88] sm:$0xff] }
 0x15e   :  { %v3117_v44 = vmov -1e+30   ;;  %vm6312_vm3 = vcmask 7168   ;;  %v4851_v49 = vadd.f32 %v3767_v28, %v4643_v46  ;;  %1163 = vmax.xlane.f32.xlu1 %v1162_v13  ;;  %v981_v59 = vadd.f32 %v3767_v28, %v4503_v50 }
 0x15f   :  { %28 = vst.msk [vmem:[#allocation2] sm:$0xff] %vm6312_vm3, %v3117_v44  ;;  %vm6313_vm11 = vmmov %vm6312_vm3  ;;  %2047 = vadd.xlane.f32.xlu0 %v2046_v16  ;;  %v4857_v12 = vadd.f32 %v3743_v17, %v4381_v14  ;;  %v1117_v33 = vmax.f32 %v4748_v8, %v4813_v52  ;;  %v4868_v46 = vadd.f32 %v3743_v17, %v4451_v3  ;;  %v6344_v14 = vld [vmem:[#allocation22_spill] sm:$0xff] }
 0x160   :  { %29 = vst.msk [vmem:[#allocation2 + $0x8] sm:$0xff] %vm6313_vm11, %v3117_v44  ;;  %vm6314_vm14 = vmmov %vm6312_vm3  ;;  %v1120_v50 = vmax.f32 %v4753_v41, %v4851_v49  ;;  %v983_v25 = vadd.f32 %v3767_v28, %v4581_v61  ;;  %v4890_v11 = vadd.f32 %v3767_v28, %v4702_v40  ;;  %v985_v0 = vadd.f32 %v3767_v28, %v4637_v38 }
 0x161   :  { %30 = vst.msk [vmem:[#allocation2 + $0x10] sm:$0xff] %vm6314_vm14, %v3117_v44  ;;  %vm6315_vm10 = vmmov %vm6312_vm3  ;;  %v4897_v27 = vadd.f32 %v3743_v17, %v4525_v34  ;;  %v4908_v40 = vadd.f32 %v3743_v17, %v4598_v58  ;;  %v4924_v48 = vadd.f32 %v3767_v28, %v4711_v6  ;;  %v987_v9 = vadd.f32 %v3767_v28, %v4684_v18 }
 0x162   :  { %31 = vst.msk [vmem:[#allocation2 + $0x18] sm:$0xff] %vm6315_vm10, %v3117_v44  ;;  %vm6316_vm15 = vmmov %vm6312_vm3  ;;  %2050 = vadd.xlane.f32.xlu1 %v4743_v1  ;;  %v4884_v1 = vadd.f32 %v3767_v28, %v4699_v32  ;;  %v1126_v38 = vmax.f32 %v4798_v51, %v4890_v11  ;;  %v1917_v28 = vld [vmem:[#allocation4] sm:$0xff] }
 0x163   :  { %32 = vst.msk [vmem:[#allocation2 + $0x20] sm:$0xff] %vm6316_vm15, %v3117_v44  ;;  %vm6317_vm0 = vmmov %vm6312_vm3  ;;  %1118 = vmax.xlane.f32.xlu0 %v1117_v33  ;;  %v1129_v54 = vmax.f32 %v4809_v60, %v4924_v48 }
 0x164   :  { %33 = vst.msk [vmem:[#allocation2 + $0x28] sm:$0xff] %vm6317_vm0, %v3117_v44  ;;  %vm6318_vm5 = vmmov %vm6317_vm0  ;;  %v1123_v32 = vmax.f32 %v4791_v62, %v4884_v1 }
 0x165   :  { %34 = vst.msk [vmem:[#allocation2 + $0x30] sm:$0xff] %vm6318_vm5, %v3117_v44  ;;  %vm6319_vm1 = vmmov %vm6317_vm0 }
 0x166   :  { %35 = vst.msk [vmem:[#allocation2 + $0x38] sm:$0xff] %vm6319_vm1, %v3117_v44  ;;  %vm6320_vm9 = vmmov %vm6317_vm0  ;;  %1121 = vmax.xlane.f32.xlu1 %v1120_v50  ;;  %v4942_v18 = vld [vmem:[#allocation2] sm:$0xff] }
 0x167   :  { %36 = vst.msk [vmem:[#allocation2 + $0x40] sm:$0xff] %vm6320_vm9, %v3117_v44  ;;  %vm6321_vm4 = vmmov %vm6317_vm0 }
 0x168   :  { %37 = vst.msk [vmem:[#allocation2 + $0x48] sm:$0xff] %vm6321_vm4, %v3117_v44  ;;  %vm6322_vm2 = vmmov %vm6317_vm0 }
 0x169   :  { %38 = vst.msk [vmem:[#allocation2 + $0x50] sm:$0xff] %vm6322_vm2, %v3117_v44  ;;  %vm6323_vm7 = vmmov %vm6317_vm0 }
 0x16a   :  { %39 = vst.msk [vmem:[#allocation2 + $0x58] sm:$0xff] %vm6323_vm7, %v3117_v44  ;;  %vm6324_vm6 = vmmov %vm6317_vm0 }
 0x16b   :  { %40 = vst.msk [vmem:[#allocation2 + $0x60] sm:$0xff] %vm6324_vm6, %v3117_v44  ;;  %vm6325_vm8 = vmmov %vm6317_vm0 }
 0x16c   :  { %41 = vst.msk [vmem:[#allocation2 + $0x68] sm:$0xff] %vm6325_vm8, %v3117_v44  ;;  %vm6326_vm13 = vmmov %vm6317_vm0 }
 0x16d   :  { %42 = vst.msk [vmem:[#allocation2 + $0x70] sm:$0xff] %vm6326_vm13, %v3117_v44  ;;  %vm6327_vm3 = vmmov %vm6317_vm0 }
 0x16e   :  { %43 = vst.msk [vmem:[#allocation2 + $0x78] sm:$0xff] %vm6327_vm3, %v3117_v44  ;;  %vm6328_vm11 = vmmov %vm6317_vm0 }
 0x16f   :  { %44 = vst.msk [vmem:[#allocation2 + $0x80] sm:$0xff] %vm6328_vm11, %v3117_v44  ;;  %vm6329_vm14 = vmmov %vm6317_vm0 }
 0x170   :  { %45 = vst.msk [vmem:[#allocation2 + $0x88] sm:$0xff] %vm6329_vm14, %v3117_v44  ;;  %vm6330_vm10 = vmmov %vm6317_vm0  ;;  %vm6343_vm14 = vcmp.ne.s32.totalorder %v3760_v24, %v3708_v7 }
 0x171   :  { %46 = vst.msk [vmem:[#allocation2 + $0x90] sm:$0xff] %vm6330_vm10, %v3117_v44  ;;  %vm6331_vm15 = vmmov %vm6317_vm0  ;;  %v4864_v23 = vsel %vm6343_vm14, %v979_v36, -1e+30  ;;  %vm6345_vm10 = vcmp.ne.s32.totalorder %v6344_v14, %v3708_v7 }
 0x172   :  { %47 = vst.msk [vmem:[#allocation2 + $0x98] sm:$0xff] %vm6331_vm15, %v3117_v44  ;;  %vm6332_vm5 = vmmov %vm6317_vm0  ;;  %v4876_v16 = vsel %vm6345_vm10, %v981_v59, -1e+30  ;;  %v1165_v24 = vmax.f32 %v4857_v12, %v4864_v23  ;;  %vm6346_vm15 = vcmp.ne.s32.totalorder %v3783_v43, %v3708_v7  ;;  %v4960_v59 = vld [vmem:[#allocation2 + $0x8] sm:$0xff] }
 0x173   :  { %48 = vst.msk [vmem:[#allocation2 + $0xa0] sm:$0xff] %vm6317_vm0, %v3117_v44  ;;  %vm6333_vm1 = vmmov %vm6317_vm0  ;;  %v1168_v3 = vmax.f32 %v4868_v46, %v4876_v16  ;;  %v4904_v61 = vsel %vm6346_vm15, %v983_v25, -1e+30 }
 0x174   :  { %49 = vst.msk [vmem:[#allocation2 + $0xa8] sm:$0xff] %vm6332_vm5, %v3117_v44  ;;  %vm6334_vm9 = vmmov %vm6317_vm0  ;;  %1166 = vmax.xlane.f32.xlu0 %v1165_v24  ;;  %v1171_v43 = vmax.f32 %v4897_v27, %v4904_v61 }
 0x175   :  { %50 = vst.msk [vmem:[#allocation2 + $0xb0] sm:$0xff] %vm6333_vm1, %v3117_v44  ;;  %vm6335_vm4 = vmmov %vm6317_vm0  ;;  %1169 = vmax.xlane.f32.xlu1 %v1168_v3 }
 0x176   :  { %51 = vst.msk [vmem:[#allocation2 + $0xb8] sm:$0xff] %vm6334_vm9, %v3117_v44  ;;  %vm6336_vm2 = vmmov %vm6317_vm0  ;;  %v4953_v55 = vld [vmem:[#allocation2 + $0x80] sm:$0xff] }
 0x177   :  { %52 = vst.msk [vmem:[#allocation2 + $0xc0] sm:$0xff] %vm6335_vm4, %v3117_v44  ;;  %vm6337_vm7 = vmmov %vm6317_vm0  ;;  %v4962_v33 = vld [vmem:[#allocation2 + $0x88] sm:$0xff] }
 0x178   :  { %53 = vst.msk [vmem:[#allocation2 + $0xc8] sm:$0xff] %vm6336_vm2, %v3117_v44  ;;  %vm6338_vm6 = vmmov %vm6317_vm0  ;;  %2053 = vadd.xlane.f32.xlu0 %v4780_v30  ;;  %v4938_v30 = vsel %vm646_vm12, %v987_v9, -1e+30 }
 0x179   :  { %54 = vst.msk [vmem:[#allocation2 + $0xd0] sm:$0xff] %vm6337_vm7, %v3117_v44  ;;  %vm6339_vm8 = vmmov %vm6317_vm0  ;;  %2056 = vadd.xlane.f32.xlu1 %v4793_v56 }
 0x17a   :  { %55 = vst.msk [vmem:[#allocation2 + $0xd8] sm:$0xff] %vm6338_vm6, %v3117_v44  ;;  %vm6340_vm13 = vmmov %vm6317_vm0 }
 0x17b   :  { %56 = vst.msk [vmem:[#allocation2 + $0xe0] sm:$0xff] %vm6339_vm8, %v3117_v44  ;;  %vm6341_vm3 = vmmov %vm6317_vm0 }
 0x17c   :  { %57 = vst.msk [vmem:[#allocation2 + $0xe8] sm:$0xff] %vm6340_vm13, %v3117_v44  ;;  %vm6342_vm11 = vmmov %vm6317_vm0  ;;  %1124 = vmax.xlane.f32.xlu0 %v1123_v32  ;;  %vm6347_vm0 = vcmp.ne.s32.totalorder %v6260_v39, %v3708_v7  ;;  %v4931_v39 = vadd.f32 %v3743_v17, %v4651_v21  ;;  %v4976_v32 = vld [vmem:[#allocation2 + $0x10] sm:$0xff] }
 0x17d   :  { %58 = vst.msk [vmem:[#allocation2 + $0xf0] sm:$0xff] %vm6341_vm3, %v3117_v44  ;;  %v4916_v34 = vsel %vm6347_vm0, %v985_v0, -1e+30  ;;  %1127 = vmax.xlane.f32.xlu1 %v1126_v38  ;;  %vm6348_vm5 = vmmov %vm6333_vm1  ;;  %v1919_v0 = vld [vmem:[#allocation4 + $0x10] sm:$0xff]  ;;  %v1924_v38 = vld [vmem:[#allocation4 + $0x38] sm:$0xff] }
 0x17e   :  { %59 = vst.msk [vmem:[#allocation2 + $0xf8] sm:$0xff] %vm6342_vm11, %v3117_v44  ;;  %v1174_v58 = vmax.f32 %v4908_v40, %v4916_v34  ;;  %v1177_v6 = vmax.f32 %v4931_v39, %v4938_v30  ;;  %vm6349_vm12 = vmmov %vm6333_vm1 }
 0x17f   :  { %vm6350_vm9 = vmmov %vm6333_vm1 }
 0x180   :  { %1172 = vmax.xlane.f32.xlu0 %v1171_v43  ;;  %vm6351_vm4 = vmmov %vm6333_vm1 }
 0x181   :  { %1175 = vmax.xlane.f32.xlu1 %v1174_v58  ;;  %vm6352_vm2 = vmmov %vm6333_vm1 }
 0x182   :  { %vm6353_vm7 = vmmov %vm6333_vm1 }
 0x183   :  { %vm6354_vm6 = vmmov %vm6333_vm1 }
 0x184   :  { %2059 = vadd.xlane.f32.xlu0 %v4804_v45  ;;  %vm6355_vm8 = vmmov %vm6333_vm1 }
 0x185   :  { %vm6356_vm13 = vmmov %vm6333_vm1 }
 0x186   :  { %vm6359_vm3 = vmmov %vm6333_vm1 }
 0x187   :  { %vm6360_vm11 = vmmov %vm6333_vm1 }
 0x188   :  { %1130 = vmax.xlane.f32.xlu0 %v1129_v54  ;;  %vm6364_vm14 = vmmov %vm6333_vm1 }
 0x189   :  { %vm6365_vm10 = vmmov %vm6333_vm1 }
 0x18a   :  { %vm6369_vm15 = vmmov %vm6333_vm1 }
 0x18b   :  { %vm6370_vm0 = vmmov %vm6333_vm1 }
 0x18c   :  { %1178 = vmax.xlane.f32.xlu0 %v1177_v6 }
 0x193   :  { %v2015_v29 = vpop.xlane.xlu1 %2014 }
 0x194   :  { %v1086_v19 = vpop.xlane.xlu0 %1085  ;;  %v2109_v17 = vadd.f32 %v2015_v29, %v1917_v28  ;;  %v4991_v28 = vld [vmem:[#allocation2 + $0x90] sm:$0xff]  ;;  %v1920_v29 = vld [vmem:[#allocation4 + $0x18] sm:$0xff] }
 0x195   :  { %v4945_v21 = vmax.f32 %v4942_v18, %v1086_v19 }
 0x196   :  { %2141 = vst.msk [vmem:[#allocation4] sm:$0xff] %vm6348_vm5, %v2109_v17  ;;  %vm6373_vm5 = vmmov %vm6370_vm0 }
 0x197   :  { %1885 = vst.msk [vmem:[#allocation2] sm:$0xff] %vm6349_vm12, %v4945_v21  ;;  %1214 = vperm.xlu1 %2792, %v4945_v21   ;;  %v2063_v35 = vpop.xlane.xlu1 %2062  ;;  %vm6374_vm12 = vmmov %vm6370_vm0 }
 0x198   :  { %v2018_v56 = vpop.xlane.xlu0 %2017  ;;  %v2125_v2 = vadd.f32 %v2063_v35, %v1933_v53 }
 0x199   :  { %v2110_v13 = vadd.f32 %v2018_v56, %v1918_v26  ;;  %v1921_v56 = vld [vmem:[#allocation4 + $0x20] sm:$0xff] }
 0x19a   :  { %2157 = vst.msk [vmem:[#allocation4 + $0x80] sm:$0xff] %vm6333_vm1, %v2125_v2  ;;  %v5002_v2 = vld [vmem:[#allocation2 + $0x18] sm:$0xff]  ;;  %vm6378_vm1 = vmmov %vm6370_vm0 }
 0x19b   :  { %2142 = vst.msk [vmem:[#allocation4 + $0x8] sm:$0xff] %vm6350_vm9, %v2110_v13  ;;  %6358 = vst [vmem:[#allocation14_spill] sm:$0xff] %v5002_v2 }
 0x19c   :  { %vm6379_vm9 = vmmov %vm6370_vm0 }
 0x19e   :  { %v1134_v45 = vpop.xlane.xlu1 %1133  ;;  %v2066_v20 = vpop.xlane.xlu0 %2065 }
 0x19f   :  { %v4958_v36 = vmax.f32 %v4953_v55, %v1134_v45  ;;  %v2126_v44 = vadd.f32 %v2066_v20, %v1934_v4 }
 0x1a1   :  { %1901 = vst.msk [vmem:[#allocation2 + $0x80] sm:$0xff] %vm6351_vm4, %v4958_v36  ;;  %vm6383_vm4 = vmmov %vm6370_vm0 }
 0x1a2   :  { %2158 = vst.msk [vmem:[#allocation4 + $0x88] sm:$0xff] %vm6352_vm2, %v2126_v44  ;;  %1294 = vperm.xlu0 %2791, %v4958_v36   ;;  %v1089_v14 = vpop.xlane.xlu1 %1088  ;;  %v1137_v24 = vpop.xlane.xlu0 %1136  ;;  %vm6384_vm2 = vmmov %vm6370_vm0 }
 0x1a3   :  { %v4971_v3 = vmax.f32 %v4960_v59, %v1089_v14  ;;  %v4974_v25 = vmax.f32 %v4962_v33, %v1137_v24  ;;  %v5013_v14 = vld [vmem:[#allocation2 + $0x20] sm:$0xff]  ;;  %v5015_v24 = vld [vmem:[#allocation2 + $0x98] sm:$0xff] }
 0x1a4   :  { %6362 = vst [vmem:[#allocation13_spill] sm:$0xff] %v5013_v14  ;;  %6363 = vst [vmem:[#allocation19_spill] sm:$0xff] %v5015_v24 }
 0x1a5   :  { %1886 = vst.msk [vmem:[#allocation2 + $0x8] sm:$0xff] %vm6353_vm7, %v4971_v3  ;;  %1299 = vperm.xlu1 %2792, %v4974_v25   ;;  %vm6387_vm7 = vmmov %vm6370_vm0 }
 0x1a6   :  { %1902 = vst.msk [vmem:[#allocation2 + $0x88] sm:$0xff] %vm6354_vm6, %v4974_v25  ;;  %1219 = vperm.xlu0 %2791, %v4971_v3   ;;  %v1092_v9 = vpop.xlane.xlu0 %1091  ;;  %vm6388_vm6 = vmmov %vm6370_vm0 }
 0x1a7   :  { %v4989_v6 = vmax.f32 %v4976_v32, %v1092_v9 }
 0x1a8   :  { %v2021_v58 = vpop.xlane.xlu1 %2020 }
 0x1a9   :  { %v2111_v54 = vadd.f32 %v2021_v58, %v1919_v0  ;;  %1887 = vst.msk [vmem:[#allocation2 + $0x10] sm:$0xff] %vm6356_vm13, %v4989_v6  ;;  %1224 = vperm.xlu1 %2792, %v4989_v6   ;;  %vm6393_vm13 = vmmov %vm6370_vm0 }
 0x1ab   :  { %2143 = vst.msk [vmem:[#allocation4 + $0x10] sm:$0xff] %vm6355_vm8, %v2111_v54  ;;  %vm6392_vm8 = vmmov %vm6370_vm0 }
 0x1ac   :  { %v1140_v17 = vpop.xlane.xlu1 %1139  ;;  %v2024_v53 = vpop.xlane.xlu0 %2023 }
 0x1ad   :  { %v5000_v26 = vmax.f32 %v4991_v28, %v1140_v17  ;;  %v2112_v35 = vadd.f32 %v2024_v53, %v1920_v29  ;;  %v5029_v17 = vld [vmem:[#allocation2 + $0xa0] sm:$0xff]  ;;  %v1922_v53 = vld [vmem:[#allocation4 + $0x28] sm:$0xff] }
 0x1ae   :  { %6368 = vst [vmem:[#allocation6_spill] sm:$0xff] %v5029_v17 }
 0x1af   :  { %6357 = vst [vmem:[#allocation8_spill] sm:$0xff] %v5000_v26  ;;  %1903 = vst.msk [vmem:[#allocation2 + $0x90] sm:$0xff] %vm6359_vm3, %v5000_v26  ;;  %1304 = vperm.xlu0 %2791, %v5000_v26  }
 0x1b0   :  { %2144 = vst.msk [vmem:[#allocation4 + $0x18] sm:$0xff] %vm6360_vm11, %v2112_v35  ;;  %v5044_v35 = vld [vmem:[#allocation2 + $0x28] sm:$0xff]  ;;  %vm6397_vm3 = vmmov %vm6370_vm0 }
 0x1b1   :  { %v1095_v45 = vpop.xlane.xlu0 %1094  ;;  %6372 = vst [vmem:[#allocation17_spill] sm:$0xff] %v5044_v35  ;;  %vm6398_vm11 = vmmov %vm6370_vm0 }
 0x1b2   :  { %v2027_v4 = vpop.xlane.xlu1 %2026  ;;  %v5011_v44 = vmax.f32 %v5002_v2, %v1095_v45 }
 0x1b3   :  { %v2113_v20 = vadd.f32 %v2027_v4, %v1921_v56 }
 0x1b4   :  { %6361 = vst [vmem:[#allocation18_spill] sm:$0xff] %v5011_v44  ;;  %1888 = vst.msk [vmem:[#allocation2 + $0x18] sm:$0xff] %vm6365_vm10, %v5011_v44  ;;  %1229 = vperm.xlu1 %2792, %v5011_v44  }
 0x1b5   :  { %2145 = vst.msk [vmem:[#allocation4 + $0x20] sm:$0xff] %vm6364_vm14, %v2113_v20  ;;  %v1143_v9 = vpop.xlane.xlu0 %1142  ;;  %vm6401_vm14 = vmmov %vm6370_vm0 }
 0x1b6   :  { %v1098_v58 = vpop.xlane.xlu1 %1097  ;;  %v5027_v29 = vmax.f32 %v5015_v24, %v1143_v9  ;;  %v1923_v9 = vld [vmem:[#allocation4 + $0x30] sm:$0xff]  ;;  %vm6402_vm10 = vmmov %vm6370_vm0 }
 0x1b7   :  { %v5024_v54 = vmax.f32 %v5013_v14, %v1098_v58 }
 0x1b8   :  { %6367 = vst [vmem:[#allocation16_spill] sm:$0xff] %v5027_v29  ;;  %1904 = vst.msk [vmem:[#allocation2 + $0x98] sm:$0xff] %vm6370_vm0, %v5027_v29  ;;  %1309 = vperm.xlu1 %2792, %v5027_v29  }
 0x1b9   :  { %6366 = vst [vmem:[#allocation11_spill] sm:$0xff] %v5024_v54  ;;  %1889 = vst.msk [vmem:[#allocation2 + $0x20] sm:$0xff] %vm6369_vm15, %v5024_v54  ;;  %1234 = vperm.xlu0 %2791, %v5024_v54  }
 0x1ba   :  { %v1146_v4 = vpop.xlane.xlu1 %1145  ;;  %vm6406_vm15 = vmmov %vm6370_vm0 }
 0x1bb   :  { %v2030_v45 = vpop.xlane.xlu0 %2029  ;;  %v5042_v20 = vmax.f32 %v5029_v17, %v1146_v4 }
 0x1bc   :  { %v2114_v58 = vadd.f32 %v2030_v45, %v1922_v53  ;;  %v5055_v53 = vld [vmem:[#allocation2 + $0x30] sm:$0xff]  ;;  %v5057_v45 = vld [vmem:[#allocation2 + $0xa8] sm:$0xff] }
 0x1bd   :  { %6371 = vst [vmem:[#allocation7_spill] sm:$0xff] %v5042_v20  ;;  %1905 = vst.msk [vmem:[#allocation2 + $0xa0] sm:$0xff] %vm6373_vm5, %v5042_v20  ;;  %1314 = vperm.xlu0 %2791, %v5042_v20   ;;  %v6454_v20 = vld [vmem:[#allocation30_spill] sm:$0xff] }
 0x1be   :  { %2146 = vst.msk [vmem:[#allocation4 + $0x28] sm:$0xff] %vm6374_vm12, %v2114_v58  ;;  %6376 = vst [vmem:[#allocation10_spill] sm:$0xff] %v5055_v53 }
 0x1bf   :  { %6377 = vst [vmem:[#allocation12_spill] sm:$0xff] %v5057_v45  ;;  %vm6410_vm5 = vmmov %vm6370_vm0 }
 0x1c0   :  { %v1101_v13 = vpop.xlane.xlu0 %1100  ;;  %vm6411_vm12 = vmmov %vm6370_vm0 }
 0x1c1   :  { %v2033_v56 = vpop.xlane.xlu1 %2032  ;;  %v5053_v4 = vmax.f32 %v5044_v35, %v1101_v13 }
 0x1c2   :  { %v2115_v19 = vadd.f32 %v2033_v56, %v1923_v9  ;;  %v5071_v9 = vld [vmem:[#allocation2 + $0xb0] sm:$0xff] }
 0x1c3   :  { %6375 = vst [vmem:[#allocation20_spill] sm:$0xff] %v5053_v4  ;;  %1890 = vst.msk [vmem:[#allocation2 + $0x28] sm:$0xff] %vm6379_vm9, %v5053_v4  ;;  %1239 = vperm.xlu1 %2792, %v5053_v4  }
 0x1c4   :  { %2147 = vst.msk [vmem:[#allocation4 + $0x30] sm:$0xff] %vm6378_vm1, %v2115_v19  ;;  %6382 = vst [vmem:[#allocation22_spill] sm:$0xff] %v5071_v9  ;;  %v1925_v19 = vld [vmem:[#allocation4 + $0x40] sm:$0xff] }
 0x1c5   :  { %v1104_v58 = vpop.xlane.xlu1 %1103  ;;  %vm6414_vm1 = vmmov %vm6370_vm0 }
 0x1c6   :  { %v1149_v43 = vpop.xlane.xlu0 %1148  ;;  %v5066_v56 = vmax.f32 %v5055_v53, %v1104_v58  ;;  %v5086_v53 = vld [vmem:[#allocation2 + $0x38] sm:$0xff]  ;;  %vm6415_vm9 = vmmov %vm6370_vm0 }
 0x1c7   :  { %v5069_v13 = vmax.f32 %v5057_v45, %v1149_v43  ;;  %6386 = vst [vmem:[#allocation70_spill] sm:$0xff] %v5086_v53 }
 0x1c8   :  { %6380 = vst [vmem:[#allocation21_spill] sm:$0xff] %v5066_v56  ;;  %1891 = vst.msk [vmem:[#allocation2 + $0x30] sm:$0xff] %vm6383_vm4, %v5066_v56  ;;  %1244 = vperm.xlu0 %2791, %v5066_v56  }
 0x1c9   :  { %6381 = vst [vmem:[#allocation15_spill] sm:$0xff] %v5069_v13  ;;  %1906 = vst.msk [vmem:[#allocation2 + $0xa8] sm:$0xff] %vm6384_vm2, %v5069_v13  ;;  %1319 = vperm.xlu1 %2792, %v5069_v13   ;;  %v1152_v43 = vpop.xlane.xlu1 %1151 }
 0x1ca   :  { %v5084_v50 = vmax.f32 %v5071_v9, %v1152_v43  ;;  %v1926_v9 = vld [vmem:[#allocation4 + $0x48] sm:$0xff]  ;;  %vm6419_vm4 = vmmov %vm6370_vm0 }
 0x1cb   :  { %vm6420_vm2 = vmmov %vm6370_vm0 }
 0x1cc   :  { %v2036_v58 = vpop.xlane.xlu0 %2035  ;;  %6385 = vst [vmem:[#allocation69_spill] sm:$0xff] %v5084_v50  ;;  %1907 = vst.msk [vmem:[#allocation2 + $0xb0] sm:$0xff] %vm6387_vm7, %v5084_v50  ;;  %1324 = vperm.xlu0 %2791, %v5084_v50  }
 0x1cd   :  { %v2116_v7 = vadd.f32 %v2036_v58, %v1924_v38  ;;  %v5097_v38 = vld [vmem:[#allocation2 + $0x40] sm:$0xff]  ;;  %v5099_v58 = vld [vmem:[#allocation2 + $0xb8] sm:$0xff]  ;;  %vm6424_vm7 = vmmov %vm6370_vm0 }
 0x1ce   :  { %6390 = vst [vmem:[#allocation72_spill] sm:$0xff] %v5097_v38  ;;  %6391 = vst [vmem:[#allocation73_spill] sm:$0xff] %v5099_v58 }
 0x1cf   :  { %2148 = vst.msk [vmem:[#allocation4 + $0x38] sm:$0xff] %vm6388_vm6, %v2116_v7  ;;  %vm6425_vm6 = vmmov %vm6370_vm0 }
 0x1d0   :  { %v1107_v13 = vpop.xlane.xlu0 %1106 }
 0x1d1   :  { %v2039_v0 = vpop.xlane.xlu1 %2038  ;;  %v5095_v43 = vmax.f32 %v5086_v53, %v1107_v13 }
 0x1d2   :  { %v2117_v45 = vadd.f32 %v2039_v0, %v1925_v19  ;;  %v5113_v19 = vld [vmem:[#allocation2 + $0xc0] sm:$0xff] }
 0x1d3   :  { %6389 = vst [vmem:[#allocation71_spill] sm:$0xff] %v5095_v43  ;;  %1892 = vst.msk [vmem:[#allocation2 + $0x38] sm:$0xff] %vm6393_vm13, %v5095_v43  ;;  %1249 = vperm.xlu1 %2792, %v5095_v43  }
 0x1d4   :  { %2149 = vst.msk [vmem:[#allocation4 + $0x40] sm:$0xff] %vm6392_vm8, %v2117_v45  ;;  %6396 = vst [vmem:[#allocation76_spill] sm:$0xff] %v5113_v19  ;;  %v1927_v45 = vld [vmem:[#allocation4 + $0x50] sm:$0xff] }
 0x1d5   :  { %v1110_v7 = vpop.xlane.xlu1 %1109  ;;  %vm6428_vm8 = vmmov %vm6370_vm0 }
 0x1d6   :  { %v1155_v50 = vpop.xlane.xlu0 %1154  ;;  %v5108_v0 = vmax.f32 %v5097_v38, %v1110_v7  ;;  %v5128_v38 = vld [vmem:[#allocation2 + $0x48] sm:$0xff]  ;;  %vm6429_vm13 = vmmov %vm6370_vm0 }
 0x1d7   :  { %v5111_v13 = vmax.f32 %v5099_v58, %v1155_v50  ;;  %6400 = vst [vmem:[#allocation78_spill] sm:$0xff] %v5128_v38 }
 0x1d8   :  { %6394 = vst [vmem:[#allocation74_spill] sm:$0xff] %v5108_v0  ;;  %1893 = vst.msk [vmem:[#allocation2 + $0x40] sm:$0xff] %vm6397_vm3, %v5108_v0  ;;  %1254 = vperm.xlu0 %2791, %v5108_v0  }
 0x1d9   :  { %6395 = vst [vmem:[#allocation75_spill] sm:$0xff] %v5111_v13  ;;  %1908 = vst.msk [vmem:[#allocation2 + $0xb8] sm:$0xff] %vm6398_vm11, %v5111_v13  ;;  %1329 = vperm.xlu1 %2792, %v5111_v13   ;;  %v1158_v50 = vpop.xlane.xlu1 %1157 }
 0x1da   :  { %v5126_v43 = vmax.f32 %v5113_v19, %v1158_v50  ;;  %v1928_v19 = vld [vmem:[#allocation4 + $0x58] sm:$0xff]  ;;  %vm6433_vm3 = vmmov %vm6370_vm0 }
 0x1db   :  { %vm6434_vm11 = vmmov %vm6370_vm0 }
 0x1dc   :  { %v2042_v7 = vpop.xlane.xlu0 %2041  ;;  %6399 = vst [vmem:[#allocation77_spill] sm:$0xff] %v5126_v43  ;;  %1909 = vst.msk [vmem:[#allocation2 + $0xc0] sm:$0xff] %vm6401_vm14, %v5126_v43  ;;  %1334 = vperm.xlu0 %2791, %v5126_v43  }
 0x1dd   :  { %v2118_v53 = vadd.f32 %v2042_v7, %v1926_v9  ;;  %v5139_v9 = vld [vmem:[#allocation2 + $0x50] sm:$0xff]  ;;  %v5141_v7 = vld [vmem:[#allocation2 + $0xc8] sm:$0xff]  ;;  %vm6438_vm14 = vmmov %vm6370_vm0 }
 0x1de   :  { %v2045_v4 = vpop.xlane.xlu1 %2044  ;;  %6404 = vst [vmem:[#allocation80_spill] sm:$0xff] %v5139_v9  ;;  %6405 = vst [vmem:[#allocation81_spill] sm:$0xff] %v5141_v7 }
 0x1df   :  { %2150 = vst.msk [vmem:[#allocation4 + $0x48] sm:$0xff] %vm6402_vm10, %v2118_v53  ;;  %v2119_v58 = vadd.f32 %v2045_v4, %v1927_v45  ;;  %v5155_v45 = vld [vmem:[#allocation2 + $0xd0] sm:$0xff]  ;;  %vm6439_vm10 = vmmov %vm6370_vm0 }
 0x1e0   :  { %v1113_v13 = vpop.xlane.xlu0 %1112  ;;  %6409 = vst [vmem:[#allocation84_spill] sm:$0xff] %v5155_v45 }
 0x1e1   :  { %v5137_v50 = vmax.f32 %v5128_v38, %v1113_v13  ;;  %2151 = vst.msk [vmem:[#allocation4 + $0x50] sm:$0xff] %vm6406_vm15, %v2119_v58  ;;  %v1929_v58 = vld [vmem:[#allocation4 + $0x60] sm:$0xff]  ;;  %vm6442_vm15 = vmmov %vm6370_vm0 }
 0x1e3   :  { %6403 = vst [vmem:[#allocation79_spill] sm:$0xff] %v5137_v50  ;;  %1894 = vst.msk [vmem:[#allocation2 + $0x48] sm:$0xff] %vm6370_vm0, %v5137_v50  ;;  %1259 = vperm.xlu1 %2792, %v5137_v50   ;;  %v1116_v53 = vpop.xlane.xlu1 %1115 }
 0x1e4   :  { %v1161_v43 = vpop.xlane.xlu0 %1160  ;;  %v5150_v4 = vmax.f32 %v5139_v9, %v1116_v53  ;;  %v5170_v9 = vld [vmem:[#allocation2 + $0x58] sm:$0xff] }
 0x1e5   :  { %v5153_v13 = vmax.f32 %v5141_v7, %v1161_v43  ;;  %6413 = vst [vmem:[#allocation86_spill] sm:$0xff] %v5170_v9 }
 0x1e6   :  { %6407 = vst [vmem:[#allocation82_spill] sm:$0xff] %v5150_v4  ;;  %1895 = vst.msk [vmem:[#allocation2 + $0x50] sm:$0xff] %vm6410_vm5, %v5150_v4  ;;  %1264 = vperm.xlu0 %2791, %v5150_v4  }
 0x1e7   :  { %6408 = vst [vmem:[#allocation83_spill] sm:$0xff] %v5153_v13  ;;  %1910 = vst.msk [vmem:[#allocation2 + $0xc8] sm:$0xff] %vm6411_vm12, %v5153_v13  ;;  %1339 = vperm.xlu1 %2792, %v5153_v13   ;;  %v1164_v43 = vpop.xlane.xlu1 %1163 }
 0x1e8   :  { %v2048_v53 = vpop.xlane.xlu0 %2047  ;;  %v5168_v50 = vmax.f32 %v5155_v45, %v1164_v43  ;;  %v1930_v45 = vld [vmem:[#allocation4 + $0x68] sm:$0xff]  ;;  %vm6445_vm5 = vmmov %vm6370_vm0 }
 0x1e9   :  { %v2120_v38 = vadd.f32 %v2048_v53, %v1928_v19  ;;  %v5181_v19 = vld [vmem:[#allocation2 + $0x60] sm:$0xff]  ;;  %v5183_v53 = vld [vmem:[#allocation2 + $0xd8] sm:$0xff]  ;;  %vm6447_vm12 = vmmov %vm6370_vm0 }
 0x1ea   :  { %6412 = vst [vmem:[#allocation85_spill] sm:$0xff] %v5168_v50  ;;  %1911 = vst.msk [vmem:[#allocation2 + $0xd0] sm:$0xff] %vm6414_vm1, %v5168_v50  ;;  %1344 = vperm.xlu0 %2791, %v5168_v50  }
 0x1eb   :  { %2152 = vst.msk [vmem:[#allocation4 + $0x58] sm:$0xff] %vm6415_vm9, %v2120_v38  ;;  %v2051_v56 = vpop.xlane.xlu1 %2050  ;;  %6417 = vst [vmem:[#allocation88_spill] sm:$0xff] %v5181_v19 }
 0x1ec   :  { %v1119_v13 = vpop.xlane.xlu0 %1118  ;;  %v2121_v7 = vadd.f32 %v2051_v56, %v1929_v58  ;;  %6418 = vst [vmem:[#allocation89_spill] sm:$0xff] %v5183_v53  ;;  %v5197_v58 = vld [vmem:[#allocation2 + $0xe0] sm:$0xff]  ;;  %vm6497_vm1 = vmmov %vm6370_vm0 }
 0x1ed   :  { %v5179_v43 = vmax.f32 %v5170_v9, %v1119_v13  ;;  %6423 = vst [vmem:[#allocation92_spill] sm:$0xff] %v5197_v58  ;;  %vm6498_vm9 = vmmov %vm6370_vm0 }
 0x1ee   :  { %2153 = vst.msk [vmem:[#allocation4 + $0x60] sm:$0xff] %vm6419_vm4, %v2121_v7  ;;  %v1931_v7 = vld [vmem:[#allocation4 + $0x70] sm:$0xff]  ;;  %vm6500_vm4 = vmmov %vm6370_vm0 }
 0x1ef   :  { %6416 = vst [vmem:[#allocation87_spill] sm:$0xff] %v5179_v43  ;;  %1896 = vst.msk [vmem:[#allocation2 + $0x58] sm:$0xff] %vm6420_vm2, %v5179_v43  ;;  %1269 = vperm.xlu1 %2792, %v5179_v43   ;;  %v1122_v38 = vpop.xlane.xlu1 %1121 }
 0x1f0   :  { %v5192_v56 = vmax.f32 %v5181_v19, %v1122_v38  ;;  %v5212_v19 = vld [vmem:[#allocation2 + $0x68] sm:$0xff]  ;;  %vm6503_vm2 = vmmov %vm6370_vm0 }
 0x1f1   :  { %6427 = vst [vmem:[#allocation94_spill] sm:$0xff] %v5212_v19 }
 0x1f2   :  { %6421 = vst [vmem:[#allocation90_spill] sm:$0xff] %v5192_v56  ;;  %1897 = vst.msk [vmem:[#allocation2 + $0x60] sm:$0xff] %vm6424_vm7, %v5192_v56  ;;  %1274 = vperm.xlu0 %2791, %v5192_v56   ;;  %v6451_v56 = vld [vmem:[#allocation42_spill] sm:$0xff] }
 0x1f3   :  { %vm6505_vm7 = vmmov %vm6370_vm0 }
 0x1fd   :  { %v1167_v50 = vpop.xlane.xlu0 %1166 }
 0x1fe   :  { %v5195_v13 = vmax.f32 %v5183_v53, %v1167_v50  ;;  %v1170_v50 = vpop.xlane.xlu1 %1169 }
 0x1ff   :  { %v5210_v43 = vmax.f32 %v5197_v58, %v1170_v50  ;;  %v1932_v58 = vld [vmem:[#allocation4 + $0x78] sm:$0xff] }
 0x200   :  { %6422 = vst [vmem:[#allocation91_spill] sm:$0xff] %v5195_v13  ;;  %1912 = vst.msk [vmem:[#allocation2 + $0xd8] sm:$0xff] %vm6425_vm6, %v5195_v13  ;;  %1349 = vperm.xlu1 %2792, %v5195_v13  }
 0x201   :  { %v2054_v38 = vpop.xlane.xlu0 %2053  ;;  %6426 = vst [vmem:[#allocation93_spill] sm:$0xff] %v5210_v43  ;;  %1913 = vst.msk [vmem:[#allocation2 + $0xe0] sm:$0xff] %vm6428_vm8, %v5210_v43  ;;  %1354 = vperm.xlu0 %2791, %v5210_v43  }
 0x202   :  { %v2122_v9 = vadd.f32 %v2054_v38, %v1930_v45  ;;  %v2057_v0 = vpop.xlane.xlu1 %2056  ;;  %v5223_v45 = vld [vmem:[#allocation2 + $0x70] sm:$0xff]  ;;  %v5225_v38 = vld [vmem:[#allocation2 + $0xe8] sm:$0xff]  ;;  %vm6508_vm6 = vmmov %vm6370_vm0 }
 0x203   :  { %v2123_v53 = vadd.f32 %v2057_v0, %v1931_v7  ;;  %6431 = vst [vmem:[#allocation96_spill] sm:$0xff] %v5223_v45  ;;  %6432 = vst [vmem:[#allocation97_spill] sm:$0xff] %v5225_v38  ;;  %v5239_v7 = vld [vmem:[#allocation2 + $0xf0] sm:$0xff] }
 0x204   :  { %2154 = vst.msk [vmem:[#allocation4 + $0x68] sm:$0xff] %vm6429_vm13, %v2122_v9  ;;  %6437 = vst [vmem:[#allocation100_spill] sm:$0xff] %v5239_v7 }
 0x205   :  { %v1125_v13 = vpop.xlane.xlu0 %1124  ;;  %2155 = vst.msk [vmem:[#allocation4 + $0x70] sm:$0xff] %vm6433_vm3, %v2123_v53  ;;  %v5254_v53 = vld [vmem:[#allocation2 + $0x78] sm:$0xff]  ;;  %vm6512_vm8 = vmmov %vm6370_vm0 }
 0x206   :  { %v5221_v50 = vmax.f32 %v5212_v19, %v1125_v13  ;;  %v1128_v9 = vpop.xlane.xlu1 %1127  ;;  %6441 = vst [vmem:[#allocation102_spill] sm:$0xff] %v5254_v53  ;;  %vm6522_vm13 = vmmov %vm6370_vm0 }
 0x207   :  { %v5234_v0 = vmax.f32 %v5223_v45, %v1128_v9  ;;  %v6449_v45 = vld [vmem:[#allocation28_spill] sm:$0xff]  ;;  %vm6526_vm3 = vmmov %vm6370_vm0 }
 0x208   :  { %6430 = vst [vmem:[#allocation95_spill] sm:$0xff] %v5221_v50  ;;  %1898 = vst.msk [vmem:[#allocation2 + $0x68] sm:$0xff] %vm6434_vm11, %v5221_v50  ;;  %1279 = vperm.xlu1 %2792, %v5221_v50  }
 0x209   :  { %v1173_v43 = vpop.xlane.xlu0 %1172  ;;  %6435 = vst [vmem:[#allocation98_spill] sm:$0xff] %v5234_v0  ;;  %1899 = vst.msk [vmem:[#allocation2 + $0x70] sm:$0xff] %vm6438_vm14, %v5234_v0  ;;  %1284 = vperm.xlu0 %2791, %v5234_v0  }
 0x20a   :  { %v5237_v13 = vmax.f32 %v5225_v38, %v1173_v43  ;;  %v1176_v43 = vpop.xlane.xlu1 %1175  ;;  %v5265_v38 = vld [vmem:[#allocation2 + $0xf8] sm:$0xff]  ;;  %vm6530_vm11 = vmmov %vm6370_vm0 }
 0x20b   :  { %v5252_v50 = vmax.f32 %v5239_v7, %v1176_v43  ;;  %6444 = vst [vmem:[#allocation104_spill] sm:$0xff] %v5265_v38  ;;  %vm6537_vm14 = vmmov %vm6370_vm0 }
 0x20c   :  { %6436 = vst [vmem:[#allocation99_spill] sm:$0xff] %v5237_v13  ;;  %1914 = vst.msk [vmem:[#allocation2 + $0xe8] sm:$0xff] %vm6439_vm10, %v5237_v13  ;;  %1359 = vperm.xlu1 %2792, %v5237_v13  }
 0x20d   :  { %v2060_v9 = vpop.xlane.xlu0 %2059  ;;  %6440 = vst [vmem:[#allocation101_spill] sm:$0xff] %v5252_v50  ;;  %1915 = vst.msk [vmem:[#allocation2 + $0xf0] sm:$0xff] %vm6442_vm15, %v5252_v50  ;;  %1364 = vperm.xlu0 %2791, %v5252_v50   ;;  %v6450_v50 = vld [vmem:[#allocation27_spill] sm:$0xff] }
 0x20e   :  { %v2124_v19 = vadd.f32 %v2060_v9, %v1932_v58  ;;  %vm6544_vm10 = vmmov %vm6370_vm0 }
 0x20f   :  { %vm6548_vm15 = vmmov %vm6370_vm0 }
 0x210   :  { %2156 = vst.msk [vmem:[#allocation4 + $0x78] sm:$0xff] %vm6370_vm0, %v2124_v19 }
 0x211   :  { %v1131_v4 = vpop.xlane.xlu0 %1130 }
 0x212   :  { %v5263_v13 = vmax.f32 %v5254_v53, %v1131_v4  ;;  %v6448_v4 = vld [vmem:[#allocation37_spill] sm:$0xff]  ;;  %v1215_v58 = vpop.permute.xlu1 %1214 }
 0x213   :  { %v1372_v53 = vsub.f32 %v6449_v45, %v1215_v58  ;;  %v1373_v7 = vsub.f32 %v6450_v50, %v1215_v58  ;;  %v6455_v45 = vld [vmem:[#allocation34_spill] sm:$0xff]  ;;  %v6457_v58 = vld [vmem:[#allocation31_spill] sm:$0xff] }
 0x214   :  { %6443 = vst [vmem:[#allocation103_spill] sm:$0xff] %v5263_v13  ;;  %1900 = vst.msk [vmem:[#allocation2 + $0x78] sm:$0xff] %vm6445_vm5, %v5263_v13  ;;  %1289 = vperm.xlu1 %2792, %v5263_v13  }
 0x215   :  { %v1179_v43 = vpop.xlane.xlu0 %1178  ;;  %v1436_v13 = vmul.f32 1.442695, %v1372_v53  ;;  %v1438_v0 = vmul.f32 1.442695, %v1373_v7  ;;  %v6456_v53 = vld [vmem:[#allocation32_spill] sm:$0xff]  ;;  %vm6555_vm5 = vmmov %vm6497_vm1 }
 0x216   :  { %v5273_v9 = vmax.f32 %v5265_v38, %v1179_v43  ;;  %v6452_v43 = vld [vmem:[#allocation51_spill] sm:$0xff]  ;;  %v6453_v38 = vld [vmem:[#allocation29_spill] sm:$0xff] }
 0x217   :  { %2793 = vpow2.f32 %v1436_v13  ;;  %v6458_v13 = vld [vmem:[#allocation33_spill] sm:$0xff] }
 0x218   :  { %6446 = vst [vmem:[#allocation105_spill] sm:$0xff] %v5273_v9  ;;  %1916 = vst.msk [vmem:[#allocation2 + $0xf8] sm:$0xff] %vm6447_vm12, %v5273_v9  ;;  %1369 = vperm.xlu1 %2792, %v5273_v9   ;;  %2795 = vpow2.f32 %v1438_v0  ;;  %v6459_v0 = vld [vmem:[#allocation35_spill] sm:$0xff] }
 0x219   :  { %vm6562_vm12 = vmmov %vm6497_vm1 }
 0x21d   :  { %v1295_v19 = vpop.permute.xlu0 %1294 }
 0x21e   :  { %v1404_v35 = vsub.f32 %v6453_v38, %v1295_v19  ;;  %v1405_v9 = vsub.f32 %v6454_v20, %v1295_v19 }
 0x220   :  { %v1500_v17 = vmul.f32 1.442695, %v1404_v35  ;;  %v1300_v24 = vpop.permute.xlu1 %1299 }
 0x221   :  { %v1220_v29 = vpop.permute.xlu0 %1219 }
 0x222   :  { %2797 = vpow2.f32 %v1500_v17  ;;  %v1374_v50 = vsub.f32 %v6455_v45, %v1220_v29  ;;  %v1375_v7 = vsub.f32 %v6456_v53, %v1220_v29  ;;  %v6461_v17 = vld [vmem:[#allocation36_spill] sm:$0xff] }
 0x223   :  { %v6462_v45 = vld [vmem:[#allocation40_spill] sm:$0xff] }
 0x224   :  { %v1440_v54 = vmul.f32 1.442695, %v1374_v50  ;;  %v1442_v38 = vmul.f32 1.442695, %v1375_v7  ;;  %v1225_v35 = vpop.permute.xlu1 %1224  ;;  %v2794_v29 = vpop.eup %2793  ;;  %v6463_v7 = vld [vmem:[#allocation39_spill] sm:$0xff] }
 0x225   :  { %v1377_v44 = vsub.f32 %v6461_v17, %v1225_v35  ;;  %v2796_v53 = vpop.eup %2795 }
 0x226   :  { %v1724_v50 = vadd.f32 %v2796_v53, %v2794_v29 }
 0x22c   :  { %2071 = vadd.xlane.f32.xlu0 %v6448_v4  ;;  %v1502_v4 = vmul.f32 1.442695, %v1405_v9  ;;  %v6460_v9 = vld [vmem:[#allocation38_spill] sm:$0xff] }
 0x22d   :  { %v1376_v19 = vsub.f32 %v6460_v9, %v1225_v35 }
 0x22e   :  { %2799 = vpow2.f32 %v1502_v4  ;;  %v1446_v4 = vmul.f32 1.442695, %v1377_v44 }
 0x22f   :  { %2801 = vpow2.f32 %v1440_v54  ;;  %v1230_v9 = vpop.permute.xlu1 %1229 }
 0x230   :  { %2077 = vadd.xlane.f32.xlu0 %v6451_v56  ;;  %v1406_v56 = vsub.f32 %v6457_v58, %v1300_v24  ;;  %2803 = vpow2.f32 %v1442_v38  ;;  %v1444_v58 = vmul.f32 1.442695, %v1376_v19  ;;  %v6466_v38 = vld [vmem:[#allocation44_spill] sm:$0xff]  ;;  %v6467_v19 = vld [vmem:[#allocation43_spill] sm:$0xff] }
 0x231   :  { %v1379_v44 = vsub.f32 %v6467_v19, %v1230_v9 }
 0x232   :  { %v1504_v14 = vmul.f32 1.442695, %v1406_v56 }
 0x233   :  { %v1450_v29 = vmul.f32 1.442695, %v1379_v44 }
 0x234   :  { %2083 = vadd.xlane.f32.xlu0 %v6452_v43  ;;  %v1407_v43 = vsub.f32 %v6459_v0, %v1300_v24  ;;  %2805 = vpow2.f32 %v1504_v14  ;;  %v1305_v24 = vpop.permute.xlu0 %1304  ;;  %v6465_v0 = vld [vmem:[#allocation46_spill] sm:$0xff]  ;;  %v1378_v14 = vsub.f32 %v6466_v38, %v1230_v9 }
 0x235   :  { %v1408_v56 = vsub.f32 %v6463_v7, %v1305_v24  ;;  %v6468_v7 = vld [vmem:[#allocation47_spill] sm:$0xff] }
 0x236   :  { %v1506_v20 = vmul.f32 1.442695, %v1407_v43 }
 0x237   :  { %v1508_v43 = vmul.f32 1.442695, %v1408_v56 }
 0x238   :  { %2807 = vpow2.f32 %v1506_v20  ;;  %1725 = vadd.xlane.f32.xlu0 %v1724_v50  ;;  %v2798_v20 = vpop.eup %2797  ;;  %v1235_v53 = vpop.permute.xlu0 %1234  ;;  %v6469_v50 = vld [vmem:[#allocation45_spill] sm:$0xff] }
 0x239   :  { %2809 = vpow2.f32 %v1444_v58  ;;  %v1310_v58 = vpop.permute.xlu1 %1309  ;;  %v1381_v56 = vsub.f32 %v6469_v50, %v1235_v53 }
 0x23a   :  { %2811 = vpow2.f32 %v1446_v4  ;;  %v1380_v4 = vsub.f32 %v6468_v7, %v1235_v53  ;;  %v6473_v53 = vld [vmem:[#allocation52_spill] sm:$0xff] }
 0x23b   :  { %2813 = vpow2.f32 %v1508_v43  ;;  %v2800_v17 = vpop.eup %2799  ;;  %v6471_v43 = vld [vmem:[#allocation49_spill] sm:$0xff]  ;;  %v1454_v19 = vmul.f32 1.442695, %v1381_v56 }
 0x23c   :  { %2068 = vadd.xlane.f32.xlu1 %v6458_v13  ;;  %v6464_v13 = vld [vmem:[#allocation41_spill] sm:$0xff]  ;;  %v1411_v38 = vsub.f32 %v6471_v43, %v1310_v58  ;;  %v1315_v26 = vpop.permute.xlu0 %1314 }
 0x23d   :  { %v1409_v54 = vsub.f32 %v6464_v13, %v1305_v24  ;;  %v1772_v24 = vadd.f32 %v2800_v17, %v2798_v20  ;;  %v6470_v13 = vld [vmem:[#allocation48_spill] sm:$0xff]  ;;  %v1413_v50 = vsub.f32 %v6473_v53, %v1315_v26 }
 0x23e   :  { %v1514_v2 = vmul.f32 1.442695, %v1411_v38  ;;  %v1240_v56 = vpop.permute.xlu1 %1239  ;;  %v6475_v38 = vld [vmem:[#allocation55_spill] sm:$0xff] }
 0x23f   :  { %v1510_v35 = vmul.f32 1.442695, %v1409_v54  ;;  %v1410_v54 = vsub.f32 %v6470_v13, %v1310_v58 }
 0x240   :  { %2074 = vadd.xlane.f32.xlu1 %v6462_v45  ;;  %v1448_v45 = vmul.f32 1.442695, %v1378_v14 }
 0x241   :  { %2815 = vpow2.f32 %v1510_v35  ;;  %v1452_v35 = vmul.f32 1.442695, %v1380_v4  ;;  %v1512_v14 = vmul.f32 1.442695, %v1410_v54  ;;  %v1518_v4 = vmul.f32 1.442695, %v1413_v50 }
 0x242   :  { %2817 = vpow2.f32 %v1448_v45  ;;  %v6472_v45 = vld [vmem:[#allocation50_spill] sm:$0xff] }
 0x243   :  { %2819 = vpow2.f32 %v1450_v29  ;;  %v1412_v7 = vsub.f32 %v6472_v45, %v1315_v26  ;;  %v6478_v50 = vld [vmem:[#allocation54_spill] sm:$0xff] }
 0x244   :  { %2080 = vadd.xlane.f32.xlu1 %v6465_v0  ;;  %v2802_v0 = vpop.eup %2801  ;;  %2821 = vpow2.f32 %v1452_v35 }
 0x245   :  { %v2804_v9 = vpop.eup %2803  ;;  %2823 = vpow2.f32 %v1454_v19 }
 0x246   :  { %v2806_v44 = vpop.eup %2805  ;;  %v1727_v20 = vadd.f32 %v2804_v9, %v2802_v0  ;;  %2825 = vpow2.f32 %v1512_v14  ;;  %v6474_v0 = vld [vmem:[#allocation56_spill] sm:$0xff]  ;;  %v1383_v9 = vsub.f32 %v6475_v38, %v1240_v56 }
 0x247   :  { %v2808_v17 = vpop.eup %2807  ;;  %2827 = vpow2.f32 %v1514_v2  ;;  %v1382_v43 = vsub.f32 %v6474_v0, %v1240_v56 }
 0x248   :  { %1773 = vadd.xlane.f32.xlu1 %v1772_v24  ;;  %v2810_v13 = vpop.eup %2809  ;;  %v1775_v29 = vadd.f32 %v2808_v17, %v2806_v44  ;;  %v1516_v24 = vmul.f32 1.442695, %v1412_v7  ;;  %v1458_v19 = vmul.f32 1.442695, %v1383_v9  ;;  %v1245_v44 = vpop.permute.xlu0 %1244  ;;  %v6476_v17 = vld [vmem:[#allocation59_spill] sm:$0xff]  ;;  %v6477_v7 = vld [vmem:[#allocation57_spill] sm:$0xff] }
 0x249   :  { %v2812_v58 = vpop.eup %2811  ;;  %v1456_v45 = vmul.f32 1.442695, %v1382_v43  ;;  %v1384_v2 = vsub.f32 %v6476_v17, %v1245_v44  ;;  %v1385_v53 = vsub.f32 %v6477_v7, %v1245_v44 }
 0x24a   :  { %1776 = vadd.xlane.f32.xlu0 %v1775_v29  ;;  %v1730_v54 = vadd.f32 %v2812_v58, %v2810_v13  ;;  %2829 = vpow2.f32 %v1516_v24  ;;  %v2814_v35 = vpop.eup %2813  ;;  %v6479_v58 = vld [vmem:[#allocation61_spill] sm:$0xff] }
 0x24b   :  { %2831 = vpow2.f32 %v1518_v4  ;;  %v1460_v56 = vmul.f32 1.442695, %v1384_v2  ;;  %v1462_v0 = vmul.f32 1.442695, %v1385_v53 }
 0x24c   :  { %1728 = vadd.xlane.f32.xlu1 %v1727_v20  ;;  %v1320_v20 = vpop.permute.xlu1 %1319  ;;  %2833 = vpow2.f32 %v1456_v45  ;;  %v1325_v38 = vpop.permute.xlu0 %1324  ;;  %v6481_v45 = vld [vmem:[#allocation65_spill] sm:$0xff] }
 0x24d   :  { %v1414_v13 = vsub.f32 %v6478_v50, %v1320_v20  ;;  %2835 = vpow2.f32 %v1458_v19  ;;  %v1415_v24 = vsub.f32 %v6479_v58, %v1320_v20  ;;  %v1417_v17 = vsub.f32 %v6481_v45, %v1325_v38  ;;  %v6483_v58 = vld [vmem:[#allocation63_spill] sm:$0xff] }
 0x24e   :  { %v2816_v26 = vpop.eup %2815  ;;  %1731 = vadd.xlane.f32.xlu0 %v1730_v54  ;;  %2837 = vpow2.f32 %v1460_v56 }
 0x24f   :  { %v1778_v14 = vadd.f32 %v2816_v26, %v2814_v35  ;;  %v2818_v29 = vpop.eup %2817  ;;  %v1520_v43 = vmul.f32 1.442695, %v1414_v13  ;;  %v1522_v54 = vmul.f32 1.442695, %v1415_v24  ;;  %v6480_v35 = vld [vmem:[#allocation60_spill] sm:$0xff]  ;;  %2839 = vpow2.f32 %v1462_v0  ;;  %v6482_v13 = vld [vmem:[#allocation5_spill] sm:$0xff] }
 0x250   :  { %v2820_v4 = vpop.eup %2819  ;;  %v1416_v26 = vsub.f32 %v6480_v35, %v1325_v38  ;;  %v1526_v20 = vmul.f32 1.442695, %v1417_v17  ;;  %v1250_v2 = vpop.permute.xlu1 %1249  ;;  %v6485_v17 = vld [vmem:[#allocation67_spill] sm:$0xff] }
 0x251   :  { %1779 = vadd.xlane.f32.xlu1 %v1778_v14  ;;  %v1733_v9 = vadd.f32 %v2820_v4, %v2818_v29  ;;  %v2822_v44 = vpop.eup %2821  ;;  %2841 = vpow2.f32 %v1520_v43  ;;  %v1386_v29 = vsub.f32 %v6482_v13, %v1250_v2  ;;  %v1387_v24 = vsub.f32 %v6483_v58, %v1250_v2  ;;  %v6487_v2 = vld [vmem:[#allocation26_spill] sm:$0xff] }
 0x252   :  { %v2824_v7 = vpop.eup %2823  ;;  %v1524_v19 = vmul.f32 1.442695, %v1416_v26  ;;  %2843 = vpow2.f32 %v1522_v54  ;;  %v6484_v54 = vld [vmem:[#allocation9_spill] sm:$0xff] }
 0x253   :  { %1734 = vadd.xlane.f32.xlu0 %v1733_v9  ;;  %v2826_v14 = vpop.eup %2825  ;;  %v1736_v53 = vadd.f32 %v2824_v7, %v2822_v44  ;;  %v1464_v38 = vmul.f32 1.442695, %v1386_v29  ;;  %v1466_v9 = vmul.f32 1.442695, %v1387_v24  ;;  %v1255_v43 = vpop.permute.xlu0 %1254  ;;  %v6486_v7 = vld [vmem:[#allocation62_spill] sm:$0xff] }
 0x254   :  { %v2828_v50 = vpop.eup %2827  ;;  %2845 = vpow2.f32 %v1524_v19  ;;  %v1330_v35 = vpop.permute.xlu1 %1329  ;;  %v1388_v45 = vsub.f32 %v6484_v54, %v1255_v43  ;;  %v1389_v44 = vsub.f32 %v6485_v17, %v1255_v43 }
 0x255   :  { %2847 = vpow2.f32 %v1526_v20  ;;  %1737 = vadd.xlane.f32.xlu1 %v1736_v53  ;;  %v1781_v56 = vadd.f32 %v2828_v50, %v2826_v14  ;;  %v1418_v19 = vsub.f32 %v6486_v7, %v1330_v35  ;;  %v1419_v20 = vsub.f32 %v6487_v2, %v1330_v35 }
 0x256   :  { %2849 = vpow2.f32 %v1464_v38  ;;  %v1468_v53 = vmul.f32 1.442695, %v1388_v45  ;;  %v1470_v50 = vmul.f32 1.442695, %v1389_v44  ;;  %v6489_v38 = vld [vmem:[#allocation68_spill] sm:$0xff] }
 0x257   :  { %v2830_v4 = vpop.eup %2829  ;;  %1782 = vadd.xlane.f32.xlu0 %v1781_v56  ;;  %2851 = vpow2.f32 %v1466_v9  ;;  %v1528_v29 = vmul.f32 1.442695, %v1418_v19  ;;  %v1530_v58 = vmul.f32 1.442695, %v1419_v20  ;;  %v1335_v24 = vpop.permute.xlu0 %1334 }
 0x258   :  { %v2832_v0 = vpop.eup %2831  ;;  %2853 = vpow2.f32 %v1468_v53  ;;  %v1421_v54 = vsub.f32 %v6489_v38, %v1335_v24 }
 0x259   :  { %v1784_v26 = vadd.f32 %v2832_v0, %v2830_v4  ;;  %v2834_v13 = vpop.eup %2833  ;;  %v6488_v4 = vld [vmem:[#allocation66_spill] sm:$0xff]  ;;  %2855 = vpow2.f32 %v1470_v50 }
 0x25a   :  { %v2836_v14 = vpop.eup %2835  ;;  %v1420_v0 = vsub.f32 %v6488_v4, %v1335_v24  ;;  %2857 = vpow2.f32 %v1528_v29  ;;  %v1534_v35 = vmul.f32 1.442695, %v1421_v54 }
 0x25b   :  { %1785 = vadd.xlane.f32.xlu1 %v1784_v26  ;;  %v1739_v56 = vadd.f32 %v2836_v14, %v2834_v13  ;;  %v2838_v43 = vpop.eup %2837  ;;  %2859 = vpow2.f32 %v1530_v58 }
 0x25c   :  { %v2840_v17 = vpop.eup %2839  ;;  %v1532_v9 = vmul.f32 1.442695, %v1420_v0 }
 0x25d   :  { %1740 = vadd.xlane.f32.xlu0 %v1739_v56  ;;  %v1742_v44 = vadd.f32 %v2840_v17, %v2838_v43 }
 0x25e   :  { %v2842_v26 = vpop.eup %2841  ;;  %v1260_v45 = vpop.permute.xlu1 %1259  ;;  %2861 = vpow2.f32 %v1532_v9 }
 0x25f   :  { %v2844_v7 = vpop.eup %2843  ;;  %v1390_v19 = vsub.f32 %v4696_v10, %v1260_v45  ;;  %v1391_v13 = vsub.f32 %v4542_v57, %v1260_v45  ;;  %2863 = vpow2.f32 %v1534_v35  ;;  %1743 = vadd.xlane.f32.xlu1 %v1742_v44 }
 0x260   :  { %v1787_v20 = vadd.f32 %v2844_v7, %v2842_v26 }
 0x261   :  { %v2846_v2 = vpop.eup %2845  ;;  %v1472_v53 = vmul.f32 1.442695, %v1390_v19  ;;  %v1474_v50 = vmul.f32 1.442695, %v1391_v13  ;;  %v1265_v29 = vpop.permute.xlu0 %1264 }
 0x262   :  { %v2848_v14 = vpop.eup %2847  ;;  %1788 = vadd.xlane.f32.xlu0 %v1787_v20  ;;  %v1340_v24 = vpop.permute.xlu1 %1339  ;;  %v1392_v58 = vsub.f32 %v4722_v22, %v1265_v29  ;;  %v1393_v4 = vsub.f32 %v4607_v63, %v1265_v29 }
 0x263   :  { %v1790_v56 = vadd.f32 %v2848_v14, %v2846_v2  ;;  %2865 = vpow2.f32 %v1472_v53  ;;  %v1422_v10 = vsub.f32 %v4513_v31, %v1340_v24  ;;  %v2850_v0 = vpop.eup %2849  ;;  %v1423_v57 = vsub.f32 %v4728_v42, %v1340_v24 }
 0x264   :  { %2867 = vpow2.f32 %v1474_v50  ;;  %v2852_v38 = vpop.eup %2851  ;;  %v1476_v54 = vmul.f32 1.442695, %v1392_v58  ;;  %v1478_v43 = vmul.f32 1.442695, %v1393_v4 }
 0x265   :  { %1791 = vadd.xlane.f32.xlu1 %v1790_v56  ;;  %v1536_v17 = vmul.f32 1.442695, %v1422_v10  ;;  %v1538_v9 = vmul.f32 1.442695, %v1423_v57  ;;  %v1345_v35 = vpop.permute.xlu0 %1344  ;;  %v1745_v26 = vadd.f32 %v2852_v38, %v2850_v0  ;;  %v2854_v63 = vpop.eup %2853 }
 0x266   :  { %2869 = vpow2.f32 %v1476_v54  ;;  %v1424_v45 = vsub.f32 %v4757_v15, %v1345_v35  ;;  %v1425_v22 = vsub.f32 %v4766_v47, %v1345_v35  ;;  %v2856_v31 = vpop.eup %2855 }
 0x267   :  { %2871 = vpow2.f32 %v1478_v43  ;;  %1746 = vadd.xlane.f32.xlu0 %v1745_v26  ;;  %v2858_v7 = vpop.eup %2857  ;;  %v1748_v13 = vadd.f32 %v2856_v31, %v2854_v63 }
 0x268   :  { %2873 = vpow2.f32 %v1536_v17  ;;  %v1540_v44 = vmul.f32 1.442695, %v1424_v45  ;;  %v1542_v42 = vmul.f32 1.442695, %v1425_v22  ;;  %v2860_v2 = vpop.eup %2859 }
 0x269   :  { %2875 = vpow2.f32 %v1538_v9  ;;  %1749 = vadd.xlane.f32.xlu1 %v1748_v13  ;;  %v1793_v47 = vadd.f32 %v2860_v2, %v2858_v7 }
 0x26a   :  { %v1270_v19 = vpop.permute.xlu1 %1269  ;;  %2877 = vpow2.f32 %v1540_v44 }
 0x26b   :  { %v1394_v20 = vsub.f32 %v4748_v8, %v1270_v19  ;;  %v1395_v14 = vsub.f32 %v4813_v52, %v1270_v19  ;;  %v2862_v15 = vpop.eup %2861  ;;  %2879 = vpow2.f32 %v1542_v42  ;;  %1794 = vadd.xlane.f32.xlu0 %v1793_v47 }
 0x26c   :  { %v2864_v53 = vpop.eup %2863 }
 0x26d   :  { %v1480_v50 = vmul.f32 1.442695, %v1394_v20  ;;  %v1482_v29 = vmul.f32 1.442695, %v1395_v14  ;;  %v1275_v24 = vpop.permute.xlu0 %1274  ;;  %v1796_v58 = vadd.f32 %v2864_v53, %v2862_v15 }
 0x26e   :  { %v1396_v4 = vsub.f32 %v4753_v41, %v1275_v24  ;;  %v1397_v10 = vsub.f32 %v4851_v49, %v1275_v24 }
 0x26f   :  { %2881 = vpow2.f32 %v1480_v50  ;;  %1797 = vadd.xlane.f32.xlu1 %v1796_v58 }
 0x270   :  { %v2866_v0 = vpop.eup %2865  ;;  %2883 = vpow2.f32 %v1482_v29  ;;  %v1484_v38 = vmul.f32 1.442695, %v1396_v4  ;;  %v1486_v54 = vmul.f32 1.442695, %v1397_v10 }
 0x271   :  { %v2868_v57 = vpop.eup %2867 }
 0x272   :  { %v1751_v35 = vadd.f32 %v2868_v57, %v2866_v0  ;;  %2885 = vpow2.f32 %v1484_v38 }
 0x273   :  { %v2870_v49 = vpop.eup %2869  ;;  %2887 = vpow2.f32 %v1486_v54 }
 0x274   :  { %1752 = vadd.xlane.f32.xlu0 %v1751_v35 }
 0x27b   :  { %v1350_v56 = vpop.permute.xlu1 %1349 }
 0x27c   :  { %v1426_v8 = vsub.f32 %v4857_v12, %v1350_v56  ;;  %v1427_v52 = vsub.f32 %v4864_v23, %v1350_v56  ;;  %v1355_v9 = vpop.permute.xlu0 %1354  ;;  %v2872_v12 = vpop.eup %2871 }
 0x27d   :  { %v1428_v26 = vsub.f32 %v4868_v46, %v1355_v9  ;;  %v1429_v41 = vsub.f32 %v4876_v16, %v1355_v9  ;;  %v2874_v22 = vpop.eup %2873  ;;  %v1754_v31 = vadd.f32 %v2872_v12, %v2870_v49 }
 0x27e   :  { %v1544_v43 = vmul.f32 1.442695, %v1426_v8  ;;  %v1546_v17 = vmul.f32 1.442695, %v1427_v52  ;;  %v2876_v44 = vpop.eup %2875 }
 0x27f   :  { %v1548_v45 = vmul.f32 1.442695, %v1428_v26  ;;  %v1550_v23 = vmul.f32 1.442695, %v1429_v41  ;;  %v2878_v46 = vpop.eup %2877  ;;  %1755 = vadd.xlane.f32.xlu1 %v1754_v31  ;;  %v1799_v16 = vadd.f32 %v2876_v44, %v2874_v22 }
 0x280   :  { %2889 = vpow2.f32 %v1544_v43  ;;  %v2880_v19 = vpop.eup %2879 }
 0x281   :  { %2891 = vpow2.f32 %v1546_v17  ;;  %1800 = vadd.xlane.f32.xlu0 %v1799_v16  ;;  %v1802_v15 = vadd.f32 %v2880_v19, %v2878_v46  ;;  %v2882_v50 = vpop.eup %2881 }
 0x282   :  { %2893 = vpow2.f32 %v1548_v45  ;;  %v2884_v29 = vpop.eup %2883 }
 0x283   :  { %v1280_v63 = vpop.permute.xlu1 %1279  ;;  %2895 = vpow2.f32 %v1550_v23  ;;  %1803 = vadd.xlane.f32.xlu1 %v1802_v15  ;;  %v1757_v8 = vadd.f32 %v2884_v29, %v2882_v50  ;;  %v6491_v50 = vld [vmem:[#allocation64_spill] sm:$0xff]  ;;  %v6493_v29 = vld [vmem:[#allocation58_spill] sm:$0xff] }
 0x284   :  { %v1398_v42 = vsub.f32 %v4791_v62, %v1280_v63  ;;  %v1399_v7 = vsub.f32 %v4884_v1, %v1280_v63  ;;  %v1285_v20 = vpop.permute.xlu0 %1284 }
 0x285   :  { %v1400_v47 = vsub.f32 %v4798_v51, %v1285_v20  ;;  %v1401_v53 = vsub.f32 %v4890_v11, %v1285_v20  ;;  %v2886_v11 = vpop.eup %2885  ;;  %1758 = vadd.xlane.f32.xlu0 %v1757_v8 }
 0x286   :  { %v1488_v13 = vmul.f32 1.442695, %v1398_v42  ;;  %v1490_v2 = vmul.f32 1.442695, %v1399_v7 }
 0x287   :  { %v1360_v14 = vpop.permute.xlu1 %1359  ;;  %v1492_v24 = vmul.f32 1.442695, %v1400_v47  ;;  %v1494_v56 = vmul.f32 1.442695, %v1401_v53  ;;  %v6490_v47 = vld [vmem:[#allocation53_spill] sm:$0xff] }
 0x288   :  { %2897 = vpow2.f32 %v1488_v13  ;;  %v1430_v62 = vsub.f32 %v4897_v27, %v1360_v14  ;;  %v1431_v1 = vsub.f32 %v4904_v61, %v1360_v14  ;;  %v1365_v10 = vpop.permute.xlu0 %1364  ;;  %v2888_v27 = vpop.eup %2887 }
 0x289   :  { %2899 = vpow2.f32 %v1490_v2  ;;  %v1432_v0 = vsub.f32 %v4908_v40, %v1365_v10  ;;  %v1433_v51 = vsub.f32 %v4916_v34, %v1365_v10  ;;  %v1760_v54 = vadd.f32 %v2888_v27, %v2886_v11 }
 0x28a   :  { %v1552_v58 = vmul.f32 1.442695, %v1430_v62  ;;  %v1554_v4 = vmul.f32 1.442695, %v1431_v1  ;;  %2901 = vpow2.f32 %v1492_v24  ;;  %v6492_v1 = vld [vmem:[#allocation24_spill] sm:$0xff]  ;;  %v6494_v24 = vld [vmem:[#allocation25_spill] sm:$0xff]  ;;  %v6496_v10 = vsub.f32 %v4942_v18, %v4945_v21 }
 0x28b   :  { %2903 = vpow2.f32 %v1494_v56  ;;  %v1556_v52 = vmul.f32 1.442695, %v1432_v0  ;;  %v1558_v61 = vmul.f32 1.442695, %v1433_v51  ;;  %1761 = vadd.xlane.f32.xlu1 %v1760_v54  ;;  %v6495_v56 = vld [vmem:[#allocation23_spill] sm:$0xff]  ;;  %v1938_v51 = vld [vmem:[#allocation4 + $0xa8] sm:$0xff] }
 0x28c   :  { %2905 = vpow2.f32 %v1552_v58  ;;  %v1936_v58 = vld [vmem:[#allocation4 + $0x98] sm:$0xff]  ;;  %v1628_v8 = vmul.f32 1.442695, %v6496_v10  ;;  %v1935_v18 = vld [vmem:[#allocation4 + $0x90] sm:$0xff] }
 0x28d   :  { %v2890_v57 = vpop.eup %2889  ;;  %2907 = vpow2.f32 %v1554_v4 }
 0x28e   :  { %v2892_v43 = vpop.eup %2891  ;;  %2909 = vpow2.f32 %v1556_v52 }
 0x28f   :  { %v1290_v38 = vpop.permute.xlu1 %1289  ;;  %v2894_v40 = vpop.eup %2893  ;;  %2911 = vpow2.f32 %v1558_v61  ;;  %v1805_v34 = vadd.f32 %v2892_v43, %v2890_v57  ;;  %v6499_v61 = vsub.f32 %v4953_v55, %v4958_v36  ;;  %v5373_v43 = vld [vmem:[%s6002_s3] sm:$0xff]  ;;  %v6502_v36 = vsub.f32 %v4962_v33, %v4974_v25  ;;  %v5394_v33 = vld [vmem:[%s6002_s3 + $0x88] sm:$0xff] }
 0x290   :  { %v1402_v17 = vsub.f32 %v4809_v60, %v1290_v38  ;;  %v1403_v9 = vsub.f32 %v4924_v48, %v1290_v38  ;;  %v2896_v35 = vpop.eup %2895  ;;  %v5378_v55 = vld [vmem:[%s6002_s3 + $0x80] sm:$0xff]  ;;  %v6504_v25 = vsub.f32 %v4976_v32, %v4989_v6  ;;  %v5412_v32 = vld [vmem:[%s6002_s3 + $0x18] sm:$0xff]  ;;  %vm2528_vm0 = vcmp.gt.f32.partialorder %v5373_v43, 0.0 }
 0x291   :  { %1806 = vadd.xlane.f32.xlu0 %v1805_v34  ;;  %v1808_v12 = vadd.f32 %v2896_v35, %v2894_v40  ;;  %v1660_v57 = vmul.f32 1.442695, %v6499_v61  ;;  %v1937_v40 = vld [vmem:[#allocation4 + $0xa0] sm:$0xff] }
 0x292   :  { %v1496_v26 = vmul.f32 1.442695, %v1402_v17  ;;  %v1498_v41 = vmul.f32 1.442695, %v1403_v9  ;;  %v1662_v9 = vmul.f32 1.442695, %v6502_v36 }
 0x293   :  { %v1370_v49 = vpop.permute.xlu1 %1369  ;;  %1809 = vadd.xlane.f32.xlu1 %v1808_v12  ;;  %v1632_v12 = vmul.f32 1.442695, %v6504_v25 }
 0x294   :  { %2913 = vpow2.f32 %v1496_v26  ;;  %v1434_v45 = vsub.f32 %v4931_v39, %v1370_v49  ;;  %v1435_v23 = vsub.f32 %v4938_v30, %v1370_v49  ;;  %v2416_v26 = vmax.f32 %v5378_v55, 1.0  ;;  %v1564_v49 = vld [vmem:[#allocation3] sm:$0xff] }
 0x295   :  { %v2898_v22 = vpop.eup %2897  ;;  %2915 = vpow2.f32 %v1498_v41 }
 0x296   :  { %v2900_v60 = vpop.eup %2899  ;;  %v1560_v48 = vmul.f32 1.442695, %v1434_v45  ;;  %v1562_v63 = vmul.f32 1.442695, %v1435_v23  ;;  %v1939_v45 = vld [vmem:[#allocation4 + $0xb0] sm:$0xff] }
 0x297   :  { %v1763_v31 = vadd.f32 %v2900_v60, %v2898_v22  ;;  %v2902_v44 = vpop.eup %2901  ;;  %v5403_v22 = vld [vmem:[%s6002_s3 + $0x10] sm:$0xff]  ;;  %v6506_v60 = vld [vmem:[#allocation8_spill] sm:$0xff] }
 0x298   :  { %2917 = vpow2.f32 %v1560_v48  ;;  %v2904_v42 = vpop.eup %2903  ;;  %v6507_v48 = vsub.f32 %v4991_v28, %v6506_v60  ;;  %v5419_v28 = vld [vmem:[%s6002_s3 + $0x20] sm:$0xff]  ;;  %v6524_v60 = vld [vmem:[#allocation20_spill] sm:$0xff] }
 0x299   :  { %2919 = vpow2.f32 %v1562_v63  ;;  %1764 = vadd.xlane.f32.xlu0 %v1763_v31  ;;  %v2906_v7 = vpop.eup %2905  ;;  %v1766_v46 = vadd.f32 %v2904_v42, %v2902_v44  ;;  %v2417_v44 = vmax.f32 %v5394_v33, 1.0 }
 0x29a   :  { %v2908_v16 = vpop.eup %2907  ;;  %2921 = vpow2.f32 %v1628_v8  ;;  %v1664_v63 = vmul.f32 1.442695, %v6507_v48 }
 0x29b   :  { %v2910_v19 = vpop.eup %2909  ;;  %1767 = vadd.xlane.f32.xlu1 %v1766_v46  ;;  %v1811_v39 = vadd.f32 %v2908_v16, %v2906_v7  ;;  %2923 = vpow2.f32 %v1660_v57  ;;  %v2402_v46 = vmax.f32 %v5403_v22, 1.0 }
 0x29c   :  { %v2912_v13 = vpop.eup %2911 }
 0x29d   :  { %1812 = vadd.xlane.f32.xlu0 %v1811_v39  ;;  %v1814_v30 = vadd.f32 %v2912_v13, %v2910_v19  ;;  %v2403_v19 = vmax.f32 %v5412_v32, 1.0  ;;  %v5425_v39 = vld [vmem:[%s6002_s3 + $0x28] sm:$0xff] }
 0x29e   :  { %v6509_v13 = vld [vmem:[#allocation14_spill] sm:$0xff] }
 0x29f   :  { %1815 = vadd.xlane.f32.xlu1 %v1814_v30  ;;  %v6510_v30 = vld [vmem:[#allocation18_spill] sm:$0xff] }
 0x2a1   :  { %v2914_v2 = vpop.eup %2913 }
 0x2a2   :  { %v2916_v20 = vpop.eup %2915 }
 0x2a3   :  { %v1769_v14 = vadd.f32 %v2916_v20, %v2914_v2  ;;  %2086 = vadd.xlane.f32.xlu1 %v6490_v47  ;;  %v6511_v2 = vsub.f32 %v6509_v13, %v6510_v30  ;;  %v1580_v47 = vld [vmem:[#allocation3 + $0x80] sm:$0xff]  ;;  %v6527_v13 = vld [vmem:[#allocation10_spill] sm:$0xff] }
 0x2a4   :  { %v6528_v30 = vld [vmem:[#allocation21_spill] sm:$0xff] }
 0x2a5   :  { %v2918_v15 = vpop.eup %2917  ;;  %1770 = vadd.xlane.f32.xlu0 %v1769_v14  ;;  %v1634_v20 = vmul.f32 1.442695, %v6511_v2  ;;  %v6529_v2 = vsub.f32 %v6527_v13, %v6528_v30  ;;  %v2176_v30 = vld [vmem:[#allocation2] sm:$0xff] }
 0x2a6   :  { %v2920_v53 = vpop.eup %2919 }
 0x2a7   :  { %v1817_v62 = vadd.f32 %v2920_v53, %v2918_v15  ;;  %2092 = vadd.xlane.f32.xlu1 %v6491_v50  ;;  %v2922_v35 = vpop.eup %2921  ;;  %v2404_v15 = vmax.f32 %v5419_v28, 1.0  ;;  %v2405_v53 = vmax.f32 %v5425_v39, 1.0  ;;  %v6513_v50 = vld [vmem:[#allocation13_spill] sm:$0xff] }
 0x2a8   :  { %v1692_v31 = vmul.f32 %v2922_v35, %v1564_v49  ;;  %v2924_v14 = vpop.eup %2923  ;;  %v2346_v49 = vld [vmem:[%s6002_s3 + $0x50] sm:$0xff] }
 0x2a9   :  { %1818 = vadd.xlane.f32.xlu0 %v1817_v62  ;;  %v5437_v62 = vld [vmem:[%s6002_s3 + $0x30] sm:$0xff] }
 0x2aa   :  { %v2406_v10 = vmax.f32 %v5437_v62, 1.0 }
 0x2ab   :  { %2098 = vadd.xlane.f32.xlu1 %v6492_v1  ;;  %v6514_v1 = vld [vmem:[#allocation11_spill] sm:$0xff] }
 0x2ad   :  { %2089 = vadd.xlane.f32.xlu0 %v6493_v29  ;;  %v6515_v29 = vsub.f32 %v6513_v50, %v6514_v1 }
 0x2af   :  { %2104 = vadd.xlane.f32.xlu1 %v4671_v5  ;;  %v1940_v5 = vld [vmem:[#allocation4 + $0xb8] sm:$0xff] }
 0x2b1   :  { %2095 = vadd.xlane.f32.xlu0 %v6494_v24  ;;  %v1636_v24 = vmul.f32 1.442695, %v6515_v29 }
 0x2b5   :  { %2101 = vadd.xlane.f32.xlu0 %v6495_v56  ;;  %v2072_v4 = vpop.xlane.xlu0 %2071  ;;  %v5445_v56 = vld [vmem:[%s6002_s3 + $0x38] sm:$0xff] }
 0x2b6   :  { %v2128_v0 = vadd.f32 %v2072_v4, %v1936_v58  ;;  %v1708_v58 = vmul.f32 %v2924_v14, %v1580_v47  ;;  %v6531_v47 = vld [vmem:[#allocation12_spill] sm:$0xff] }
 0x2b8   :  { %2160 = vst.msk [vmem:[#allocation4 + $0x98] sm:$0xff] %vm6497_vm1, %v2128_v0  ;;  %v1565_v0 = vld [vmem:[#allocation3 + $0x8] sm:$0xff] }
 0x2b9   :  { %2107 = vadd.xlane.f32.xlu0 %v4714_v37  ;;  %v2078_v11 = vpop.xlane.xlu0 %2077  ;;  %v6501_v37 = vsub.f32 %v4960_v59, %v4971_v3  ;;  %v2400_v59 = vmax.f32 %v5373_v43, 1.0  ;;  %v5388_v3 = vld [vmem:[%s6002_s3 + $0x8] sm:$0xff] }
 0x2ba   :  { %v2130_v27 = vadd.f32 %v2078_v11, %v1938_v51  ;;  %v2401_v23 = vmax.f32 %v5388_v3, 1.0  ;;  %v6516_v51 = vld [vmem:[#allocation19_spill] sm:$0xff]  ;;  %v6517_v11 = vld [vmem:[#allocation16_spill] sm:$0xff] }
 0x2bb   :  { %v1630_v21 = vmul.f32 1.442695, %v6501_v37 }
 0x2bc   :  { %2162 = vst.msk [vmem:[#allocation4 + $0xa8] sm:$0xff] %vm6498_vm9, %v2130_v27  ;;  %v6518_v27 = vsub.f32 %v6516_v51, %v6517_v11  ;;  %v6535_v51 = vld [vmem:[#allocation69_spill] sm:$0xff]  ;;  %vm6566_vm9 = vmmov %vm6497_vm1 }
 0x2bd   :  { %v2084_v52 = vpop.xlane.xlu0 %2083  ;;  %2925 = vpow2.f32 %v1630_v21  ;;  %v1581_v21 = vld [vmem:[#allocation3 + $0x88] sm:$0xff] }
 0x2be   :  { %v2132_v38 = vadd.f32 %v2084_v52, %v1940_v5  ;;  %2927 = vpow2.f32 %v1662_v9  ;;  %v1666_v5 = vmul.f32 1.442695, %v6518_v27  ;;  %v5454_v52 = vld [vmem:[%s6002_s3 + $0x40] sm:$0xff] }
 0x2bf   :  { %2929 = vrcp.f32 %v2400_v59 }
 0x2c0   :  { %2164 = vst.msk [vmem:[#allocation4 + $0xb8] sm:$0xff] %vm6500_vm4, %v2132_v38  ;;  %2931 = vrcp.f32 %v2416_v26  ;;  %v2407_v38 = vmax.f32 %v5445_v56, 1.0  ;;  %vm2544_vm4 = vcmp.gt.f32.partialorder %v5378_v55, 0.0  ;;  %v5591_v55 = vld [vmem:[%s6002_s3 + $0xa8] sm:$0xff] }
 0x2c1   :  { %v1726_v7 = vpop.xlane.xlu0 %1725  ;;  %2933 = vpow2.f32 %v1632_v12 }
 0x2c2   :  { %v1820_v16 = vadd.f32 %v1726_v7, %v1692_v31  ;;  %2935 = vrcp.f32 %v2401_v23  ;;  %v6523_v23 = vld [vmem:[#allocation17_spill] sm:$0xff]  ;;  %v1566_v31 = vld [vmem:[#allocation3 + $0x10] sm:$0xff] }
 0x2c3   :  { %2937 = vpow2.f32 %v1664_v63  ;;  %v6525_v48 = vsub.f32 %v6523_v23, %v6524_v60  ;;  %v6545_v23 = vld [vmem:[#allocation73_spill] sm:$0xff]  ;;  %v6546_v60 = vld [vmem:[#allocation75_spill] sm:$0xff] }
 0x2c4   :  { %1853 = vst.msk [vmem:[#allocation3] sm:$0xff] %vm6512_vm8, %v1820_v16  ;;  %2939 = vrcp.f32 %v2417_v44  ;;  %v1582_v16 = vld [vmem:[#allocation3 + $0x90] sm:$0xff]  ;;  %vm2545_vm8 = vcmp.gt.f32.partialorder %v5394_v33, 0.0  ;;  %v2372_v33 = vld [vmem:[#allocation4 + $0x20] sm:$0xff] }
 0x2c5   :  { %v2069_v54 = vpop.xlane.xlu1 %2068  ;;  %2941 = vrcp.f32 %v2402_v46  ;;  %v1638_v63 = vmul.f32 1.442695, %v6525_v48  ;;  %v2410_v46 = vmax.f32 %v2346_v49, 1.0  ;;  %v5508_v49 = vld [vmem:[%s6002_s3 + $0x90] sm:$0xff]  ;;  %v6547_v48 = vsub.f32 %v6545_v23, %v6546_v60  ;;  %v2385_v23 = vld [vmem:[#allocation4 + $0x88] sm:$0xff] }
 0x2c6   :  { %v2127_v17 = vadd.f32 %v2069_v54, %v1935_v18  ;;  %2943 = vrcp.f32 %v2403_v19  ;;  %v2345_v18 = vld [vmem:[%s6002_s3 + $0x48] sm:$0xff]  ;;  %v2370_v60 = vld [vmem:[#allocation4 + $0x10] sm:$0xff] }
 0x2c7   :  { %2945 = vpow2.f32 %v1634_v20  ;;  %v6519_v54 = vld [vmem:[#allocation6_spill] sm:$0xff]  ;;  %v1640_v20 = vmul.f32 1.442695, %v6529_v2  ;;  %v2418_v2 = vmax.f32 %v5508_v49, 1.0 }
 0x2c8   :  { %2159 = vst.msk [vmem:[#allocation4 + $0x90] sm:$0xff] %vm6503_vm2, %v2127_v17  ;;  %2947 = vrcp.f32 %v2404_v15  ;;  %v6520_v17 = vld [vmem:[#allocation7_spill] sm:$0xff]  ;;  %vm6567_vm2 = vmmov %vm6497_vm1 }
 0x2c9   :  { %v2075_v34 = vpop.xlane.xlu1 %2074  ;;  %2949 = vrcp.f32 %v2405_v53  ;;  %v6521_v36 = vsub.f32 %v6519_v54, %v6520_v17  ;;  %v6532_v53 = vld [vmem:[#allocation15_spill] sm:$0xff] }
 0x2ca   :  { %v2129_v41 = vadd.f32 %v2075_v34, %v1937_v40  ;;  %v2926_v4 = vpop.eup %2925  ;;  %2951 = vpow2.f32 %v1636_v24  ;;  %v2408_v34 = vmax.f32 %v5454_v52, 1.0  ;;  %v6533_v50 = vsub.f32 %v6531_v47, %v6532_v53 }
 0x2cb   :  { %v2928_v57 = vpop.eup %2927  ;;  %v2208_v37 = vld [vmem:[#allocation3] sm:$0xff]  ;;  %v1668_v9 = vmul.f32 1.442695, %v6521_v36  ;;  %v1693_v40 = vmul.f32 %v2926_v4, %v1565_v0  ;;  %v6534_v0 = vld [vmem:[#allocation22_spill] sm:$0xff] }
 0x2cc   :  { %2161 = vst.msk [vmem:[#allocation4 + $0xa0] sm:$0xff] %vm6505_vm7, %v2129_v41  ;;  %2953 = vlog2.f32 %v2208_v37  ;;  %v5464_v59 = vpop.eup %2929  ;;  %v2409_v41 = vmax.f32 %v2345_v18, 1.0  ;;  %v1709_v12 = vmul.f32 %v2928_v57, %v1581_v21  ;;  %v1670_v1 = vmul.f32 1.442695, %v6533_v50  ;;  %v6538_v37 = vld [vmem:[#allocation70_spill] sm:$0xff]  ;;  %v6539_v21 = vld [vmem:[#allocation71_spill] sm:$0xff]  ;;  %vm6571_vm7 = vmmov %vm6497_vm1 }
 0x2cd   :  { %v2081_v6 = vpop.xlane.xlu1 %2080  ;;  %2955 = vrcp.f32 %v2406_v10  ;;  %v5467_v26 = vpop.eup %2931  ;;  %v6536_v11 = vsub.f32 %v6534_v0, %v6535_v51  ;;  %v6540_v54 = vsub.f32 %v6538_v37, %v6539_v21  ;;  %v1584_v51 = vld [vmem:[#allocation3 + $0xa0] sm:$0xff]  ;;  %v6553_v37 = vld [vmem:[#allocation79_spill] sm:$0xff] }
 0x2ce   :  { %v2131_v42 = vadd.f32 %v2081_v6, %v1939_v45  ;;  %2957 = vpow2.f32 %v1666_v5  ;;  %v2934_v45 = vpop.eup %2933 }
 0x2cf   :  { %2959 = vrcp.f32 %v2407_v38  ;;  %v5475_v44 = vpop.eup %2935  ;;  %v1694_v14 = vmul.f32 %v2934_v45, %v1566_v31  ;;  %v1672_v27 = vmul.f32 1.442695, %v6536_v11  ;;  %v1642_v17 = vmul.f32 1.442695, %v6540_v54  ;;  %v2368_v45 = vld [vmem:[#allocation4] sm:$0xff] }
 0x2d0   :  { %2163 = vst.msk [vmem:[#allocation4 + $0xb0] sm:$0xff] %vm6508_vm6, %v2131_v42  ;;  %2961 = vpow2.f32 %v1668_v9  ;;  %v2938_v7 = vpop.eup %2937  ;;  %v2433_v47 = vmul.f32 %v5464_v59, %v2368_v45  ;;  %v2369_v45 = vld [vmem:[#allocation4 + $0x8] sm:$0xff]  ;;  %vm2529_vm6 = vcmp.gt.f32.partialorder %v5388_v3, 0.0 }
 0x2d1   :  { %v1774_v8 = vpop.xlane.xlu1 %1773  ;;  %2963 = vrcp.f32 %v2408_v34  ;;  %v5478_v19 = vpop.eup %2939  ;;  %v1710_v10 = vmul.f32 %v2938_v7, %v1582_v16  ;;  %v6542_v34 = vld [vmem:[#allocation74_spill] sm:$0xff] }
 0x2d2   :  { %v1836_v61 = vadd.f32 %v1774_v8, %v1708_v58  ;;  %2965 = vrcp.f32 %v2409_v41  ;;  %v5484_v15 = vpop.eup %2941 }
 0x2d3   :  { %v1777_v6 = vpop.xlane.xlu0 %1776  ;;  %2967 = vpow2.f32 %v1638_v63  ;;  %v5489_v58 = vpop.eup %2943  ;;  %v1674_v63 = vmul.f32 1.442695, %v6547_v48  ;;  %v6556_v48 = vld [vmem:[#allocation80_spill] sm:$0xff] }
 0x2d4   :  { %1869 = vst.msk [vmem:[#allocation3 + $0x80] sm:$0xff] %vm6522_vm13, %v1836_v61  ;;  %v1837_v42 = vadd.f32 %v1777_v6, %v1709_v12  ;;  %v2946_v8 = vpop.eup %2945  ;;  %v1567_v61 = vld [vmem:[#allocation3 + $0x18] sm:$0xff]  ;;  %vm6575_vm13 = vmmov %vm6497_vm1 }
 0x2d5   :  { %v1729_v35 = vpop.xlane.xlu1 %1728  ;;  %v5494_v57 = vpop.eup %2947 }
 0x2d6   :  { %v1821_v25 = vadd.f32 %v1729_v35, %v1693_v40  ;;  %1870 = vst.msk [vmem:[#allocation3 + $0x88] sm:$0xff] %vm6530_vm11, %v1837_v42  ;;  %v5497_v18 = vpop.eup %2949  ;;  %v6541_v40 = vld [vmem:[#allocation72_spill] sm:$0xff]  ;;  %v1568_v42 = vld [vmem:[#allocation3 + $0x20] sm:$0xff]  ;;  %vm6577_vm11 = vmmov %vm6497_vm1 }
 0x2d7   :  { %v1732_v24 = vpop.xlane.xlu0 %1731  ;;  %v2952_v9 = vpop.eup %2951  ;;  %v6543_v35 = vsub.f32 %v6541_v40, %v6542_v34  ;;  %v2384_v40 = vld [vmem:[#allocation4 + $0x80] sm:$0xff] }
 0x2d8   :  { %1854 = vst.msk [vmem:[#allocation3 + $0x8] sm:$0xff] %vm6526_vm3, %v1821_v25  ;;  %v1822_v4 = vadd.f32 %v1732_v24, %v1694_v14  ;;  %v1695_v25 = vmul.f32 %v2946_v8, %v1567_v61  ;;  %v1696_v50 = vmul.f32 %v2952_v9, %v1568_v42  ;;  %v6550_v24 = vld [vmem:[#allocation77_spill] sm:$0xff]  ;;  %vm6576_vm3 = vmmov %vm6497_vm1 }
 0x2d9   :  { %v1644_v41 = vmul.f32 1.442695, %v6543_v35  ;;  %v2954_v12 = vpop.eup %2953 }
 0x2da   :  { %v1780_v5 = vpop.xlane.xlu1 %1779  ;;  %1855 = vst.msk [vmem:[#allocation3 + $0x10] sm:$0xff] %vm6537_vm14, %v1822_v4  ;;  %v5514_v7 = vpop.eup %2955  ;;  %vm6578_vm14 = vmmov %vm6497_vm1 }
 0x2db   :  { %v2224_v29 = vld [vmem:[#allocation3 + $0x80] sm:$0xff]  ;;  %v1838_v38 = vadd.f32 %v1780_v5, %v1710_v10  ;;  %v2958_v13 = vpop.eup %2957 }
 0x2dc   :  { %2969 = vlog2.f32 %v2224_v29  ;;  %v1735_v31 = vpop.xlane.xlu0 %1734  ;;  %v5517_v14 = vpop.eup %2959  ;;  %v6549_v29 = vld [vmem:[#allocation76_spill] sm:$0xff] }
 0x2dd   :  { %2971 = vrcp.f32 %v2410_v46  ;;  %1871 = vst.msk [vmem:[#allocation3 + $0x90] sm:$0xff] %vm6544_vm10, %v1838_v38  ;;  %v2225_v6 = vld [vmem:[#allocation3 + $0x88] sm:$0xff]  ;;  %v2241_v46 = vmul.f32 0.6931472, %v2954_v12  ;;  %v1823_v16 = vadd.f32 %v1735_v31, %v1695_v25  ;;  %v6551_v4 = vsub.f32 %v6549_v29, %v6550_v24  ;;  %v2192_v24 = vld [vmem:[#allocation2 + $0x80] sm:$0xff] }
 0x2de   :  { %2973 = vpow2.f32 %v1640_v20  ;;  %v1583_v20 = vld [vmem:[#allocation3 + $0x98] sm:$0xff]  ;;  %v1738_v0 = vpop.xlane.xlu1 %1737  ;;  %v6552_v38 = vld [vmem:[#allocation78_spill] sm:$0xff]  ;;  %v2465_v29 = vmul.f32 %v5467_v26, %v2384_v40  ;;  %vm2530_vm10 = vcmp.gt.f32.partialorder %v5403_v22, 0.0 }
 0x2df   :  { %2975 = vpow2.f32 %v1670_v1  ;;  %v2209_v36 = vld [vmem:[#allocation3 + $0x8] sm:$0xff]  ;;  %v2304_v53 = vadd.f32 %v2241_v46, %v2176_v30  ;;  %1856 = vst.msk [vmem:[#allocation3 + $0x18] sm:$0xff] %vm6548_vm15, %v1823_v16  ;;  %v2962_v1 = vpop.eup %2961  ;;  %v1676_v10 = vmul.f32 1.442695, %v6551_v4  ;;  %v1824_v5 = vadd.f32 %v1738_v0, %v1696_v50  ;;  %v6559_v16 = vld [vmem:[#allocation81_spill] sm:$0xff]  ;;  %v6563_v4 = vld [vmem:[#allocation84_spill] sm:$0xff] }
 0x2e0   :  { %2977 = vlog2.f32 %v2209_v36  ;;  %v5524_v11 = vpop.eup %2963  ;;  %v1711_v59 = vmul.f32 %v2958_v13, %v1583_v20  ;;  %v6554_v21 = vsub.f32 %v6552_v38, %v6553_v37  ;;  %v1783_v36 = vpop.xlane.xlu0 %1782  ;;  %v1569_v25 = vld [vmem:[#allocation3 + $0x28] sm:$0xff]  ;;  %v6560_v13 = vld [vmem:[#allocation83_spill] sm:$0xff]  ;;  %v5544_v20 = vld [vmem:[%s6002_s3 + $0x98] sm:$0xff] }
 0x2e1   :  { %2979 = vpow2.f32 %v1672_v27  ;;  %v2210_v8 = vld [vmem:[#allocation3 + $0x10] sm:$0xff]  ;;  %v2496_v27 = vsub.f32 %v2433_v47, %v2304_v53  ;;  %v5526_v61 = vpop.eup %2965  ;;  %1857 = vst.msk [vmem:[#allocation3 + $0x20] sm:$0xff] %vm6555_vm5, %v1824_v5  ;;  %v6561_v30 = vsub.f32 %v6559_v16, %v6560_v13  ;;  %v5561_v5 = vld [vmem:[%s6002_s3 + $0xa0] sm:$0xff]  ;;  %v6568_v16 = vld [vmem:[#allocation86_spill] sm:$0xff] }
 0x2e2   :  { %2981 = vlog2.f32 %v2225_v6  ;;  %v1646_v54 = vmul.f32 1.442695, %v6554_v21  ;;  %v2968_v9 = vpop.eup %2967  ;;  %v1839_v35 = vadd.f32 %v1783_v36, %v1711_v59  ;;  %v1570_v38 = vld [vmem:[#allocation3 + $0x30] sm:$0xff]  ;;  %v5565_v21 = vmul.f32 %v5478_v19, %v2385_v23  ;;  %vm6579_vm15 = vmmov %vm6497_vm1 }
 0x2e3   :  { %2983 = vpow2.f32 %v1642_v17  ;;  %v2560_v34 = vmul.f32 -1.0, %v2496_v27  ;;  %v2435_v27 = vmul.f32 %v5475_v44, %v2369_v45  ;;  %v1697_v59 = vmul.f32 %v2968_v9, %v1569_v25  ;;  %v2177_v25 = vld [vmem:[#allocation2 + $0x8] sm:$0xff]  ;;  %v6569_v13 = vld [vmem:[#allocation87_spill] sm:$0xff]  ;;  %vm6580_vm5 = vmmov %vm6497_vm1 }
 0x2e4   :  { %2985 = vpow2.f32 %v1644_v41  ;;  %v2226_v17 = vld [vmem:[#allocation3 + $0x90] sm:$0xff]  ;;  %v1712_v41 = vmul.f32 %v2962_v1, %v1584_v51  ;;  %v1786_v42 = vpop.xlane.xlu1 %1785  ;;  %1872 = vst.msk [vmem:[#allocation3 + $0x98] sm:$0xff] %vm6562_vm12, %v1839_v35  ;;  %v2419_v44 = vmax.f32 %v5544_v20, 1.0  ;;  %v2420_v19 = vmax.f32 %v5561_v5, 1.0  ;;  %vm6581_vm12 = vmmov %vm6497_vm1 }
 0x2e5   :  { %2987 = vpow2.f32 %v1674_v63  ;;  %v6557_v63 = vld [vmem:[#allocation82_spill] sm:$0xff]  ;;  %v2592_v47 = vsel %vm2528_vm0, %v2560_v34, 0.0  ;;  %vm2546_vm0 = vcmp.gt.f32.partialorder %v5508_v49, 0.0 }
 0x2e6   :  { %2989 = vlog2.f32 %v2210_v8  ;;  %v6558_v6 = vsub.f32 %v6556_v48, %v6557_v63  ;;  %v1840_v50 = vadd.f32 %v1786_v42, %v1712_v41  ;;  %2624 = vst.msk [vmem:[%s6003_s6] sm:$0xff] %vm6497_vm1, %v2592_v47  ;;  %v2211_v43 = vld [vmem:[#allocation3 + $0x18] sm:$0xff]  ;;  %v1585_v41 = vld [vmem:[#allocation3 + $0xa8] sm:$0xff] }
 0x2e7   :  { %2991 = vrcp.f32 %v2418_v2  ;;  %v1678_v2 = vmul.f32 1.442695, %v6561_v30  ;;  %v2193_v42 = vld [vmem:[#allocation2 + $0x88] sm:$0xff]  ;;  %v6570_v30 = vsub.f32 %v6568_v16, %v6569_v13  ;;  %v2371_v13 = vld [vmem:[#allocation4 + $0x18] sm:$0xff] }
 0x2e8   :  { %2993 = vlog2.f32 %v2226_v17  ;;  %v1648_v31 = vmul.f32 1.442695, %v6558_v6  ;;  %1873 = vst.msk [vmem:[#allocation3 + $0xa0] sm:$0xff] %vm6566_vm9, %v1840_v50  ;;  %v1741_v17 = vpop.xlane.xlu0 %1740  ;;  %v1571_v6 = vld [vmem:[#allocation3 + $0x38] sm:$0xff]  ;;  %vm2531_vm9 = vcmp.gt.f32.partialorder %v5412_v32, 0.0 }
 0x2e9   :  { %v2970_v12 = vpop.eup %2969  ;;  %2995 = vpow2.f32 %v1676_v10  ;;  %v6564_v10 = vld [vmem:[#allocation85_spill] sm:$0xff]  ;;  %v1825_v35 = vadd.f32 %v1741_v17, %v1697_v59 }
 0x2ea   :  { %v5536_v46 = vpop.eup %2971  ;;  %v2273_v53 = vmul.f32 0.6931472, %v2970_v12  ;;  %2997 = vpow2.f32 %v1646_v54  ;;  %v6565_v8 = vsub.f32 %v6563_v4, %v6564_v10  ;;  %v5568_v54 = vmul.f32 %v5484_v15, %v2370_v60  ;;  %v1586_v12 = vld [vmem:[#allocation3 + $0xb0] sm:$0xff]  ;;  %v2212_v15 = vld [vmem:[#allocation3 + $0x20] sm:$0xff] }
 0x2eb   :  { %v2974_v1 = vpop.eup %2973  ;;  %2999 = vlog2.f32 %v2211_v43  ;;  %1858 = vst.msk [vmem:[#allocation3 + $0x28] sm:$0xff] %vm6567_vm2, %v1825_v35  ;;  %v2227_v47 = vld [vmem:[#allocation3 + $0x98] sm:$0xff]  ;;  %v6573_v35 = vld [vmem:[#allocation90_spill] sm:$0xff]  ;;  %vm6586_vm2 = vmmov %vm6497_vm1 }
 0x2ec   :  { %v1680_v0 = vmul.f32 1.442695, %v6565_v8  ;;  %v2976_v51 = vpop.eup %2975  ;;  %v2320_v26 = vadd.f32 %v2273_v53, %v2192_v24  ;;  %3001 = vpow2.f32 %v1648_v31  ;;  %v1698_v45 = vmul.f32 %v2974_v1, %v1570_v38  ;;  %v1744_v53 = vpop.xlane.xlu1 %1743  ;;  %v5596_v38 = vld [vmem:[%s6002_s3 + $0xb0] sm:$0xff] }
 0x2ed   :  { %v2978_v37 = vpop.eup %2977  ;;  %3003 = vpow2.f32 %v1678_v2  ;;  %v1650_v2 = vmul.f32 1.442695, %v6570_v30  ;;  %v1713_v50 = vmul.f32 %v2976_v51, %v1585_v41  ;;  %v1789_v51 = vpop.xlane.xlu0 %1788 }
 0x2ee   :  { %v2980_v36 = vpop.eup %2979  ;;  %v2512_v40 = vsub.f32 %v2465_v29, %v2320_v26  ;;  %v2243_v34 = vmul.f32 0.6931472, %v2978_v37  ;;  %3005 = vpow2.f32 %v1680_v0  ;;  %v1826_v43 = vadd.f32 %v1744_v53, %v1698_v45  ;;  %v1572_v53 = vld [vmem:[#allocation3 + $0x40] sm:$0xff] }
 0x2ef   :  { %v2982_v9 = vpop.eup %2981  ;;  %3007 = vlog2.f32 %v2212_v15  ;;  %v1714_v1 = vmul.f32 %v2980_v36, %v1586_v12  ;;  %v2228_v0 = vld [vmem:[#allocation3 + $0xa0] sm:$0xff] }
 0x2f0   :  { %v2984_v23 = vpop.eup %2983  ;;  %v2576_v60 = vmul.f32 -1.0, %v2512_v40  ;;  %v2305_v48 = vadd.f32 %v2243_v34, %v2177_v25  ;;  %v2275_v63 = vmul.f32 0.6931472, %v2982_v9  ;;  %3009 = vrcp.f32 %v2419_v44  ;;  %v2178_v40 = vld [vmem:[#allocation2 + $0x10] sm:$0xff]  ;;  %v6572_v34 = vld [vmem:[#allocation88_spill] sm:$0xff]  ;;  %1859 = vst.msk [vmem:[#allocation3 + $0x30] sm:$0xff] %vm6575_vm13, %v1826_v43  ;;  %v1792_v25 = vpop.xlane.xlu1 %1791  ;;  %vm6591_vm13 = vmmov %vm6497_vm1 }
 0x2f1   :  { %v5574_v31 = vpop.eup %2985  ;;  %3011 = vlog2.f32 %v2227_v47  ;;  %v1699_v26 = vmul.f32 %v2984_v23, %v1571_v6  ;;  %v6574_v41 = vsub.f32 %v6572_v34, %v6573_v35  ;;  %v1841_v9 = vadd.f32 %v1789_v51, %v1713_v50  ;;  %v1588_v34 = vld [vmem:[#allocation3 + $0xc0] sm:$0xff] }
 0x2f2   :  { %v5579_v29 = vpop.eup %2987  ;;  %v2608_v24 = vsel %vm2544_vm4, %v2576_v60, 0.0  ;;  %v2497_v4 = vsub.f32 %v2435_v27, %v2305_v48  ;;  %v2321_v10 = vadd.f32 %v2275_v63, %v2193_v42  ;;  %3013 = vrcp.f32 %v2420_v19  ;;  %v2386_v27 = vld [vmem:[#allocation4 + $0x90] sm:$0xff]  ;;  %v2213_v42 = vld [vmem:[#allocation3 + $0x28] sm:$0xff]  ;;  %vm6582_vm4 = vmmov %vm6497_vm1 }
 0x2f3   :  { %v2990_v8 = vpop.eup %2989  ;;  %2640 = vst.msk [vmem:[%s6003_s6 + $0x80] sm:$0xff] %vm6571_vm7, %v2608_v24  ;;  %3015 = vlog2.f32 %v2228_v0  ;;  %v1652_v12 = vmul.f32 1.442695, %v6574_v41  ;;  %v2194_v60 = vld [vmem:[#allocation2 + $0x90] sm:$0xff]  ;;  %v2421_v48 = vmax.f32 %v5591_v55, 1.0  ;;  %v2422_v6 = vmax.f32 %v5596_v38, 1.0  ;;  %vm6590_vm7 = vmmov %vm6497_vm1 }
 0x2f4   :  { %v2992_v59 = vpop.eup %2991  ;;  %v2561_v37 = vmul.f32 -1.0, %v2497_v4  ;;  %v2513_v44 = vsub.f32 %v5565_v21, %v2321_v10  ;;  %v2245_v17 = vmul.f32 0.6931472, %v2990_v8  ;;  %3017 = vpow2.f32 %v1650_v2  ;;  %1874 = vst.msk [vmem:[#allocation3 + $0xa8] sm:$0xff] %vm6577_vm11, %v1841_v9  ;;  %v1587_v0 = vld [vmem:[#allocation3 + $0xb8] sm:$0xff] }
 0x2f5   :  { %v2994_v36 = vpop.eup %2993  ;;  %v2469_v63 = vmul.f32 %v2992_v59, %v2386_v27  ;;  %v1842_v16 = vadd.f32 %v1792_v25, %v1714_v1  ;;  %3019 = vlog2.f32 %v2213_v42  ;;  %v1747_v1 = vpop.xlane.xlu0 %1746  ;;  %v2439_v51 = vmul.f32 %v5489_v58, %v2371_v13  ;;  %v2179_v59 = vld [vmem:[#allocation2 + $0x18] sm:$0xff] }
 0x2f6   :  { %v5604_v19 = vpop.eup %2995  ;;  %v2593_v21 = vsel %vm2529_vm6, %v2561_v37, 0.0  ;;  %v2577_v15 = vmul.f32 -1.0, %v2513_v44  ;;  %v2306_v45 = vadd.f32 %v2245_v17, %v2178_v40  ;;  %v2277_v23 = vmul.f32 0.6931472, %v2994_v36  ;;  %v2373_v44 = vld [vmem:[#allocation4 + $0x28] sm:$0xff] }
 0x2f7   :  { %2625 = vst.msk [vmem:[%s6003_s6 + $0x8] sm:$0xff] %vm6576_vm3, %v2593_v21  ;;  %v5615_v3 = vpop.eup %2997  ;;  %3021 = vpow2.f32 %v1652_v12  ;;  %v1827_v8 = vadd.f32 %v1747_v1, %v1699_v26  ;;  %v1700_v27 = vmul.f32 %v5574_v31, %v1572_v53  ;;  %v2214_v40 = vld [vmem:[#allocation3 + $0x30] sm:$0xff]  ;;  %v2441_v35 = vmul.f32 %v5494_v57, %v2372_v33  ;;  %v1750_v31 = vpop.xlane.xlu1 %1749  ;;  %v2387_v12 = vld [vmem:[#allocation4 + $0x98] sm:$0xff]  ;;  %v6583_v53 = vld [vmem:[#allocation89_spill] sm:$0xff] }
 0x2f8   :  { %v2609_v30 = vsel %vm2545_vm8, %v2577_v15, 0.0  ;;  %v2498_v2 = vsub.f32 %v5568_v54, %v2306_v45  ;;  %v2322_v47 = vadd.f32 %v2277_v23, %v2194_v60  ;;  %v3000_v50 = vpop.eup %2999  ;;  %1875 = vst.msk [vmem:[#allocation3 + $0xb0] sm:$0xff] %vm6579_vm15, %v1842_v16  ;;  %3023 = vrcp.f32 %v2421_v48  ;;  %v1573_v23 = vld [vmem:[#allocation3 + $0x48] sm:$0xff]  ;;  %v2180_v60 = vld [vmem:[#allocation2 + $0x20] sm:$0xff]  ;;  %vm6595_vm3 = vmmov %vm6497_vm1 }
 0x2f9   :  { %2641 = vst.msk [vmem:[%s6003_s6 + $0x88] sm:$0xff] %vm6578_vm14, %v2609_v30  ;;  %v5626_v24 = vpop.eup %3001  ;;  %v2247_v10 = vmul.f32 0.6931472, %v3000_v50  ;;  %3025 = vrcp.f32 %v2422_v6  ;;  %v1715_v41 = vmul.f32 %v5579_v29, %v1587_v0  ;;  %v1828_v45 = vadd.f32 %v1750_v31, %v1700_v27  ;;  %v1795_v49 = vpop.xlane.xlu0 %1794  ;;  %v2388_v6 = vld [vmem:[#allocation4 + $0xa0] sm:$0xff]  ;;  %v6584_v50 = vld [vmem:[#allocation91_spill] sm:$0xff]  ;;  %vm6599_vm14 = vmmov %vm6497_vm1 }
 0x2fa   :  { %v2562_v4 = vmul.f32 -1.0, %v2498_v2  ;;  %v2514_v54 = vsub.f32 %v2469_v63, %v2322_v47  ;;  %v5628_v43 = vpop.eup %3003  ;;  %1860 = vst.msk [vmem:[#allocation3 + $0x38] sm:$0xff] %vm6580_vm5, %v1827_v8  ;;  %3027 = vlog2.f32 %v2214_v40  ;;  %v5647_v48 = vmul.f32 %v5497_v18, %v2373_v44  ;;  %v2195_v47 = vld [vmem:[#allocation2 + $0x98] sm:$0xff]  ;;  %v1574_v44 = vld [vmem:[#allocation3 + $0x50] sm:$0xff]  ;;  %vm6601_vm15 = vmmov %vm6497_vm1 }
 0x2fb   :  { %v5633_v37 = vpop.eup %3005  ;;  %v2307_v26 = vadd.f32 %v2247_v10, %v2179_v59  ;;  %v2229_v15 = vld [vmem:[#allocation3 + $0xa8] sm:$0xff]  ;;  %v1716_v29 = vmul.f32 %v5604_v19, %v1588_v34  ;;  %1861 = vst.msk [vmem:[#allocation3 + $0x40] sm:$0xff] %vm6582_vm4, %v1828_v45  ;;  %v1843_v18 = vadd.f32 %v1795_v49, %v1715_v41  ;;  %v6585_v1 = vsub.f32 %v6583_v53, %v6584_v50  ;;  %v5665_v8 = vld [vmem:[%s6002_s3 + $0xb8] sm:$0xff]  ;;  %vm6605_vm5 = vmmov %vm6497_vm1 }
 0x2fc   :  { %v2594_v17 = vsel %vm2530_vm10, %v2562_v4, 0.0  ;;  %v2578_v36 = vmul.f32 -1.0, %v2514_v54  ;;  %v3008_v58 = vpop.eup %3007  ;;  %3029 = vlog2.f32 %v2229_v15  ;;  %v1798_v54 = vpop.xlane.xlu1 %1797  ;;  %v1701_v19 = vmul.f32 %v5615_v3, %v1573_v23  ;;  %v6592_v49 = vld [vmem:[#allocation94_spill] sm:$0xff]  ;;  %v6596_v50 = vld [vmem:[#allocation96_spill] sm:$0xff]  ;;  %vm6600_vm10 = vmmov %vm6497_vm1 }
 0x2fd   :  { %2626 = vst.msk [vmem:[%s6003_s6 + $0x10] sm:$0xff] %vm6581_vm12, %v2594_v17  ;;  %v3010_v22 = vpop.eup %3009  ;;  %v2499_v25 = vsub.f32 %v2439_v51, %v2307_v26  ;;  %v2249_v21 = vmul.f32 0.6931472, %v3008_v58  ;;  %v1682_v33 = vmul.f32 1.442695, %v6585_v1  ;;  %v2196_v17 = vld [vmem:[#allocation2 + $0xa0] sm:$0xff]  ;;  %v1844_v58 = vadd.f32 %v1798_v54, %v1716_v29  ;;  %vm6609_vm12 = vmmov %vm6497_vm1 }
 0x2fe   :  { %v2610_v9 = vsel %vm2546_vm0, %v2578_v36, 0.0  ;;  %v3012_v57 = vpop.eup %3011  ;;  %v2471_v4 = vmul.f32 %v3010_v22, %v2387_v12  ;;  %1876 = vst.msk [vmem:[#allocation3 + $0xb8] sm:$0xff] %vm6586_vm2, %v1843_v18  ;;  %v6587_v36 = vld [vmem:[#allocation92_spill] sm:$0xff]  ;;  %v6588_v26 = vld [vmem:[#allocation93_spill] sm:$0xff]  ;;  %vm2532_vm6 = vcmp.gt.f32.partialorder %v5419_v28, 0.0  ;;  %v2423_v12 = vmax.f32 %v5665_v8, 1.0  ;;  %vm6610_vm4 = vmmov %vm6497_vm1 }
 0x2ff   :  { %2642 = vst.msk [vmem:[%s6003_s6 + $0x90] sm:$0xff] %vm6497_vm1, %v2610_v9  ;;  %v3014_v63 = vpop.eup %3013  ;;  %v2563_v42 = vmul.f32 -1.0, %v2499_v25  ;;  %v2308_v16 = vadd.f32 %v2249_v21, %v2180_v60  ;;  %v2279_v13 = vmul.f32 0.6931472, %v3012_v57  ;;  %v2230_v30 = vld [vmem:[#allocation3 + $0xb0] sm:$0xff]  ;;  %v6589_v3 = vsub.f32 %v6587_v36, %v6588_v26  ;;  %v1753_v9 = vpop.xlane.xlu0 %1752  ;;  %v1589_v57 = vld [vmem:[#allocation3 + $0xc8] sm:$0xff] }
 0x300   :  { %v3016_v2 = vpop.eup %3015  ;;  %3031 = vlog2.f32 %v2230_v30  ;;  %v2473_v34 = vmul.f32 %v3014_v63, %v2388_v6  ;;  %vm2547_vm8 = vcmp.gt.f32.partialorder %v5544_v20, 0.0  ;;  %1877 = vst.msk [vmem:[#allocation3 + $0xc0] sm:$0xff] %vm6591_vm13, %v1844_v58  ;;  %v1702_v25 = vmul.f32 %v5626_v24, %v1574_v44  ;;  %v2181_v60 = vld [vmem:[#allocation2 + $0x28] sm:$0xff]  ;;  %v6593_v29 = vld [vmem:[#allocation95_spill] sm:$0xff]  ;;  %vm6616_vm13 = vmmov %vm6497_vm1 }
 0x301   :  { %v5660_v10 = vpop.eup %3017  ;;  %v2595_v0 = vsel %vm2531_vm9, %v2563_v42, 0.0  ;;  %v2500_v51 = vsub.f32 %v2441_v35, %v2308_v16  ;;  %v2323_v59 = vadd.f32 %v2279_v13, %v2195_v47  ;;  %v2281_v27 = vmul.f32 0.6931472, %v3016_v2  ;;  %v2215_v32 = vld [vmem:[#allocation3 + $0x38] sm:$0xff]  ;;  %v1590_v47 = vld [vmem:[#allocation3 + $0xd0] sm:$0xff]  ;;  %v6597_v1 = vld [vmem:[#allocation98_spill] sm:$0xff] }
 0x302   :  { %v1684_v40 = vmul.f32 1.442695, %v6589_v3  ;;  %2627 = vst.msk [vmem:[%s6003_s6 + $0x18] sm:$0xff] %vm6590_vm7, %v2595_v0  ;;  %3033 = vlog2.f32 %v2215_v32  ;;  %v3020_v22 = vpop.eup %3019  ;;  %v6594_v63 = vsub.f32 %v6592_v49, %v6593_v29  ;;  %vm2548_vm11 = vcmp.gt.f32.partialorder %v5561_v5, 0.0  ;;  %v2216_v24 = vld [vmem:[#allocation3 + $0x40] sm:$0xff]  ;;  %v5695_v13 = vld [vmem:[%s6002_s3 + $0x58] sm:$0xff]  ;;  %vm6614_vm7 = vmmov %vm6497_vm1 }
 0x303   :  { %v2564_v35 = vmul.f32 -1.0, %v2500_v51  ;;  %v2515_v31 = vsub.f32 %v2471_v4, %v2323_v59  ;;  %v2324_v41 = vadd.f32 %v2281_v27, %v2196_v17  ;;  %3035 = vpow2.f32 %v1682_v33  ;;  %v2374_v51 = vld [vmem:[#allocation4 + $0x30] sm:$0xff]  ;;  %v2375_v59 = vld [vmem:[#allocation4 + $0x38] sm:$0xff] }
 0x304   :  { %v5682_v21 = vpop.eup %3021  ;;  %v2251_v23 = vmul.f32 0.6931472, %v3020_v22  ;;  %3037 = vpow2.f32 %v1684_v40  ;;  %v1654_v6 = vmul.f32 1.442695, %v6594_v63  ;;  %v1829_v42 = vadd.f32 %v1753_v9, %v1701_v19  ;;  %v2182_v5 = vld [vmem:[#allocation2 + $0x30] sm:$0xff] }
 0x305   :  { %v2596_v28 = vsel %vm2532_vm6, %v2564_v35, 0.0  ;;  %v2579_v15 = vmul.f32 -1.0, %v2515_v31  ;;  %v2516_v45 = vsub.f32 %v2473_v34, %v2324_v41  ;;  %v3024_v16 = vpop.eup %3023  ;;  %3039 = vlog2.f32 %v2216_v24  ;;  %v2231_v54 = vld [vmem:[#allocation3 + $0xb8] sm:$0xff]  ;;  %v6602_v34 = vld [vmem:[#allocation97_spill] sm:$0xff]  ;;  %v2389_v35 = vld [vmem:[#allocation4 + $0xa8] sm:$0xff] }
 0x306   :  { %2628 = vst.msk [vmem:[%s6003_s6 + $0x20] sm:$0xff] %vm6595_vm3, %v2596_v28  ;;  %v2309_v2 = vadd.f32 %v2251_v23, %v2181_v60  ;;  %v3026_v53 = vpop.eup %3025  ;;  %v6598_v33 = vsub.f32 %v6596_v50, %v6597_v1  ;;  %3041 = vrcp.f32 %v2423_v12  ;;  %v1717_v19 = vmul.f32 %v5628_v43, %v1589_v57  ;;  %v2390_v9 = vld [vmem:[#allocation4 + $0xb0] sm:$0xff]  ;;  %v2197_v23 = vld [vmem:[#allocation2 + $0xa8] sm:$0xff]  ;;  %v6606_v57 = vld [vmem:[#allocation100_spill] sm:$0xff] }
 0x307   :  { %v2611_v30 = vsel %vm2547_vm8, %v2579_v15, 0.0  ;;  %v2580_v18 = vmul.f32 -1.0, %v2516_v45  ;;  %1862 = vst.msk [vmem:[#allocation3 + $0x48] sm:$0xff] %vm6600_vm10, %v1829_v42  ;;  %v3028_v0 = vpop.eup %3027  ;;  %3043 = vlog2.f32 %v2231_v54  ;;  %v2411_v36 = vmax.f32 %v5695_v13, 1.0  ;;  %v1575_v15 = vld [vmem:[#allocation3 + $0x58] sm:$0xff]  ;;  %v6607_v60 = vld [vmem:[#allocation101_spill] sm:$0xff]  ;;  %vm6615_vm8 = vmmov %vm6497_vm1 }
 0x308   :  { %v1656_v4 = vmul.f32 1.442695, %v6598_v33  ;;  %2643 = vst.msk [vmem:[%s6003_s6 + $0x98] sm:$0xff] %vm6599_vm14, %v2611_v30  ;;  %v1756_v20 = vpop.xlane.xlu1 %1755  ;;  %v2501_v44 = vsub.f32 %v5647_v48, %v2309_v2  ;;  %vm2533_vm0 = vcmp.gt.f32.partialorder %v5425_v39, 0.0  ;;  %v2253_v43 = vmul.f32 0.6931472, %v3028_v0  ;;  %vm6618_vm14 = vmmov %vm6497_vm1 }
 0x309   :  { %v2612_v27 = vsel %vm2548_vm11, %v2580_v18, 0.0  ;;  %v1830_v17 = vadd.f32 %v1756_v20, %v1702_v25  ;;  %v1718_v3 = vmul.f32 %v5633_v37, %v1590_v47  ;;  %v3030_v40 = vpop.eup %3029  ;;  %3045 = vpow2.f32 %v1654_v6  ;;  %v6603_v48 = vld [vmem:[#allocation99_spill] sm:$0xff]  ;;  %v1576_v30 = vld [vmem:[#allocation3 + $0x60] sm:$0xff]  ;;  %vm6617_vm11 = vmmov %vm6497_vm1 }
 0x30a   :  { %2644 = vst.msk [vmem:[%s6003_s6 + $0xa0] sm:$0xff] %vm6601_vm15, %v2612_v27  ;;  %v1801_v26 = vpop.xlane.xlu0 %1800  ;;  %v6604_v32 = vsub.f32 %v6602_v34, %v6603_v48  ;;  %v2565_v31 = vmul.f32 -1.0, %v2501_v44  ;;  %v2445_v22 = vmul.f32 %v5514_v7, %v2374_v51  ;;  %v5724_v12 = vmul.f32 %v5517_v14, %v2375_v59  ;;  %v2198_v18 = vld [vmem:[#allocation2 + $0xb0] sm:$0xff]  ;;  %v5742_v20 = vld [vmem:[%s6002_s3 + $0x60] sm:$0xff]  ;;  %vm6622_vm10 = vmmov %vm6497_vm1 }
 0x30b   :  { %1863 = vst.msk [vmem:[#allocation3 + $0x50] sm:$0xff] %vm6605_vm5, %v1830_v17  ;;  %v1845_v41 = vadd.f32 %v1801_v26, %v1717_v19  ;;  %v2310_v25 = vadd.f32 %v2253_v43, %v2182_v5  ;;  %v2283_v37 = vmul.f32 0.6931472, %v3030_v40  ;;  %3047 = vpow2.f32 %v1656_v4  ;;  %v2376_v51 = vld [vmem:[#allocation4 + $0x40] sm:$0xff]  ;;  %v6611_v26 = vld [vmem:[#allocation102_spill] sm:$0xff] }
 0x30c   :  { %v1686_v58 = vmul.f32 1.442695, %v6604_v32  ;;  %v1804_v28 = vpop.xlane.xlu1 %1803  ;;  %v6608_v49 = vsub.f32 %v6606_v57, %v6607_v60  ;;  %v2597_v63 = vsel %vm2533_vm0, %v2565_v31, 0.0  ;;  %v2475_v14 = vmul.f32 %v3024_v16, %v2389_v35  ;;  %v1592_v34 = vld [vmem:[#allocation3 + $0xe0] sm:$0xff]  ;;  %vm6623_vm0 = vmmov %vm6497_vm1 }
 0x30d   :  { %v3032_v45 = vpop.eup %3031  ;;  %1878 = vst.msk [vmem:[#allocation3 + $0xc8] sm:$0xff] %vm6609_vm12, %v1845_v41  ;;  %v1846_v7 = vadd.f32 %v1804_v28, %v1718_v3  ;;  %v2502_v6 = vsub.f32 %v2445_v22, %v2310_v25  ;;  %v2325_v24 = vadd.f32 %v2283_v37, %v2197_v23  ;;  %v2477_v2 = vmul.f32 %v3026_v53, %v2390_v9  ;;  %v6612_v3 = vld [vmem:[#allocation103_spill] sm:$0xff]  ;;  %v5766_v9 = vld [vmem:[%s6002_s3 + $0x68] sm:$0xff]  ;;  %v2391_v25 = vld [vmem:[#allocation4 + $0xb8] sm:$0xff] }
 0x30e   :  { %v1688_v29 = vmul.f32 1.442695, %v6608_v49  ;;  %2629 = vst.msk [vmem:[%s6003_s6 + $0x28] sm:$0xff] %vm6497_vm1, %v2597_v63  ;;  %v2285_v42 = vmul.f32 0.6931472, %v3032_v45  ;;  %3049 = vpow2.f32 %v1686_v58  ;;  %vm2534_vm9 = vcmp.gt.f32.partialorder %v5437_v62, 0.0  ;;  %v1759_v4 = vpop.xlane.xlu0 %1758  ;;  %vm6624_vm5 = vmmov %vm6623_vm0 }
 0x30f   :  { %v2217_v39 = vld [vmem:[#allocation3 + $0x48] sm:$0xff]  ;;  %1879 = vst.msk [vmem:[#allocation3 + $0xd0] sm:$0xff] %vm6610_vm4, %v1846_v7  ;;  %v1703_v47 = vmul.f32 %v5660_v10, %v1575_v15  ;;  %v3034_v16 = vpop.eup %3033  ;;  %v2566_v50 = vmul.f32 -1.0, %v2502_v6  ;;  %v2517_v1 = vsub.f32 %v2475_v14, %v2325_v24  ;;  %vm2549_vm2 = vcmp.gt.f32.partialorder %v5591_v55, 0.0  ;;  %v2183_v10 = vld [vmem:[#allocation2 + $0x38] sm:$0xff]  ;;  %v2184_v15 = vld [vmem:[#allocation2 + $0x40] sm:$0xff] }
 0x310   :  { %v2326_v33 = vadd.f32 %v2285_v42, %v2198_v18  ;;  %3051 = vlog2.f32 %v2217_v39  ;;  %v3036_v54 = vpop.eup %3035  ;;  %v2255_v53 = vmul.f32 0.6931472, %v3034_v16  ;;  %v1704_v0 = vmul.f32 %v5682_v21, %v1576_v30  ;;  %v1591_v62 = vld [vmem:[#allocation3 + $0xd8] sm:$0xff]  ;;  %v6620_v14 = vld [vmem:[#allocation105_spill] sm:$0xff]  ;;  %v5788_v39 = vld [vmem:[%s6002_s3 + $0x70] sm:$0xff] }
 0x311   :  { %v1831_v19 = vadd.f32 %v1759_v4, %v1703_v47  ;;  %3053 = vpow2.f32 %v1688_v29  ;;  %v2598_v59 = vsel %vm2534_vm9, %v2566_v50, 0.0  ;;  %v2581_v27 = vmul.f32 -1.0, %v2517_v1  ;;  %v3038_v43 = vpop.eup %3037  ;;  %v2199_v63 = vld [vmem:[#allocation2 + $0xb8] sm:$0xff]  ;;  %vm6625_vm1 = vmmov %vm6623_vm0 }
 0x312   :  { %v2518_v44 = vsub.f32 %v2477_v2, %v2326_v33  ;;  %v2218_v17 = vld [vmem:[#allocation3 + $0x50] sm:$0xff]  ;;  %v6613_v40 = vsub.f32 %v6611_v26, %v6612_v3  ;;  %2630 = vst.msk [vmem:[%s6003_s6 + $0x30] sm:$0xff] %vm6614_vm7, %v2598_v59  ;;  %vm2550_vm6 = vcmp.gt.f32.partialorder %v5596_v38, 0.0  ;;  %v2311_v21 = vadd.f32 %v2255_v53, %v2183_v10  ;;  %v3040_v48 = vpop.eup %3039  ;;  %v6619_v7 = vld [vmem:[#allocation104_spill] sm:$0xff]  ;;  %v1577_v2 = vld [vmem:[#allocation3 + $0x68] sm:$0xff] }
 0x313   :  { %3055 = vlog2.f32 %v2218_v17  ;;  %1864 = vst.msk [vmem:[#allocation3 + $0x58] sm:$0xff] %vm6615_vm8, %v1831_v19  ;;  %v2412_v32 = vmax.f32 %v5742_v20, 1.0  ;;  %v2613_v58 = vsel %vm2549_vm2, %v2581_v27, 0.0  ;;  %v3042_v41 = vpop.eup %3041  ;;  %v2449_v22 = vmul.f32 %v5524_v11, %v2376_v51  ;;  %v2232_v19 = vld [vmem:[#allocation3 + $0xc0] sm:$0xff]  ;;  %v1578_v27 = vld [vmem:[#allocation3 + $0x70] sm:$0xff]  ;;  %v2377_v17 = vld [vmem:[#allocation4 + $0x48] sm:$0xff] }
 0x314   :  { %v1658_v5 = vmul.f32 1.442695, %v6613_v40  ;;  %3057 = vrcp.f32 %v2411_v36  ;;  %v2582_v35 = vmul.f32 -1.0, %v2518_v44  ;;  %v1762_v31 = vpop.xlane.xlu1 %1761  ;;  %2645 = vst.msk [vmem:[%s6003_s6 + $0xa8] sm:$0xff] %vm6616_vm13, %v2613_v58  ;;  %v2503_v36 = vsub.f32 %v5724_v12, %v2311_v21  ;;  %v3044_v28 = vpop.eup %3043  ;;  %v5811_v40 = vld [vmem:[%s6002_s3 + $0xd0] sm:$0xff]  ;;  %v2185_v58 = vld [vmem:[#allocation2 + $0x48] sm:$0xff]  ;;  %vm6626_vm9 = vmmov %vm6623_vm0 }
 0x315   :  { %v2257_v55 = vmul.f32 0.6931472, %v3040_v48  ;;  %v1832_v37 = vadd.f32 %v1762_v31, %v1704_v0  ;;  %vm2535_vm3 = vcmp.gt.f32.partialorder %v5445_v56, 0.0  ;;  %v1719_v45 = vmul.f32 %v3036_v54, %v1591_v62  ;;  %v5802_v0 = vld [vmem:[%s6002_s3 + $0xc0] sm:$0xff]  ;;  %v1593_v62 = vld [vmem:[#allocation3 + $0xe8] sm:$0xff]  ;;  %vm6627_vm4 = vmmov %vm6623_vm0 }
 0x316   :  { %v2614_v11 = vsel %vm2550_vm6, %v2582_v35, 0.0  ;;  %v1720_v57 = vmul.f32 %v3038_v43, %v1592_v34  ;;  %3059 = vpow2.f32 %v1658_v5  ;;  %v2567_v60 = vmul.f32 -1.0, %v2503_v36  ;;  %v3046_v29 = vpop.eup %3045  ;;  %vm6628_vm7 = vmmov %vm6623_vm0 }
 0x317   :  { %2646 = vst.msk [vmem:[%s6003_s6 + $0xb0] sm:$0xff] %vm6617_vm11, %v2614_v11  ;;  %v2312_v12 = vadd.f32 %v2257_v55, %v2184_v15  ;;  %v2287_v49 = vmul.f32 0.6931472, %v3044_v28  ;;  %v2413_v38 = vmax.f32 %v5766_v9, 1.0  ;;  %v6621_v6 = vsub.f32 %v6619_v7, %v6620_v14  ;;  %v2234_v55 = vld [vmem:[#allocation3 + $0xd0] sm:$0xff]  ;;  %vm6629_vm6 = vmmov %vm6623_vm0 }
 0x318   :  { %1865 = vst.msk [vmem:[#allocation3 + $0x60] sm:$0xff] %vm6618_vm14, %v1832_v37  ;;  %v2479_v42 = vmul.f32 %v3042_v41, %v2391_v25  ;;  %v2599_v47 = vsel %vm2535_vm3, %v2567_v60, 0.0  ;;  %v3048_v33 = vpop.eup %3047  ;;  %3061 = vrcp.f32 %v2412_v32  ;;  %vm2536_vm15 = vcmp.gt.f32.partialorder %v5454_v52, 0.0  ;;  %v5821_v52 = vld [vmem:[%s6002_s3 + $0xe0] sm:$0xff]  ;;  %v2378_v32 = vld [vmem:[#allocation4 + $0x50] sm:$0xff]  ;;  %vm6630_vm13 = vmmov %vm6623_vm0 }
 0x319   :  { %v1690_v24 = vmul.f32 1.442695, %v6621_v6  ;;  %v2504_v16 = vsub.f32 %v2449_v22, %v2312_v12  ;;  %v2327_v50 = vadd.f32 %v2287_v49, %v2199_v63  ;;  %2631 = vst.msk [vmem:[%s6003_s6 + $0x38] sm:$0xff] %vm6622_vm10, %v2599_v47  ;;  %v1705_v56 = vmul.f32 %v3046_v29, %v1577_v2  ;;  %v1594_v41 = vld [vmem:[#allocation3 + $0xf0] sm:$0xff]  ;;  %v3113_v29 = vld [vmem:[%s6002_s3 + $0x48] sm:$0xff]  ;;  %vm6631_vm3 = vmmov %vm6623_vm0 }
 0x31a   :  { %v1807_v23 = vpop.xlane.xlu0 %1806  ;;  %v2219_v4 = vld [vmem:[#allocation3 + $0x58] sm:$0xff]  ;;  %v2414_v10 = vmax.f32 %v5788_v39, 1.0  ;;  %vm2551_vm12 = vcmp.gt.f32.partialorder %v5665_v8, 0.0  ;;  %v2424_v34 = vmax.f32 %v5802_v0, 1.0  ;;  %v1706_v31 = vmul.f32 %v3048_v33, %v1578_v27  ;;  %v5844_v2 = vld [vmem:[%s6002_s3 + $0xc8] sm:$0xff]  ;;  %v5849_v47 = vld [vmem:[%s6002_s3 + $0xf0] sm:$0xff] }
 0x31b   :  { %v1847_v30 = vadd.f32 %v1807_v23, %v1719_v45  ;;  %v2568_v54 = vmul.f32 -1.0, %v2504_v16  ;;  %v2519_v53 = vsub.f32 %v2479_v42, %v2327_v50  ;;  %3063 = vlog2.f32 %v2219_v4  ;;  %v3050_v51 = vpop.eup %3049  ;;  %v3114_v50 = vld [vmem:[%s6002_s3 + $0x50] sm:$0xff]  ;;  %v1941_v33 = vld [vmem:[#allocation4 + $0xc0] sm:$0xff]  ;;  %vm6632_vm11 = vmmov %vm6623_vm0 }
 0x31c   :  { %v1810_v18 = vpop.xlane.xlu1 %1809  ;;  %3065 = vpow2.f32 %v1690_v24  ;;  %v2451_v25 = vmul.f32 %v5526_v61, %v2377_v17  ;;  %v2426_v8 = vmax.f32 %v5811_v40, 1.0  ;;  %v1721_v45 = vmul.f32 %v3050_v51, %v1593_v62  ;;  %vm6633_vm14 = vmmov %vm6623_vm0 }
 0x31d   :  { %v1848_v1 = vadd.f32 %v1810_v18, %v1720_v57  ;;  %1880 = vst.msk [vmem:[#allocation3 + $0xd8] sm:$0xff] %vm6623_vm0, %v1847_v30  ;;  %v3052_v44 = vpop.eup %3051  ;;  %3067 = vrcp.f32 %v2413_v38  ;;  %v2600_v43 = vsel %vm2536_vm15, %v2568_v54, 0.0  ;;  %v2583_v26 = vmul.f32 -1.0, %v2519_v53  ;;  %v2186_v57 = vld [vmem:[#allocation2 + $0x50] sm:$0xff]  ;;  %v2233_v38 = vld [vmem:[#allocation3 + $0xc8] sm:$0xff]  ;;  %vm6634_vm10 = vmmov %vm6623_vm0 }
 0x31e   :  { %2632 = vst.msk [vmem:[%s6003_s6 + $0x40] sm:$0xff] %vm6625_vm1, %v2600_v43  ;;  %3069 = vlog2.f32 %v2232_v19  ;;  %v2259_v5 = vmul.f32 0.6931472, %v3052_v44  ;;  %v3054_v48 = vpop.eup %3053  ;;  %v2428_v23 = vmax.f32 %v5821_v52, 1.0  ;;  %v2453_v61 = vmul.f32 %v5536_v46, %v2378_v32  ;;  %v1579_v46 = vld [vmem:[#allocation3 + $0x78] sm:$0xff] }
 0x31f   :  { %1881 = vst.msk [vmem:[#allocation3 + $0xe0] sm:$0xff] %vm6624_vm5, %v1848_v1  ;;  %v2220_v21 = vld [vmem:[#allocation3 + $0x60] sm:$0xff]  ;;  %v2615_v35 = vsel %vm2551_vm12, %v2583_v26, 0.0  ;;  %v1722_v49 = vmul.f32 %v3054_v48, %v1594_v41  ;;  %vm2537_vm2 = vcmp.gt.f32.partialorder %v3113_v29, 0.0  ;;  %vm2538_vm8 = vcmp.gt.f32.partialorder %v3114_v50, 0.0  ;;  %v5870_v26 = vld [vmem:[%s6002_s3 + $0x78] sm:$0xff]  ;;  %vm6635_vm5 = vmmov %vm6623_vm0 }
 0x320   :  { %3071 = vlog2.f32 %v2220_v21  ;;  %v3056_v22 = vpop.eup %3055  ;;  %2647 = vst.msk [vmem:[%s6003_s6 + $0xb8] sm:$0xff] %vm6627_vm4, %v2615_v35  ;;  %v2313_v36 = vadd.f32 %v2259_v5, %v2185_v58  ;;  %v2425_v44 = vmax.f32 %v5844_v2, 1.0  ;;  %v2430_v17 = vmax.f32 %v5849_v47, 1.0  ;;  %v2187_v32 = vld [vmem:[#allocation2 + $0x58] sm:$0xff]  ;;  %v1943_v35 = vld [vmem:[#allocation4 + $0xd0] sm:$0xff]  ;;  %vm6636_vm12 = vmmov %vm6623_vm0 }
 0x321   :  { %3073 = vrcp.f32 %v2414_v10  ;;  %v5832_v28 = vpop.eup %3057  ;;  %v2261_v15 = vmul.f32 0.6931472, %v3056_v22  ;;  %v2379_v10 = vld [vmem:[#allocation4 + $0x58] sm:$0xff]  ;;  %vm2539_vm15 = vcmp.gt.f32.partialorder %v5695_v13, 0.0  ;;  %vm2540_vm1 = vcmp.gt.f32.partialorder %v5742_v20, 0.0  ;;  %vm6638_vm4 = vmmov %vm6623_vm0 }
 0x322   :  { %v1765_v59 = vpop.xlane.xlu0 %1764  ;;  %v2505_v60 = vsub.f32 %v2451_v25, %v2313_v36  ;;  %3075 = vrcp.f32 %v2424_v34  ;;  %v1595_v34 = vld [vmem:[#allocation3 + $0xf8] sm:$0xff]  ;;  %v2455_v22 = vmul.f32 %v5832_v28, %v2379_v10 }
 0x323   :  { %v1833_v3 = vadd.f32 %v1765_v59, %v1705_v56  ;;  %v2314_v63 = vadd.f32 %v2261_v15, %v2186_v57  ;;  %3077 = vlog2.f32 %v2234_v55  ;;  %v3060_v14 = vpop.eup %3059  ;;  %v5863_v56 = vld [vmem:[%s6002_s3 + $0xd8] sm:$0xff]  ;;  %v2380_v55 = vld [vmem:[#allocation4 + $0x60] sm:$0xff] }
 0x324   :  { %v1768_v37 = vpop.xlane.xlu1 %1767  ;;  %v2569_v6 = vmul.f32 -1.0, %v2505_v60  ;;  %3079 = vrcp.f32 %v2426_v8  ;;  %v2235_v53 = vld [vmem:[#allocation3 + $0xd8] sm:$0xff]  ;;  %v1707_v19 = vmul.f32 %v3060_v14, %v1579_v46  ;;  %v5889_v60 = vld [vmem:[%s6002_s3 + $0xe8] sm:$0xff] }
 0x325   :  { %1866 = vst.msk [vmem:[#allocation3 + $0x68] sm:$0xff] %vm6626_vm9, %v1833_v3  ;;  %v1834_v11 = vadd.f32 %v1768_v37, %v1706_v31  ;;  %v2506_v42 = vsub.f32 %v2453_v61, %v2314_v63  ;;  %3081 = vrcp.f32 %v2428_v23  ;;  %v3062_v4 = vpop.eup %3061  ;;  %v2427_v31 = vmax.f32 %v5863_v56, 1.0  ;;  %v1942_v46 = vld [vmem:[#allocation4 + $0xc8] sm:$0xff]  ;;  %vm6637_vm9 = vmmov %vm6623_vm0 }
 0x326   :  { %v1813_v12 = vpop.xlane.xlu0 %1812  ;;  %v2236_v30 = vld [vmem:[#allocation3 + $0xe0] sm:$0xff]  ;;  %v2601_v16 = vsel %vm2537_vm2, %v2569_v6, 0.0  ;;  %3083 = vlog2.f32 %v2233_v38  ;;  %v2415_v37 = vmax.f32 %v5870_v26, 1.0  ;;  %v2457_v14 = vmul.f32 %v3062_v4, %v2380_v55  ;;  %v2381_v4 = vld [vmem:[#allocation4 + $0x68] sm:$0xff]  ;;  %vm6639_vm2 = vmmov %vm6623_vm0 }
 0x327   :  { %1867 = vst.msk [vmem:[#allocation3 + $0x70] sm:$0xff] %vm6628_vm7, %v1834_v11  ;;  %v1849_v7 = vadd.f32 %v1813_v12, %v1721_v45  ;;  %v2570_v54 = vmul.f32 -1.0, %v2506_v42  ;;  %v2188_v12 = vld [vmem:[#allocation2 + $0x60] sm:$0xff]  ;;  %v5896_v42 = vld [vmem:[%s6002_s3 + $0xf8] sm:$0xff]  ;;  %v2429_v50 = vmax.f32 %v5889_v60, 1.0  ;;  %vm2552_vm7 = vcmp.gt.f32.partialorder %v5802_v0, 0.0 }
 0x328   :  { %v1816_v24 = vpop.xlane.xlu1 %1815  ;;  %2633 = vst.msk [vmem:[%s6003_s6 + $0x48] sm:$0xff] %vm6630_vm13, %v2601_v16  ;;  %v3064_v51 = vpop.eup %3063  ;;  %v1945_v38 = vld [vmem:[#allocation4 + $0xe0] sm:$0xff]  ;;  %vm6641_vm13 = vmmov %vm6623_vm0 }
 0x329   :  { %1882 = vst.msk [vmem:[#allocation3 + $0xe8] sm:$0xff] %vm6629_vm6, %v1849_v7  ;;  %v1850_v18 = vadd.f32 %v1816_v24, %v1722_v49  ;;  %v3066_v43 = vpop.eup %3065  ;;  %v2602_v3 = vsel %vm2538_vm8, %v2570_v54, 0.0  ;;  %v2263_v5 = vmul.f32 0.6931472, %v3064_v51  ;;  %vm6640_vm6 = vmmov %vm6623_vm0  ;;  %vm2541_vm8 = vcmp.gt.f32.partialorder %v5766_v9, 0.0 }
 0x32a   :  { %v5873_v48 = vpop.eup %3067  ;;  %2634 = vst.msk [vmem:[%s6003_s6 + $0x50] sm:$0xff] %vm6632_vm11, %v2602_v3  ;;  %v1723_v15 = vmul.f32 %v3066_v43, %v1595_v34  ;;  %v2431_v43 = vmax.f32 %v5896_v42, 1.0  ;;  %v2382_v3 = vld [vmem:[#allocation4 + $0x70] sm:$0xff]  ;;  %v1944_v34 = vld [vmem:[#allocation4 + $0xd8] sm:$0xff]  ;;  %vm6642_vm11 = vmmov %vm6623_vm0 }
 0x32b   :  { %1883 = vst.msk [vmem:[#allocation3 + $0xf0] sm:$0xff] %vm6631_vm3, %v1850_v18  ;;  %v3070_v41 = vpop.eup %3069  ;;  %v2315_v25 = vadd.f32 %v2263_v5, %v2187_v32  ;;  %vm2542_vm3 = vcmp.gt.f32.partialorder %v5788_v39, 0.0  ;;  %v2205_v39 = vld [vmem:[#allocation2 + $0xe8] sm:$0xff] }
 0x32c   :  { %v2221_v1 = vld [vmem:[#allocation3 + $0x68] sm:$0xff]  ;;  %v2087_v59 = vpop.xlane.xlu1 %2086  ;;  %v2289_v49 = vmul.f32 0.6931472, %v3070_v41 }
 0x32d   :  { %3085 = vlog2.f32 %v2221_v1  ;;  %v2133_v21 = vadd.f32 %v2087_v59, %v1941_v33  ;;  %v3072_v36 = vpop.eup %3071  ;;  %v2507_v23 = vsub.f32 %v2455_v22, %v2315_v25  ;;  %v2200_v33 = vld [vmem:[#allocation2 + $0xc0] sm:$0xff] }
 0x32e   :  { %3087 = vlog2.f32 %v2236_v30  ;;  %v1771_v27 = vpop.xlane.xlu0 %1770  ;;  %v2222_v58 = vld [vmem:[#allocation3 + $0x70] sm:$0xff]  ;;  %v5884_v45 = vpop.eup %3073  ;;  %v2265_v61 = vmul.f32 0.6931472, %v3072_v36  ;;  %v2328_v10 = vadd.f32 %v2289_v49, %v2200_v33 }
 0x32f   :  { %v1835_v62 = vadd.f32 %v1771_v27, %v1707_v19  ;;  %3089 = vlog2.f32 %v2235_v53  ;;  %2165 = vst.msk [vmem:[#allocation4 + $0xc0] sm:$0xff] %vm6633_vm14, %v2133_v21  ;;  %v3076_v7 = vpop.eup %3075  ;;  %v2571_v6 = vmul.f32 -1.0, %v2507_v23  ;;  %vm2554_vm14 = vcmp.gt.f32.partialorder %v5811_v40, 0.0 }
 0x330   :  { %3091 = vlog2.f32 %v2222_v58  ;;  %v2093_v8 = vpop.xlane.xlu1 %2092  ;;  %v2237_v57 = vld [vmem:[#allocation3 + $0xe8] sm:$0xff]  ;;  %v2316_v24 = vadd.f32 %v2265_v61, %v2188_v12  ;;  %v3078_v30 = vpop.eup %3077  ;;  %v2459_v58 = vmul.f32 %v5873_v48, %v2381_v4 }
 0x331   :  { %1868 = vst.msk [vmem:[#allocation3 + $0x78] sm:$0xff] %vm6634_vm10, %v1835_v62  ;;  %3093 = vrcp.f32 %v2425_v44  ;;  %v2135_v28 = vadd.f32 %v2093_v8, %v1943_v35  ;;  %v3080_v1 = vpop.eup %3079  ;;  %v2603_v54 = vsel %vm2539_vm15, %v2571_v6, 0.0  ;;  %v2293_v5 = vmul.f32 0.6931472, %v3078_v30  ;;  %vm6643_vm15 = vmmov %vm6623_vm0 }
 0x332   :  { %v1819_v11 = vpop.xlane.xlu0 %1818  ;;  %3095 = vrcp.f32 %v2430_v17  ;;  %v2238_v29 = vld [vmem:[#allocation3 + $0xf0] sm:$0xff]  ;;  %v2508_v53 = vsub.f32 %v2457_v14, %v2316_v24  ;;  %v5902_v51 = vpop.eup %3081  ;;  %2635 = vst.msk [vmem:[%s6003_s6 + $0x58] sm:$0xff] %vm6636_vm12, %v2603_v54  ;;  %v5916_v8 = vmul.f32 %v5884_v45, %v2382_v3  ;;  %v1946_v45 = vld [vmem:[#allocation4 + $0xe8] sm:$0xff]  ;;  %vm2556_vm10 = vcmp.gt.f32.partialorder %v5821_v52, 0.0 }
 0x333   :  { %v1851_v63 = vadd.f32 %v1819_v11, %v1723_v15  ;;  %3097 = vrcp.f32 %v2427_v31  ;;  %2167 = vst.msk [vmem:[#allocation4 + $0xd0] sm:$0xff] %vm6623_vm0, %v2135_v28  ;;  %v1947_v17 = vld [vmem:[#allocation4 + $0xf0] sm:$0xff]  ;;  %v3084_v13 = vpop.eup %3083  ;;  %v2189_v15 = vld [vmem:[#allocation2 + $0x68] sm:$0xff]  ;;  %vm2553_vm12 = vcmp.gt.f32.partialorder %v5844_v2, 0.0 }
 0x334   :  { %3099 = vlog2.f32 %v2238_v29  ;;  %v2099_v18 = vpop.xlane.xlu1 %2098  ;;  %v2572_v21 = vmul.f32 -1.0, %v2508_v53  ;;  %v2291_v29 = vmul.f32 0.6931472, %v3084_v13  ;;  %v2201_v14 = vld [vmem:[#allocation2 + $0xc8] sm:$0xff] }
 0x335   :  { %3101 = vlog2.f32 %v2237_v57  ;;  %1884 = vst.msk [vmem:[#allocation3 + $0xf8] sm:$0xff] %vm6635_vm5, %v1851_v63  ;;  %v2137_v19 = vadd.f32 %v2099_v18, %v1945_v38  ;;  %vm6644_vm5 = vmmov %vm6623_vm0 }
 0x336   :  { %v2090_v16 = vpop.xlane.xlu0 %2089  ;;  %3103 = vrcp.f32 %v2415_v37  ;;  %v2392_v59 = vld [vmem:[#allocation4 + $0xc0] sm:$0xff]  ;;  %v2604_v22 = vsel %vm2540_vm1, %v2572_v21, 0.0  ;;  %v2202_v37 = vld [vmem:[#allocation2 + $0xd0] sm:$0xff]  ;;  %vm6645_vm1 = vmmov %vm6623_vm0 }
 0x337   :  { %v2134_v44 = vadd.f32 %v2090_v16, %v1942_v46  ;;  %v2481_v62 = vmul.f32 %v3076_v7, %v2392_v59  ;;  %2169 = vst.msk [vmem:[#allocation4 + $0xe0] sm:$0xff] %vm6637_vm9, %v2137_v19  ;;  %v2330_v57 = vadd.f32 %v2293_v5, %v2202_v37  ;;  %v2204_v16 = vld [vmem:[#allocation2 + $0xe0] sm:$0xff]  ;;  %v1948_v59 = vld [vmem:[#allocation4 + $0xf8] sm:$0xff]  ;;  %vm6646_vm9 = vmmov %vm6623_vm0 }
 0x338   :  { %v2223_v27 = vld [vmem:[#allocation3 + $0x78] sm:$0xff]  ;;  %v2105_v35 = vpop.xlane.xlu1 %2104  ;;  %2636 = vst.msk [vmem:[%s6003_s6 + $0x60] sm:$0xff] %vm6639_vm2, %v2604_v22  ;;  %vm6647_vm2 = vmmov %vm6623_vm0 }
 0x339   :  { %3105 = vlog2.f32 %v2223_v27  ;;  %2166 = vst.msk [vmem:[#allocation4 + $0xc8] sm:$0xff] %vm6638_vm4, %v2134_v44  ;;  %v2520_v36 = vsub.f32 %v2481_v62, %v2328_v10  ;;  %v2139_v55 = vadd.f32 %v2105_v35, %v1947_v17  ;;  %v2203_v35 = vld [vmem:[#allocation2 + $0xd8] sm:$0xff]  ;;  %vm2558_vm4 = vcmp.gt.f32.partialorder %v5849_v47, 0.0 }
 0x33a   :  { %v3086_v32 = vpop.eup %3085  ;;  %v2096_v31 = vpop.xlane.xlu0 %2095  ;;  %3107 = vrcp.f32 %v2429_v50  ;;  %v2394_v48 = vld [vmem:[#allocation4 + $0xd0] sm:$0xff] }
 0x33b   :  { %v3088_v41 = vpop.eup %3087  ;;  %v2267_v25 = vmul.f32 0.6931472, %v3086_v32  ;;  %v2136_v11 = vadd.f32 %v2096_v31, %v1944_v34  ;;  %3109 = vrcp.f32 %v2431_v43  ;;  %v2584_v61 = vmul.f32 -1.0, %v2520_v36  ;;  %2171 = vst.msk [vmem:[#allocation4 + $0xf0] sm:$0xff] %vm6640_vm6, %v2139_v55  ;;  %v2190_v50 = vld [vmem:[#allocation2 + $0x70] sm:$0xff] }
 0x33c   :  { %v3090_v20 = vpop.eup %3089  ;;  %v2485_v28 = vmul.f32 %v3080_v1, %v2394_v48  ;;  %v2239_v12 = vld [vmem:[#allocation3 + $0xf8] sm:$0xff]  ;;  %v2297_v63 = vmul.f32 0.6931472, %v3088_v41  ;;  %v2329_v43 = vadd.f32 %v2291_v29, %v2201_v14  ;;  %v2206_v31 = vld [vmem:[#allocation2 + $0xf0] sm:$0xff]  ;;  %vm2555_vm6 = vcmp.gt.f32.partialorder %v5863_v56, 0.0 }
 0x33d   :  { %v2317_v23 = vadd.f32 %v2267_v25, %v2189_v15  ;;  %v3092_v49 = vpop.eup %3091  ;;  %3111 = vlog2.f32 %v2239_v12  ;;  %2168 = vst.msk [vmem:[#allocation4 + $0xd8] sm:$0xff] %vm6641_vm13, %v2136_v11  ;;  %v2616_v46 = vsel %vm2552_vm7, %v2584_v61, 0.0  ;;  %v2295_v0 = vmul.f32 0.6931472, %v3090_v20  ;;  %v2383_v15 = vld [vmem:[#allocation4 + $0x78] sm:$0xff]  ;;  %vm6648_vm7 = vmmov %vm6623_vm0 }
 0x33e   :  { %v2102_v38 = vpop.xlane.xlu0 %2101  ;;  %v3094_v7 = vpop.eup %3093  ;;  %v2269_v24 = vmul.f32 0.6931472, %v3092_v49  ;;  %v2522_v30 = vsub.f32 %v2485_v28, %v2330_v57  ;;  %2648 = vst.msk [vmem:[%s6003_s6 + $0xc0] sm:$0xff] %vm6642_vm11, %v2616_v46  ;;  %v2396_v1 = vld [vmem:[#allocation4 + $0xe0] sm:$0xff]  ;;  %v2332_v44 = vadd.f32 %v2297_v63, %v2204_v16  ;;  %vm6649_vm13 = vmmov %vm6623_vm0  ;;  %v2207_v56 = vld [vmem:[#allocation2 + $0xf8] sm:$0xff]  ;;  %vm2557_vm11 = vcmp.gt.f32.partialorder %v5889_v60, 0.0 }
 0x33f   :  { %v2509_v6 = vsub.f32 %v2459_v58, %v2317_v23  ;;  %v3096_v18 = vpop.eup %3095  ;;  %v2138_v33 = vadd.f32 %v2102_v38, %v1946_v45  ;;  %v2489_v17 = vmul.f32 %v5902_v51, %v2396_v1  ;;  %v2331_v55 = vadd.f32 %v2295_v0, %v2203_v35  ;;  %v2191_v45 = vld [vmem:[#allocation2 + $0x78] sm:$0xff] }
 0x340   :  { %v3098_v4 = vpop.eup %3097  ;;  %v2318_v53 = vadd.f32 %v2269_v24, %v2190_v50  ;;  %v2586_v19 = vmul.f32 -1.0, %v2522_v30  ;;  %v2393_v10 = vld [vmem:[#allocation4 + $0xc8] sm:$0xff] }
 0x341   :  { %v2573_v54 = vmul.f32 -1.0, %v2509_v6  ;;  %v3100_v27 = vpop.eup %3099  ;;  %v2483_v13 = vmul.f32 %v3094_v7, %v2393_v10  ;;  %2170 = vst.msk [vmem:[#allocation4 + $0xe8] sm:$0xff] %vm6643_vm15, %v2138_v33  ;;  %v2524_v9 = vsub.f32 %v2489_v17, %v2332_v44  ;;  %vm2559_vm15 = vcmp.gt.f32.partialorder %v5896_v42, 0.0 }
 0x342   :  { %v2108_v3 = vpop.xlane.xlu0 %2107  ;;  %v3102_v5 = vpop.eup %3101  ;;  %v2510_v62 = vsub.f32 %v5916_v8, %v2318_v53  ;;  %v2301_v34 = vmul.f32 0.6931472, %v3100_v27  ;;  %v2618_v32 = vsel %vm2554_vm14, %v2586_v19, 0.0  ;;  %v2398_v41 = vld [vmem:[#allocation4 + $0xf0] sm:$0xff]  ;;  %vm6651_vm14 = vmmov %vm6623_vm0 }
 0x343   :  { %v2605_v21 = vsel %vm2541_vm8, %v2573_v54, 0.0  ;;  %v3104_v58 = vpop.eup %3103  ;;  %2650 = vst.msk [vmem:[%s6003_s6 + $0xd0] sm:$0xff] %vm6644_vm5, %v2618_v32  ;;  %v2521_v51 = vsub.f32 %v2483_v13, %v2329_v43  ;;  %v2140_v40 = vadd.f32 %v2108_v3, %v1948_v59  ;;  %v2493_v36 = vmul.f32 %v3096_v18, %v2398_v41 }
 0x344   :  { %2637 = vst.msk [vmem:[%s6003_s6 + $0x68] sm:$0xff] %vm6623_vm0, %v2605_v21  ;;  %v2574_v22 = vmul.f32 -1.0, %v2510_v62  ;;  %v2334_v25 = vadd.f32 %v2301_v34, %v2206_v31  ;;  %v2395_v37 = vld [vmem:[#allocation4 + $0xd8] sm:$0xff]  ;;  %v2299_v48 = vmul.f32 0.6931472, %v3102_v5  ;;  %v2588_v11 = vmul.f32 -1.0, %v2524_v9 }
 0x345   :  { %v2585_v20 = vmul.f32 -1.0, %v2521_v51  ;;  %v2487_v23 = vmul.f32 %v3098_v4, %v2395_v37  ;;  %2172 = vst.msk [vmem:[#allocation4 + $0xf8] sm:$0xff] %vm6645_vm1, %v2140_v40  ;;  %v2463_v7 = vmul.f32 %v3104_v58, %v2383_v15  ;;  %vm2543_vm8 = vcmp.gt.f32.partialorder %v5870_v26, 0.0 }
 0x346   :  { %v3106_v8 = vpop.eup %3105  ;;  %v2606_v57 = vsel %vm2542_vm3, %v2574_v22, 0.0  ;;  %v2526_v12 = vsub.f32 %v2493_v36, %v2334_v25  ;;  %v2620_v49 = vsel %vm2556_vm10, %v2588_v11, 0.0  ;;  %v2333_v24 = vadd.f32 %v2299_v48, %v2205_v39  ;;  %vm6650_vm3 = vmmov %vm6623_vm0 }
 0x347   :  { %v3108_v61 = vpop.eup %3107  ;;  %v2271_v28 = vmul.f32 0.6931472, %v3106_v8  ;;  %2638 = vst.msk [vmem:[%s6003_s6 + $0x70] sm:$0xff] %vm6646_vm9, %v2606_v57  ;;  %v2617_v29 = vsel %vm2553_vm12, %v2585_v20, 0.0  ;;  %v2523_v63 = vsub.f32 %v2487_v23, %v2331_v55  ;;  %vm6652_vm10 = vmmov %vm6623_vm0 }
 0x348   :  { %v3110_v38 = vpop.eup %3109  ;;  %2652 = vst.msk [vmem:[%s6003_s6 + $0xe0] sm:$0xff] %vm6647_vm2, %v2620_v49  ;;  %v2590_v52 = vmul.f32 -1.0, %v2526_v12  ;;  %v2397_v2 = vld [vmem:[#allocation4 + $0xe8] sm:$0xff] }
 0x349   :  { %v2319_v14 = vadd.f32 %v2271_v28, %v2191_v45  ;;  %2649 = vst.msk [vmem:[%s6003_s6 + $0xc8] sm:$0xff] %vm6648_vm7, %v2617_v29  ;;  %v2587_v6 = vmul.f32 -1.0, %v2523_v63  ;;  %v2491_v46 = vmul.f32 %v3108_v61, %v2397_v2 }
 0x34a   :  { %v3112_v30 = vpop.eup %3111  ;;  %v2622_v16 = vsel %vm2558_vm4, %v2590_v52, 0.0 }
 0x34b   :  { %v2511_v18 = vsub.f32 %v2463_v7, %v2319_v14  ;;  %v2303_v50 = vmul.f32 0.6931472, %v3112_v30  ;;  %2654 = vst.msk [vmem:[%s6003_s6 + $0xf0] sm:$0xff] %vm6649_vm13, %v2622_v16  ;;  %v2619_v1 = vsel %vm2555_vm6, %v2587_v6, 0.0  ;;  %v2525_v33 = vsub.f32 %v2491_v46, %v2333_v24 }
 0x34c   :  { %2651 = vst.msk [vmem:[%s6003_s6 + $0xd8] sm:$0xff] %vm6650_vm3, %v2619_v1  ;;  %v2399_v47 = vld [vmem:[#allocation4 + $0xf8] sm:$0xff] }
 0x34d   :  { %v2575_v4 = vmul.f32 -1.0, %v2511_v18  ;;  %v2589_v0 = vmul.f32 -1.0, %v2525_v33  ;;  %v2335_v26 = vadd.f32 %v2303_v50, %v2207_v56  ;;  %v2495_v54 = vmul.f32 %v3110_v38, %v2399_v47 }
 0x34f   :  { %v2607_v53 = vsel %vm2543_vm8, %v2575_v4, 0.0  ;;  %v2621_v19 = vsel %vm2557_vm11, %v2589_v0, 0.0  ;;  %v2527_v10 = vsub.f32 %v2495_v54, %v2335_v26 }
 0x350   :  { %2639 = vst.msk [vmem:[%s6003_s6 + $0x78] sm:$0xff] %vm6651_vm14, %v2607_v53 }
 0x351   :  { %2653 = vst.msk [vmem:[%s6003_s6 + $0xe8] sm:$0xff] %vm6652_vm10, %v2621_v19  ;;  %v2591_v60 = vmul.f32 -1.0, %v2527_v10 }
 0x353   :  { %v2623_v59 = vsel %vm2559_vm15, %v2591_v60, 0.0 }
 0x354   :  { %2655 = vst.msk [vmem:[%s6003_s6 + $0xf8] sm:$0xff] %vm6623_vm0, %v2623_v59 }

</bundles_post_ra>
